<compile_context>
chip_gen: v7x
topology: tpu7x:2x2x1
jax: 0.10.0
libtpu: 0.0.40
codegen_flags: <defaults>
</compile_context>

<pallas_src>
import functools

import jax
import jax.numpy as jnp
from jax import lax
from jax.experimental import pallas as pl
from jax.experimental.pallas import tpu as pltpu


def _round_up(x, m):
    return ((x + m - 1) // m) * m


def _guess_num_tensorcores():
    """v7x has 2 TensorCores per chip; v5e/v6e have 1."""
    try:
        kind = jax.devices()[0].device_kind.lower()
    except Exception:
        return 1
    return 2 if "v7" in kind else 1


def _full_spec(arr):
    zeros = (0,) * arr.ndim
    return pl.BlockSpec(arr.shape, lambda q, _z=zeros: _z)


# ----------------------------------------------------------------------------
# Fused episode kernel (runs once per query tile):
#   encode(support) -> masked pooling -> prototypes -> L2-normalize
#   encode(query tile) -> scaled cosine vs prototypes -> per-point NLL
# ----------------------------------------------------------------------------
def _protonet_kernel(sx_ref, qx_ref, pw_ref, lab_ref,
                     w1_ref, b1_ref, w2_ref, b2_ref,
                     wp_ref, bp_ref, w4_ref, b4_ref,
                     sim_ref, nll_ref, *,
                     bq, n_points, d_ec, output_dim, scaler, eps):
    f32 = jnp.float32
    bf16 = jnp.bfloat16
    d_pad = w4_ref.shape[1]

    def encode(x):
        """(rows, c_in) bf16 -> (rows, d_pad) f32 concatenated features."""
        # feat_level1 (DGCNN stand-in layer 1), lane-placed at [0, d_ec)
        fl1 = jnp.maximum(
            jnp.dot(x, w1_ref[...], preferred_element_type=f32) + b1_ref[...], 0.0)
        # feat_level2 (DGCNN stand-in layer 2)
        fl2 = jnp.maximum(
            jnp.dot(fl1.astype(bf16), w2_ref[...], preferred_element_type=f32)
            + b2_ref[...], 0.0)
        # one packed matmul feeds both consumers of feat_level2:
        #   linear_mapper at lanes [d_ec, d_ec+output_dim),
        #   base_learner hidden layer in the pad lanes [d_feat, ...)
        y = jnp.dot(fl2.astype(bf16), wp_ref[...], preferred_element_type=f32) + bp_ref[...]
        lane = lax.broadcasted_iota(jnp.int32, y.shape, 1)
        mapped = jnp.where((lane >= d_ec) & (lane < d_ec + output_dim), y, 0.0)
        if mapped.shape[1] != d_pad:          # fallback when base1 doesn't fit pad lanes
            mapped = mapped[:, :d_pad]
        # base_learner: relu(hidden) -> conv2 (+ folded BN); zero rows in w4w make
        # the relu on the mapper lanes irrelevant.  Output lane-placed at
        # [d_ec+output_dim, d_feat).
        bl2 = jnp.dot(jnp.maximum(y, 0.0).astype(bf16), w4_ref[...],
                      preferred_element_type=f32) + b4_ref[...]
        return fl1 + mapped + bl2             # concat via lane placement

    # ---- support branch: features -> masked pooling -> prototypes -> normalize
    sfeat = encode(sx_ref[...]).astype(bf16)                          # (S*L, D)
    protos = jnp.dot(pw_ref[...], sfeat, preferred_element_type=f32)  # (C, D)
    psq = jnp.sum(protos * protos, axis=-1, keepdims=True)
    protos_hat = (protos * lax.rsqrt(jnp.maximum(psq, eps * eps))).astype(bf16)

    # ---- query branch: features -> scaled cosine -> cross entropy
    qfeat = encode(qx_ref[...]).astype(bf16)                          # (BQ*L, D)
    dots = lax.dot_general(protos_hat, qfeat, (((1,), (1,)), ((), ())),
                           preferred_element_type=f32)                # (C, BQ*L)
    ones = jnp.ones((1, qfeat.shape[1]), bf16)
    fsq = lax.dot_general(ones, qfeat * qfeat, (((1,), (1,)), ((), ())),
                          preferred_element_type=f32)                 # (1, BQ*L)
    inv_f = lax.rsqrt(jnp.maximum(fsq, eps * eps))
    sim = dots * (inv_f * scaler)                                     # (C, BQ*L)

    # per-query epilogue: lane-aligned slice store + per-point NLL over classes
    for b in range(bq):                                               # static, small
        s = sim[:, b * n_points:(b + 1) * n_points]                   # (C, L)
        sim_ref[b] = s
        m = jnp.max(s, axis=0, keepdims=True)
        z = s - m
        lse = jnp.log(jnp.sum(jnp.exp(z), axis=0, keepdims=True))     # (1, L)
        cls = lax.broadcasted_iota(jnp.int32, s.shape, 0)
        z_lab = jnp.sum(jnp.where(cls == lab_ref[b], z, 0.0), axis=0, keepdims=True)
        nll_ref[b] = lse - z_lab                                      # (1, L)


# ----------------------------------------------------------------------------
# Parameter construction (deterministic, synthetic) + BN folding / lane packing
# ----------------------------------------------------------------------------
def conv_bn_params(key, c_in, c_out, bn=True):
    """1x1 Conv1d weight with eval-mode BatchNorm folded into (weight, shift)."""
    k1, k2, k3, k4, k5, k6 = jax.random.split(key, 6)
    w = jax.random.normal(k1, (c_in, c_out), jnp.float32) / jnp.sqrt(c_in)
    b = 0.02 * jax.random.normal(k2, (c_out,), jnp.float32)
    if bn:
        gamma = 1.0 + 0.1 * jax.random.normal(k3, (c_out,), jnp.float32)
        beta = 0.05 * jax.random.normal(k4, (c_out,), jnp.float32)
        mean = 0.1 * jax.random.normal(k5, (c_out,), jnp.float32)
        var = jnp.abs(1.0 + 0.1 * jax.random.normal(k6, (c_out,), jnp.float32))
        s = gamma / jnp.sqrt(var + 1e-5)
        w = w * s[None, :]
        shift = beta + (b - mean) * s
    else:
        shift = b
    return w, shift.reshape(1, c_out)


def pack_encoder_params(raw, *, d_ec, d_mlp, n_b1, n_b2, output_dim):
    """Pad/pack weights so the fused kernel keeps every intermediate a single
    128-lane column and writes the concatenated feature lane-densely."""
    w1, s1 = raw["enc1"]       # (c_in, d_ec)
    w2, s2 = raw["enc2"]       # (d_ec, d_mlp)
    w3, s3 = raw["base1"]      # (d_mlp, n_b1)
    w4, s4 = raw["base2"]      # (n_b1, n_b2)
    w5 = raw["mapper"]         # (d_mlp, output_dim), no bias / no BN

    d_feat = d_ec + output_dim + n_b2
    d_pad = _round_up(d_feat, 128)
    # base_learner hidden layer lives in the otherwise-unused pad lanes if it fits
    b1_off = d_feat if n_b1 <= d_pad - d_feat else d_pad
    pack_w = _round_up(max(d_pad, b1_off + n_b1), 128)

    w1w = jnp.pad(w1, ((0, 0), (0, d_pad - d_ec)))
    b1w = jnp.pad(s1, ((0, 0), (0, d_pad - d_ec)))
    w2w = jnp.pad(w2, ((0, d_pad - d_ec), (0, 0)))

    wp = jnp.zeros((d_mlp, pack_w), jnp.float32)
    wp = wp.at[:, d_ec:d_ec + output_dim].set(w5)          # linear_mapper
    wp = wp.at[:, b1_off:b1_off + n_b1].set(w3)            # base_learner conv1
    bp = jnp.zeros((1, pack_w), jnp.float32).at[:, b1_off:b1_off + n_b1].set(s3)

    w4w = jnp.zeros((pack_w, d_pad), jnp.float32)
    w4w = w4w.at[b1_off:b1_off + n_b1, d_ec + output_dim:d_feat].set(w4)
    b4w = jnp.zeros((1, d_pad), jnp.float32).at[:, d_ec + output_dim:d_feat].set(s4)

    bf = lambda a: a.astype(jnp.bfloat16)                  # MXU operands in bf16
    return dict(w1w=bf(w1w), b1w=b1w, w2w=bf(w2w), b2w=s2,
                w_pack=bf(wp), b_pack=bp, w4w=bf(w4w), b4w=b4w)


# ----------------------------------------------------------------------------
# ProtoNet forward (glue + the single Pallas kernel)
# ----------------------------------------------------------------------------
def protonet_forward(enc, support_x, support_y, query_x, query_y, *,
                     n_way, k_shot, d_ec, output_dim, scaler=10.0, eps=1e-8):
    # support_x: (n_way, k_shot, C_in, L); support_y: (n_way, k_shot, L)
    # query_x: (Q, C_in, L); query_y: (Q, L) int labels in {0..n_way}
    n_q, c_in, L = query_x.shape
    S = n_way * k_shot
    C = n_way + 1

    # TODO(synk): DGCNN (edge-conv / kNN graph) and SelfAttention were not provided;
    # the encoder is a deterministic pointwise Conv1d+BN stand-in producing
    # feat_level1/feat_level2, and the use_attention=False (linear_mapper) path is used.
    # TODO(synk): feed the encoder directly in NCL layout (contract the channel
    # sublane axis in-kernel) to drop this tiny host transpose; kept here so every
    # matmul in the kernel is a plain 2D MXU dot.
    sx = support_x.reshape(S, c_in, L).transpose(0, 2, 1).reshape(S * L, c_in)
    qx = query_x.transpose(0, 2, 1).reshape(n_q * L, c_in)
    sx = sx.astype(jnp.bfloat16)
    qx = qx.astype(jnp.bfloat16)

    # masked-average-pooling + prototype-averaging weights (tiny glue on the masks):
    # prototypes == pool_w @ support_features is the whole reduction.
    fg = support_y.reshape(S, L).astype(jnp.float32)
    bg = 1.0 - fg                                          # logical_not of binary mask
    fg_w = fg / ((jnp.sum(fg, axis=-1, keepdims=True) + 1e-5) * k_shot)
    bg_w = bg / ((jnp.sum(bg, axis=-1, keepdims=True) + 1e-5) * (n_way * k_shot))
    sel = (jnp.arange(S) // k_shot == jnp.arange(n_way)[:, None]).astype(jnp.float32)
    w_fg = (sel[:, :, None] * fg_w[None]).reshape(n_way, S * L)
    pool_w = jnp.concatenate([bg_w.reshape(1, S * L), w_fg], axis=0)   # (n_way+1, S*L)
    pool_w = pool_w.astype(jnp.bfloat16)

    labels = query_y.reshape(n_q, 1, L).astype(jnp.int32)

    # grid == TensorCore count (1 on v5e/v6e, 2 on v7x); queries batched per step.
    n_tc = _guess_num_tensorcores()
    nq_tiles = n_tc if (n_q % n_tc == 0 and L % 128 == 0) else 1
    bq = n_q // nq_tiles

    kern = functools.partial(_protonet_kernel, bq=bq, n_points=L,
                             d_ec=d_ec, output_dim=output_dim,
                             scaler=scaler, eps=eps)

    sim, nll = pl.pallas_call(
        kern,
        out_shape=(jax.ShapeDtypeStruct((n_q, C, L), jnp.float32),
                   jax.ShapeDtypeStruct((n_q, 1, L), jnp.float32)),
        grid=(nq_tiles,),
        in_specs=[
            _full_spec(sx),
            pl.BlockSpec((bq * L, c_in), lambda q: (q, 0)),
            _full_spec(pool_w),
            pl.BlockSpec((bq, 1, L), lambda q: (q, 0, 0)),
            _full_spec(enc["w1w"]), _full_spec(enc["b1w"]),
            _full_spec(enc["w2w"]), _full_spec(enc["b2w"]),
            _full_spec(enc["w_pack"]), _full_spec(enc["b_pack"]),
            _full_spec(enc["w4w"]), _full_spec(enc["b4w"]),
        ],
        out_specs=(pl.BlockSpec((bq, C, L), lambda q: (q, 0, 0)),
                   pl.BlockSpec((bq, 1, L), lambda q: (q, 0, 0))),
        compiler_params=pltpu.CompilerParams(dimension_semantics=("parallel",)),
    )(sx, qx, pool_w, labels,
      enc["w1w"], enc["b1w"], enc["w2w"], enc["b2w"],
      enc["w_pack"], enc["b_pack"], enc["w4w"], enc["b4w"])

    loss = jnp.sum(nll) / (n_q * L)                        # CE mean reduction
    return sim, loss


# ----------------------------------------------------------------------------
if __name__ == "__main__":
    # Small synthetic "args": n_way=2, k_shot=2, pc_in_dim=8, pc_npts=128,
    # edgeconv feature dim (stand-in)=24, dgcnn_mlp_widths[-1]=64,
    # base_widths=[32, 16], output_dim=32, use_attention=False.
    n_way, k_shot, n_queries = 2, 2, 2
    c_in, n_points = 8, 128
    d_ec, d_mlp = 24, 64
    base_widths = (32, 16)
    output_dim = 32

    key = jax.random.PRNGKey(0)
    ks = jax.random.split(key, 10)
    raw = {
        "enc1": conv_bn_params(ks[0], c_in, d_ec, bn=True),
        "enc2": conv_bn_params(ks[1], d_ec, d_mlp, bn=True),
        "base1": conv_bn_params(ks[2], d_mlp, base_widths[0], bn=True),
        "base2": conv_bn_params(ks[3], base_widths[0], base_widths[1], bn=True),
        "mapper": jax.random.normal(ks[4], (d_mlp, output_dim), jnp.float32) / jnp.sqrt(d_mlp),
    }
    enc = pack_encoder_params(raw, d_ec=d_ec, d_mlp=d_mlp,
                              n_b1=base_widths[0], n_b2=base_widths[1],
                              output_dim=output_dim)

    support_x = jax.random.normal(ks[5], (n_way, k_shot, c_in, n_points), jnp.float32)
    support_y = (jax.random.uniform(ks[6], (n_way, k_shot, n_points)) > 0.5).astype(jnp.float32)
    query_x = jax.random.normal(ks[7], (n_queries, c_in, n_points), jnp.float32)
    query_y = jax.random.randint(ks[8], (n_queries, n_points), 0, n_way + 1, jnp.int32)

    fwd = jax.jit(functools.partial(protonet_forward, n_way=n_way, k_shot=k_shot,
                                    d_ec=d_ec, output_dim=output_dim))
    query_pred, loss = fwd(enc, support_x, support_y, query_x, query_y)
    jax.block_until_ready((query_pred, loss))
    assert query_pred.shape == (n_queries, n_way + 1, n_points)
    assert loss.shape == ()
    assert bool(jnp.isfinite(loss)) and bool(jnp.all(jnp.isfinite(query_pred)))
    print("KERNEL_OK")
</pallas_src>

<mosaic_0001>
module attributes {stable_mosaic.version = 11 : i64} {
  func.func @_protonet_kernel(%arg0: i32, %arg1: memref<512x8xbf16, #tpu.memory_space<vmem>>, %arg2: memref<256x8xbf16, #tpu.memory_space<vmem>>, %arg3: memref<3x512xbf16, #tpu.memory_space<vmem>>, %arg4: memref<2x1x128xi32, #tpu.memory_space<vmem>>, %arg5: memref<8x128xbf16, #tpu.memory_space<vmem>>, %arg6: memref<1x128xf32, #tpu.memory_space<vmem>>, %arg7: memref<128x64xbf16, #tpu.memory_space<vmem>>, %arg8: memref<1x64xf32, #tpu.memory_space<vmem>>, %arg9: memref<64x128xbf16, #tpu.memory_space<vmem>>, %arg10: memref<1x128xf32, #tpu.memory_space<vmem>>, %arg11: memref<128x128xbf16, #tpu.memory_space<vmem>>, %arg12: memref<1x128xf32, #tpu.memory_space<vmem>>, %arg13: memref<2x3x128xf32, #tpu.memory_space<vmem>>, %arg14: memref<2x1x128xf32, #tpu.memory_space<vmem>>) attributes {dimension_semantics = [#tpu.dimension_semantics<parallel>], iteration_bounds = array<i64: 1>, scalar_prefetch = 0 : i64, scratch_operands = 0 : i64, tpu.core_type = #tpu.core_type<tc>, window_params = [{pipeline_mode = #tpu.pipeline_mode<synchronous>, transform_indices = @transform_0, window_bounds = array<i64: 512, 8>}, {transform_indices = @transform_1, window_bounds = array<i64: 256, 8>}, {pipeline_mode = #tpu.pipeline_mode<synchronous>, transform_indices = @transform_2, window_bounds = array<i64: 3, 512>}, {transform_indices = @transform_3, window_bounds = array<i64: 2, 1, 128>}, {pipeline_mode = #tpu.pipeline_mode<synchronous>, transform_indices = @transform_4, window_bounds = array<i64: 8, 128>}, {pipeline_mode = #tpu.pipeline_mode<synchronous>, transform_indices = @transform_5, window_bounds = array<i64: 1, 128>}, {pipeline_mode = #tpu.pipeline_mode<synchronous>, transform_indices = @transform_6, window_bounds = array<i64: 128, 64>}, {pipeline_mode = #tpu.pipeline_mode<synchronous>, transform_indices = @transform_7, window_bounds = array<i64: 1, 64>}, {pipeline_mode = #tpu.pipeline_mode<synchronous>, transform_indices = @transform_8, window_bounds = array<i64: 64, 128>}, {pipeline_mode = #tpu.pipeline_mode<synchronous>, transform_indices = @transform_9, window_bounds = array<i64: 1, 128>}, {pipeline_mode = #tpu.pipeline_mode<synchronous>, transform_indices = @transform_10, window_bounds = array<i64: 128, 128>}, {pipeline_mode = #tpu.pipeline_mode<synchronous>, transform_indices = @transform_11, window_bounds = array<i64: 1, 128>}, {transform_indices = @transform_12, window_bounds = array<i64: 2, 3, 128>}, {transform_indices = @transform_13, window_bounds = array<i64: 2, 1, 128>}]} {
    %c0 = arith.constant 0 : index
    %c0_0 = arith.constant 0 : index
    %0 = vector.load %arg1[%c0, %c0_0] : memref<512x8xbf16, #tpu.memory_space<vmem>>, vector<512x8xbf16>
    %c0_1 = arith.constant 0 : index
    %c0_2 = arith.constant 0 : index
    %1 = vector.load %arg5[%c0_1, %c0_2] : memref<8x128xbf16, #tpu.memory_space<vmem>>, vector<8x128xbf16>
    %cst = arith.constant dense<0.000000e+00> : vector<512x128xf32>
    %2 = tpu.matmul %0, %1, %cst {dimension_numbers = #tpu.dot_dimension_numbers<[1], [0], [0], [1], [0, 0, 1, 1], [], []>} : vector<512x8xbf16>, vector<8x128xbf16>, vector<512x128xf32> -> vector<512x128xf32>
    %c0_3 = arith.constant 0 : index
    %c0_4 = arith.constant 0 : index
    %3 = vector.load %arg6[%c0_3, %c0_4] : memref<1x128xf32, #tpu.memory_space<vmem>>, vector<1x128xf32>
    %4 = vector.broadcast %3 : vector<1x128xf32> to vector<512x128xf32>
    %5 = arith.addf %2, %4 : vector<512x128xf32>
    %cst_5 = arith.constant 0.000000e+00 : f32
    %6 = vector.broadcast %cst_5 : f32 to vector<512x128xf32>
    %7 = arith.maximumf %5, %6 : vector<512x128xf32>
    %8 = arith.truncf %7 : vector<512x128xf32> to vector<512x128xbf16>
    %c0_6 = arith.constant 0 : index
    %c0_7 = arith.constant 0 : index
    %9 = vector.load %arg7[%c0_6, %c0_7] : memref<128x64xbf16, #tpu.memory_space<vmem>>, vector<128x64xbf16>
    %cst_8 = arith.constant dense<0.000000e+00> : vector<512x64xf32>
    %10 = tpu.matmul %8, %9, %cst_8 {dimension_numbers = #tpu.dot_dimension_numbers<[1], [0], [0], [1], [0, 0, 1, 1], [], []>} : vector<512x128xbf16>, vector<128x64xbf16>, vector<512x64xf32> -> vector<512x64xf32>
    %c0_9 = arith.constant 0 : index
    %c0_10 = arith.constant 0 : index
    %11 = vector.load %arg8[%c0_9, %c0_10] : memref<1x64xf32, #tpu.memory_space<vmem>>, vector<1x64xf32>
    %12 = vector.broadcast %11 : vector<1x64xf32> to vector<512x64xf32>
    %13 = arith.addf %10, %12 : vector<512x64xf32>
    %cst_11 = arith.constant 0.000000e+00 : f32
    %14 = vector.broadcast %cst_11 : f32 to vector<512x64xf32>
    %15 = arith.maximumf %13, %14 : vector<512x64xf32>
    %16 = arith.truncf %15 : vector<512x64xf32> to vector<512x64xbf16>
    %c0_12 = arith.constant 0 : index
    %c0_13 = arith.constant 0 : index
    %17 = vector.load %arg9[%c0_12, %c0_13] : memref<64x128xbf16, #tpu.memory_space<vmem>>, vector<64x128xbf16>
    %cst_14 = arith.constant dense<0.000000e+00> : vector<512x128xf32>
    %18 = tpu.matmul %16, %17, %cst_14 {dimension_numbers = #tpu.dot_dimension_numbers<[1], [0], [0], [1], [0, 0, 1, 1], [], []>} : vector<512x64xbf16>, vector<64x128xbf16>, vector<512x128xf32> -> vector<512x128xf32>
    %c0_15 = arith.constant 0 : index
    %c0_16 = arith.constant 0 : index
    %19 = vector.load %arg10[%c0_15, %c0_16] : memref<1x128xf32, #tpu.memory_space<vmem>>, vector<1x128xf32>
    %20 = vector.broadcast %19 : vector<1x128xf32> to vector<512x128xf32>
    %21 = arith.addf %18, %20 : vector<512x128xf32>
    %22 = tpu.iota {dimensions = array<i32: 1>} : vector<512x128xi32>
    %c24_i32 = arith.constant 24 : i32
    %23 = vector.broadcast %c24_i32 : i32 to vector<512x128xi32>
    %24 = arith.cmpi sge, %22, %23 : vector<512x128xi32>
    %c56_i32 = arith.constant 56 : i32
    %25 = vector.broadcast %c56_i32 : i32 to vector<512x128xi32>
    %26 = arith.cmpi slt, %22, %25 : vector<512x128xi32>
    %27 = arith.andi %24, %26 : vector<512x128xi1>
    %cst_17 = arith.constant 0.000000e+00 : f32
    %28 = vector.broadcast %cst_17 : f32 to vector<512x128xf32>
    %29 = arith.select %27, %21, %28 : vector<512x128xi1>, vector<512x128xf32>
    %cst_18 = arith.constant 0.000000e+00 : f32
    %30 = vector.broadcast %cst_18 : f32 to vector<512x128xf32>
    %31 = arith.maximumf %21, %30 : vector<512x128xf32>
    %32 = arith.truncf %31 : vector<512x128xf32> to vector<512x128xbf16>
    %c0_19 = arith.constant 0 : index
    %c0_20 = arith.constant 0 : index
    %33 = vector.load %arg11[%c0_19, %c0_20] : memref<128x128xbf16, #tpu.memory_space<vmem>>, vector<128x128xbf16>
    %cst_21 = arith.constant dense<0.000000e+00> : vector<512x128xf32>
    %34 = tpu.matmul %32, %33, %cst_21 {dimension_numbers = #tpu.dot_dimension_numbers<[1], [0], [0], [1], [0, 0, 1, 1], [], []>} : vector<512x128xbf16>, vector<128x128xbf16>, vector<512x128xf32> -> vector<512x128xf32>
    %c0_22 = arith.constant 0 : index
    %c0_23 = arith.constant 0 : index
    %35 = vector.load %arg12[%c0_22, %c0_23] : memref<1x128xf32, #tpu.memory_space<vmem>>, vector<1x128xf32>
    %36 = vector.broadcast %35 : vector<1x128xf32> to vector<512x128xf32>
    %37 = arith.addf %34, %36 : vector<512x128xf32>
    %38 = arith.addf %7, %29 : vector<512x128xf32>
    %39 = arith.addf %38, %37 : vector<512x128xf32>
    %40 = arith.truncf %39 : vector<512x128xf32> to vector<512x128xbf16>
    %c0_24 = arith.constant 0 : index
    %c0_25 = arith.constant 0 : index
    %41 = vector.load %arg3[%c0_24, %c0_25] : memref<3x512xbf16, #tpu.memory_space<vmem>>, vector<3x512xbf16>
    %cst_26 = arith.constant dense<0.000000e+00> : vector<3x128xf32>
    %42 = tpu.matmul %41, %40, %cst_26 {dimension_numbers = #tpu.dot_dimension_numbers<[1], [0], [0], [1], [0, 0, 1, 1], [], []>} : vector<3x512xbf16>, vector<512x128xbf16>, vector<3x128xf32> -> vector<3x128xf32>
    %43 = arith.mulf %42, %42 : vector<3x128xf32>
    %cst_27 = arith.constant dense<0.000000e+00> : vector<3xf32>
    %44 = vector.multi_reduction <add>, %43, %cst_27 [1] : vector<3x128xf32> to vector<3xf32>
    %45 = vector.shape_cast %44 : vector<3xf32> to vector<3x1xf32>
    %cst_28 = arith.constant 1.000000e-16 : f32
    %46 = vector.broadcast %cst_28 : f32 to vector<3x1xf32>
    %47 = arith.maximumf %45, %46 : vector<3x1xf32>
    %48 = math.rsqrt %47 : vector<3x1xf32>
    %49 = vector.broadcast %48 : vector<3x1xf32> to vector<3x128xf32>
    %50 = arith.mulf %42, %49 : vector<3x128xf32>
    %51 = arith.truncf %50 : vector<3x128xf32> to vector<3x128xbf16>
    %c0_29 = arith.constant 0 : index
    %c0_30 = arith.constant 0 : index
    %52 = vector.load %arg2[%c0_29, %c0_30] : memref<256x8xbf16, #tpu.memory_space<vmem>>, vector<256x8xbf16>
    %c0_31 = arith.constant 0 : index
    %c0_32 = arith.constant 0 : index
    %53 = vector.load %arg5[%c0_31, %c0_32] : memref<8x128xbf16, #tpu.memory_space<vmem>>, vector<8x128xbf16>
    %cst_33 = arith.constant dense<0.000000e+00> : vector<256x128xf32>
    %54 = tpu.matmul %52, %53, %cst_33 {dimension_numbers = #tpu.dot_dimension_numbers<[1], [0], [0], [1], [0, 0, 1, 1], [], []>} : vector<256x8xbf16>, vector<8x128xbf16>, vector<256x128xf32> -> vector<256x128xf32>
    %c0_34 = arith.constant 0 : index
    %c0_35 = arith.constant 0 : index
    %55 = vector.load %arg6[%c0_34, %c0_35] : memref<1x128xf32, #tpu.memory_space<vmem>>, vector<1x128xf32>
    %56 = vector.broadcast %55 : vector<1x128xf32> to vector<256x128xf32>
    %57 = arith.addf %54, %56 : vector<256x128xf32>
    %cst_36 = arith.constant 0.000000e+00 : f32
    %58 = vector.broadcast %cst_36 : f32 to vector<256x128xf32>
    %59 = arith.maximumf %57, %58 : vector<256x128xf32>
    %60 = arith.truncf %59 : vector<256x128xf32> to vector<256x128xbf16>
    %c0_37 = arith.constant 0 : index
    %c0_38 = arith.constant 0 : index
    %61 = vector.load %arg7[%c0_37, %c0_38] : memref<128x64xbf16, #tpu.memory_space<vmem>>, vector<128x64xbf16>
    %cst_39 = arith.constant dense<0.000000e+00> : vector<256x64xf32>
    %62 = tpu.matmul %60, %61, %cst_39 {dimension_numbers = #tpu.dot_dimension_numbers<[1], [0], [0], [1], [0, 0, 1, 1], [], []>} : vector<256x128xbf16>, vector<128x64xbf16>, vector<256x64xf32> -> vector<256x64xf32>
    %c0_40 = arith.constant 0 : index
    %c0_41 = arith.constant 0 : index
    %63 = vector.load %arg8[%c0_40, %c0_41] : memref<1x64xf32, #tpu.memory_space<vmem>>, vector<1x64xf32>
    %64 = vector.broadcast %63 : vector<1x64xf32> to vector<256x64xf32>
    %65 = arith.addf %62, %64 : vector<256x64xf32>
    %cst_42 = arith.constant 0.000000e+00 : f32
    %66 = vector.broadcast %cst_42 : f32 to vector<256x64xf32>
    %67 = arith.maximumf %65, %66 : vector<256x64xf32>
    %68 = arith.truncf %67 : vector<256x64xf32> to vector<256x64xbf16>
    %c0_43 = arith.constant 0 : index
    %c0_44 = arith.constant 0 : index
    %69 = vector.load %arg9[%c0_43, %c0_44] : memref<64x128xbf16, #tpu.memory_space<vmem>>, vector<64x128xbf16>
    %cst_45 = arith.constant dense<0.000000e+00> : vector<256x128xf32>
    %70 = tpu.matmul %68, %69, %cst_45 {dimension_numbers = #tpu.dot_dimension_numbers<[1], [0], [0], [1], [0, 0, 1, 1], [], []>} : vector<256x64xbf16>, vector<64x128xbf16>, vector<256x128xf32> -> vector<256x128xf32>
    %c0_46 = arith.constant 0 : index
    %c0_47 = arith.constant 0 : index
    %71 = vector.load %arg10[%c0_46, %c0_47] : memref<1x128xf32, #tpu.memory_space<vmem>>, vector<1x128xf32>
    %72 = vector.broadcast %71 : vector<1x128xf32> to vector<256x128xf32>
    %73 = arith.addf %70, %72 : vector<256x128xf32>
    %74 = tpu.iota {dimensions = array<i32: 1>} : vector<256x128xi32>
    %c24_i32_48 = arith.constant 24 : i32
    %75 = vector.broadcast %c24_i32_48 : i32 to vector<256x128xi32>
    %76 = arith.cmpi sge, %74, %75 : vector<256x128xi32>
    %c56_i32_49 = arith.constant 56 : i32
    %77 = vector.broadcast %c56_i32_49 : i32 to vector<256x128xi32>
    %78 = arith.cmpi slt, %74, %77 : vector<256x128xi32>
    %79 = arith.andi %76, %78 : vector<256x128xi1>
    %cst_50 = arith.constant 0.000000e+00 : f32
    %80 = vector.broadcast %cst_50 : f32 to vector<256x128xf32>
    %81 = arith.select %79, %73, %80 : vector<256x128xi1>, vector<256x128xf32>
    %cst_51 = arith.constant 0.000000e+00 : f32
    %82 = vector.broadcast %cst_51 : f32 to vector<256x128xf32>
    %83 = arith.maximumf %73, %82 : vector<256x128xf32>
    %84 = arith.truncf %83 : vector<256x128xf32> to vector<256x128xbf16>
    %c0_52 = arith.constant 0 : index
    %c0_53 = arith.constant 0 : index
    %85 = vector.load %arg11[%c0_52, %c0_53] : memref<128x128xbf16, #tpu.memory_space<vmem>>, vector<128x128xbf16>
    %cst_54 = arith.constant dense<0.000000e+00> : vector<256x128xf32>
    %86 = tpu.matmul %84, %85, %cst_54 {dimension_numbers = #tpu.dot_dimension_numbers<[1], [0], [0], [1], [0, 0, 1, 1], [], []>} : vector<256x128xbf16>, vector<128x128xbf16>, vector<256x128xf32> -> vector<256x128xf32>
    %c0_55 = arith.constant 0 : index
    %c0_56 = arith.constant 0 : index
    %87 = vector.load %arg12[%c0_55, %c0_56] : memref<1x128xf32, #tpu.memory_space<vmem>>, vector<1x128xf32>
    %88 = vector.broadcast %87 : vector<1x128xf32> to vector<256x128xf32>
    %89 = arith.addf %86, %88 : vector<256x128xf32>
    %90 = arith.addf %59, %81 : vector<256x128xf32>
    %91 = arith.addf %90, %89 : vector<256x128xf32>
    %92 = arith.truncf %91 : vector<256x128xf32> to vector<256x128xbf16>
    %cst_57 = arith.constant dense<0.000000e+00> : vector<3x256xf32>
    %93 = tpu.matmul %51, %92, %cst_57 {dimension_numbers = #tpu.dot_dimension_numbers<[1], [1], [0], [0], [0, 0, 1, 0], [], []>} : vector<3x128xbf16>, vector<256x128xbf16>, vector<3x256xf32> -> vector<3x256xf32>
    %cst_58 = arith.constant 1.000000e+00 : bf16
    %94 = vector.broadcast %cst_58 : bf16 to vector<1x128xbf16>
    %95 = arith.mulf %92, %92 : vector<256x128xbf16>
    %cst_59 = arith.constant dense<0.000000e+00> : vector<1x256xf32>
    %96 = tpu.matmul %94, %95, %cst_59 {dimension_numbers = #tpu.dot_dimension_numbers<[1], [1], [0], [0], [0, 0, 1, 0], [], []>} : vector<1x128xbf16>, vector<256x128xbf16>, vector<1x256xf32> -> vector<1x256xf32>
    %cst_60 = arith.constant 1.000000e-16 : f32
    %97 = vector.broadcast %cst_60 : f32 to vector<1x256xf32>
    %98 = arith.maximumf %96, %97 : vector<1x256xf32>
    %99 = math.rsqrt %98 : vector<1x256xf32>
    %cst_61 = arith.constant 1.000000e+01 : f32
    %100 = vector.broadcast %cst_61 : f32 to vector<1x256xf32>
    %101 = arith.mulf %99, %100 : vector<1x256xf32>
    %102 = vector.broadcast %101 : vector<1x256xf32> to vector<3x256xf32>
    %103 = arith.mulf %93, %102 : vector<3x256xf32>
    %104 = vector.extract_strided_slice %103 {offsets = [0, 0], sizes = [3, 128], strides = [1, 1]} : vector<3x256xf32> to vector<3x128xf32>
    %c0_62 = arith.constant 0 : index
    %c0_63 = arith.constant 0 : index
    %c0_64 = arith.constant 0 : index
    %105 = vector.load %arg13[%c0_62, %c0_63, %c0_64] : memref<2x3x128xf32, #tpu.memory_space<vmem>>, vector<1x3x128xf32>
    %106 = vector.shape_cast %105 : vector<1x3x128xf32> to vector<3x128xf32>
    %107 = vector.shape_cast %104 : vector<3x128xf32> to vector<1x3x128xf32>
    tpu.vector_store %arg13[%c0_62, %c0_63, %c0_64], %107 {strides = array<i32>} : memref<2x3x128xf32, #tpu.memory_space<vmem>>, vector<1x3x128xf32>,
    %cst_65 = arith.constant dense<0xFF800000> : vector<128xf32>
    %108 = vector.multi_reduction <maximumf>, %104, %cst_65 [0] : vector<3x128xf32> to vector<128xf32>
    %109 = vector.shape_cast %108 : vector<128xf32> to vector<1x128xf32>
    %110 = vector.broadcast %109 : vector<1x128xf32> to vector<3x128xf32>
    %111 = arith.subf %104, %110 : vector<3x128xf32>
    %112 = math.exp %111 : vector<3x128xf32>
    %cst_66 = arith.constant dense<0.000000e+00> : vector<128xf32>
    %113 = vector.multi_reduction <add>, %112, %cst_66 [0] : vector<3x128xf32> to vector<128xf32>
    %114 = vector.shape_cast %113 : vector<128xf32> to vector<1x128xf32>
    %115 = math.log %114 : vector<1x128xf32>
    %116 = tpu.iota {dimensions = array<i32: 0>} : vector<3x128xi32>
    %c0_67 = arith.constant 0 : index
    %c0_68 = arith.constant 0 : index
    %c0_69 = arith.constant 0 : index
    %117 = vector.load %arg4[%c0_67, %c0_68, %c0_69] : memref<2x1x128xi32, #tpu.memory_space<vmem>>, vector<1x1x128xi32>
    %118 = vector.shape_cast %117 : vector<1x1x128xi32> to vector<1x128xi32>
    %119 = vector.broadcast %118 : vector<1x128xi32> to vector<3x128xi32>
    %120 = arith.cmpi eq, %116, %119 : vector<3x128xi32>
    %cst_70 = arith.constant 0.000000e+00 : f32
    %121 = vector.broadcast %cst_70 : f32 to vector<3x128xf32>
    %122 = arith.select %120, %111, %121 : vector<3x128xi1>, vector<3x128xf32>
    %cst_71 = arith.constant dense<0.000000e+00> : vector<128xf32>
    %123 = vector.multi_reduction <add>, %122, %cst_71 [0] : vector<3x128xf32> to vector<128xf32>
    %124 = vector.shape_cast %123 : vector<128xf32> to vector<1x128xf32>
    %125 = arith.subf %115, %124 : vector<1x128xf32>
    %c0_72 = arith.constant 0 : index
    %c0_73 = arith.constant 0 : index
    %c0_74 = arith.constant 0 : index
    %126 = vector.load %arg14[%c0_72, %c0_73, %c0_74] : memref<2x1x128xf32, #tpu.memory_space<vmem>>, vector<1x1x128xf32>
    %127 = vector.shape_cast %126 : vector<1x1x128xf32> to vector<1x128xf32>
    %128 = vector.shape_cast %125 : vector<1x128xf32> to vector<1x1x128xf32>
    tpu.vector_store %arg14[%c0_72, %c0_73, %c0_74], %128 {strides = array<i32>} : memref<2x1x128xf32, #tpu.memory_space<vmem>>, vector<1x1x128xf32>,
    %129 = vector.extract_strided_slice %103 {offsets = [0, 128], sizes = [3, 128], strides = [1, 1]} : vector<3x256xf32> to vector<3x128xf32>
    %c1 = arith.constant 1 : index
    %c0_75 = arith.constant 0 : index
    %c0_76 = arith.constant 0 : index
    %130 = vector.load %arg13[%c1, %c0_75, %c0_76] : memref<2x3x128xf32, #tpu.memory_space<vmem>>, vector<1x3x128xf32>
    %131 = vector.shape_cast %130 : vector<1x3x128xf32> to vector<3x128xf32>
    %132 = vector.shape_cast %129 : vector<3x128xf32> to vector<1x3x128xf32>
    tpu.vector_store %arg13[%c1, %c0_75, %c0_76], %132 {strides = array<i32>} : memref<2x3x128xf32, #tpu.memory_space<vmem>>, vector<1x3x128xf32>,
    %cst_77 = arith.constant dense<0xFF800000> : vector<128xf32>
    %133 = vector.multi_reduction <maximumf>, %129, %cst_77 [0] : vector<3x128xf32> to vector<128xf32>
    %134 = vector.shape_cast %133 : vector<128xf32> to vector<1x128xf32>
    %135 = vector.broadcast %134 : vector<1x128xf32> to vector<3x128xf32>
    %136 = arith.subf %129, %135 : vector<3x128xf32>
    %137 = math.exp %136 : vector<3x128xf32>
    %cst_78 = arith.constant dense<0.000000e+00> : vector<128xf32>
    %138 = vector.multi_reduction <add>, %137, %cst_78 [0] : vector<3x128xf32> to vector<128xf32>
    %139 = vector.shape_cast %138 : vector<128xf32> to vector<1x128xf32>
    %140 = math.log %139 : vector<1x128xf32>
    %141 = tpu.iota {dimensions = array<i32: 0>} : vector<3x128xi32>
    %c1_79 = arith.constant 1 : index
    %c0_80 = arith.constant 0 : index
    %c0_81 = arith.constant 0 : index
    %142 = vector.load %arg4[%c1_79, %c0_80, %c0_81] : memref<2x1x128xi32, #tpu.memory_space<vmem>>, vector<1x1x128xi32>
    %143 = vector.shape_cast %142 : vector<1x1x128xi32> to vector<1x128xi32>
    %144 = vector.broadcast %143 : vector<1x128xi32> to vector<3x128xi32>
    %145 = arith.cmpi eq, %141, %144 : vector<3x128xi32>
    %cst_82 = arith.constant 0.000000e+00 : f32
    %146 = vector.broadcast %cst_82 : f32 to vector<3x128xf32>
    %147 = arith.select %145, %136, %146 : vector<3x128xi1>, vector<3x128xf32>
    %cst_83 = arith.constant dense<0.000000e+00> : vector<128xf32>
    %148 = vector.multi_reduction <add>, %147, %cst_83 [0] : vector<3x128xf32> to vector<128xf32>
    %149 = vector.shape_cast %148 : vector<128xf32> to vector<1x128xf32>
    %150 = arith.subf %140, %149 : vector<1x128xf32>
    %c1_84 = arith.constant 1 : index
    %c0_85 = arith.constant 0 : index
    %c0_86 = arith.constant 0 : index
    %151 = vector.load %arg14[%c1_84, %c0_85, %c0_86] : memref<2x1x128xf32, #tpu.memory_space<vmem>>, vector<1x1x128xf32>
    %152 = vector.shape_cast %151 : vector<1x1x128xf32> to vector<1x128xf32>
    %153 = vector.shape_cast %150 : vector<1x128xf32> to vector<1x1x128xf32>
    tpu.vector_store %arg14[%c1_84, %c0_85, %c0_86], %153 {strides = array<i32>} : memref<2x1x128xf32, #tpu.memory_space<vmem>>, vector<1x1x128xf32>,
    return
  }
  func.func @transform_0(%arg0: i32) -> (i32, i32) {
    %c0_i32 = arith.constant 0 : i32
    %c0_i32_0 = arith.constant 0 : i32
    %c0_i32_1 = arith.constant 0 : i32
    return %c0_i32, %c0_i32_0 : i32, i32
  }
  func.func @transform_1(%arg0: i32) -> (i32, i32) {
    %c0_i32 = arith.constant 0 : i32
    %c0_i32_0 = arith.constant 0 : i32
    return %arg0, %c0_i32 : i32, i32
  }
  func.func @transform_2(%arg0: i32) -> (i32, i32) {
    %c0_i32 = arith.constant 0 : i32
    %c0_i32_0 = arith.constant 0 : i32
    %c0_i32_1 = arith.constant 0 : i32
    return %c0_i32, %c0_i32_0 : i32, i32
  }
  func.func @transform_3(%arg0: i32) -> (i32, i32, i32) {
    %c0_i32 = arith.constant 0 : i32
    %c0_i32_0 = arith.constant 0 : i32
    %c0_i32_1 = arith.constant 0 : i32
    return %arg0, %c0_i32, %c0_i32_0 : i32, i32, i32
  }
  func.func @transform_4(%arg0: i32) -> (i32, i32) {
    %c0_i32 = arith.constant 0 : i32
    %c0_i32_0 = arith.constant 0 : i32
    %c0_i32_1 = arith.constant 0 : i32
    return %c0_i32, %c0_i32_0 : i32, i32
  }
  func.func @transform_5(%arg0: i32) -> (i32, i32) {
    %c0_i32 = arith.constant 0 : i32
    %c0_i32_0 = arith.constant 0 : i32
    %c0_i32_1 = arith.constant 0 : i32
    return %c0_i32, %c0_i32_0 : i32, i32
  }
  func.func @transform_6(%arg0: i32) -> (i32, i32) {
    %c0_i32 = arith.constant 0 : i32
    %c0_i32_0 = arith.constant 0 : i32
    %c0_i32_1 = arith.constant 0 : i32
    return %c0_i32, %c0_i32_0 : i32, i32
  }
  func.func @transform_7(%arg0: i32) -> (i32, i32) {
    %c0_i32 = arith.constant 0 : i32
    %c0_i32_0 = arith.constant 0 : i32
    %c0_i32_1 = arith.constant 0 : i32
    return %c0_i32, %c0_i32_0 : i32, i32
  }
  func.func @transform_8(%arg0: i32) -> (i32, i32) {
    %c0_i32 = arith.constant 0 : i32
    %c0_i32_0 = arith.constant 0 : i32
    %c0_i32_1 = arith.constant 0 : i32
    return %c0_i32, %c0_i32_0 : i32, i32
  }
  func.func @transform_9(%arg0: i32) -> (i32, i32) {
    %c0_i32 = arith.constant 0 : i32
    %c0_i32_0 = arith.constant 0 : i32
    %c0_i32_1 = arith.constant 0 : i32
    return %c0_i32, %c0_i32_0 : i32, i32
  }
  func.func @transform_10(%arg0: i32) -> (i32, i32) {
    %c0_i32 = arith.constant 0 : i32
    %c0_i32_0 = arith.constant 0 : i32
    %c0_i32_1 = arith.constant 0 : i32
    return %c0_i32, %c0_i32_0 : i32, i32
  }
  func.func @transform_11(%arg0: i32) -> (i32, i32) {
    %c0_i32 = arith.constant 0 : i32
    %c0_i32_0 = arith.constant 0 : i32
    %c0_i32_1 = arith.constant 0 : i32
    return %c0_i32, %c0_i32_0 : i32, i32
  }
  func.func @transform_12(%arg0: i32) -> (i32, i32, i32) {
    %c0_i32 = arith.constant 0 : i32
    %c0_i32_0 = arith.constant 0 : i32
    %c0_i32_1 = arith.constant 0 : i32
    return %arg0, %c0_i32, %c0_i32_0 : i32, i32, i32
  }
  func.func @transform_13(%arg0: i32) -> (i32, i32, i32) {
    %c0_i32 = arith.constant 0 : i32
    %c0_i32_0 = arith.constant 0 : i32
    %c0_i32_1 = arith.constant 0 : i32
    return %arg0, %c0_i32, %c0_i32_0 : i32, i32, i32
  }
}

</mosaic_0001>

<bundles_post_ra>
// kernel: div.8
= control target key start
LH: loop header
LB: loop body
LE: loop exit
PB: predicated region body
PF: predicated region fallthrough
CT: control target
= control target key end

     0   :  { %s37_s0 = inlined_call_operand.vmem [shape: f32[512], index: 0, kind: input, shape index: {}]   ;;  %s38_s1 = inlined_call_operand.vmem [shape: f32[512], index: 1, kind: input, shape index: {}]   ;;  %s39_s2 = inlined_call_operand.vmem [shape: f32[512], index: 2, kind: output, shape index: {}]  }
   0x1   :  { %v4_v0 = vld [vmem:[%s38_s1] sm:$0xf] }
   0x2   :  { %11 = vrcp.f32 %v4_v0  ;;  %v3_v1 = vld [vmem:[%s37_s0] sm:$0xf] }
   0xc   :  { %v12_v2 = vpop.eup %11 }
   0xd   :  { %v8_v3 = vmul.f32 %v12_v2, %v3_v1 }
   0xf   :  { %10 = vst [vmem:[%s39_s2] sm:$0xf] %v8_v3 }

// kernel: protonet_forward.1
= control target key start
LH: loop header
LB: loop body
LE: loop exit
PB: predicated region body
PF: predicated region fallthrough
CT: control target
= control target key end

     0   :  { %vm374_vm0 = vcmask 1043456   ;;  %vm277_vm1 = vcmask 64512   ;;  %vm1258_vm2 = vcmask 523264   ;;  %vm2433_vm6 = vcmask 1042432   ;;  %s7194_s4 = inlined_call_operand.vmem [shape: bf16[8,128], index: 4, kind: input, shape index: {}]   ;;  %s7195_s0 = inlined_call_operand.vmem [shape: bf16[512,8], index: 0, kind: input, shape index: {}]   ;;  %s7196_s6 = inlined_call_operand.vmem [shape: bf16[128,64], index: 6, kind: input, shape index: {}]   ;;  %s7197_s5 = inlined_call_operand.vmem [shape: f32[1,128], index: 5, kind: input, shape index: {}]   ;;  %s7198_s8 = inlined_call_operand.vmem [shape: bf16[64,128], index: 8, kind: input, shape index: {}]   ;;  %s7199_s7 = inlined_call_operand.vmem [shape: f32[1,64], index: 7, kind: input, shape index: {}]   ;;  %s7200_s10 = inlined_call_operand.vmem [shape: bf16[128,128], index: 10, kind: input, shape index: {}]   ;;  %s7201_s9 = inlined_call_operand.vmem [shape: f32[1,128], index: 9, kind: input, shape index: {}]   ;;  %s7202_s2 = inlined_call_operand.vmem [shape: bf16[3,512], index: 2, kind: input, shape index: {}]   ;;  %s7203_s1 = inlined_call_operand.vmem [shape: bf16[256,8], index: 1, kind: input, shape index: {}]   ;;  %s7204_s11 = inlined_call_operand.vmem [shape: f32[1,128], index: 11, kind: input, shape index: {}]   ;;  %s7205_s12 = inlined_call_operand.vmem [shape: f32[2,3,128], index: 12, kind: output, shape index: {0}]   ;;  %s7206_s3 = inlined_call_operand.vmem [shape: s32[2,1,128], index: 3, kind: input, shape index: {}]   ;;  %s7207_s13 = inlined_call_operand.vmem [shape: f32[2,1,128], index: 13, kind: output, shape index: {1}]  }
   0x1   :  { %v109_v0 = vld [vmem:[%s7194_s4] sm:$0xf]  ;;  %v4724_v3 = vld [vmem:[%s7195_s0 + $0x8] sm:$0xff]   ;;  %v4725_v4 = vld [vmem:[%s7195_s0 + $0x10] sm:$0xff]  }
   0x2   :  { %4719 = vmatprep.subr.msk.bf16.mxu0 %vm374_vm0, %v109_v0  ;;  %v4908_v1 = vsel %vm374_vm0, %v109_v0, 0  ;;  %v4723_v2 = vld [vmem:[%s7195_s0] sm:$0xff]   ;;  %v4726_v5 = vld [vmem:[%s7195_s0 + $0x18] sm:$0xff]   ;;  %v4728_v7 = vld [vmem:[%s7195_s0 + $0x28] sm:$0xff]  }
   0x3   :  { %7409 = vst [vmem:[#allocation2_spill] sm:$0xff] %v4908_v1  ;;  %4236 = vmatpush3.bf16.msra.mxu0 %v4908_v1  ;;  %4237 = vmatprep.mubr.msk.bf16.mxu0 %vm277_vm1, %v4723_v2  ;;  %v4727_v6 = vld [vmem:[%s7195_s0 + $0x20] sm:$0xff]   ;;  %v4729_v8 = vld [vmem:[%s7195_s0 + $0x30] sm:$0xff]   ;;  %v4730_v9 = vld [vmem:[%s7195_s0 + $0x38] sm:$0xff]  }
   0x4   :  { %v4731_v10 = vld [vmem:[%s7195_s0 + $0x40] sm:$0xff]   ;;  %v4732_v11 = vld [vmem:[%s7195_s0 + $0x48] sm:$0xff]   ;;  %v4733_v12 = vld [vmem:[%s7195_s0 + $0x50] sm:$0xff]  }
   0x5   :  { %v4755_v13 = vld [vmem:[%s7196_s6] sm:$0xff]   ;;  %v4756_v14 = vld [vmem:[%s7196_s6 + $0x8] sm:$0xff]   ;;  %v4757_v15 = vld [vmem:[%s7196_s6 + $0x10] sm:$0xff]  }
   0x6   :  { %4238 = vmatmul.mubr.msk.bf16.vlgmr.msra.gmra.mrb[0].mxu0 %vm277_vm1, %v4724_v3  ;;  %4301 = vmatprep.subr.bf16.mxu0 %v4755_v13  ;;  %v4734_v16 = vld [vmem:[%s7195_s0 + $0x58] sm:$0xff]   ;;  %v4735_v18 = vld [vmem:[%s7195_s0 + $0x60] sm:$0xff]   ;;  %v4736_v20 = vld [vmem:[%s7195_s0 + $0x68] sm:$0xff]  }
   0x7   :  { %4241 = vmatprep.mubr.msk.bf16.mxu0 %vm277_vm1, %v4725_v4  ;;  %4703 = vmatprep.subr.bf16.mxu1 %v4755_v13  ;;  %v4758_v17 = vld [vmem:[%s7196_s6 + $0x18] sm:$0xff]   ;;  %v4759_v19 = vld [vmem:[%s7196_s6 + $0x20] sm:$0xff]   ;;  %v4760_v21 = vld [vmem:[%s7196_s6 + $0x28] sm:$0xff]  }
   0x8   :  { %4302 = vmatpush3.bf16.msra.mxu0 %v4755_v13  ;;  %4711 = vmatpush3.bf16.msra.mxu1 %v4755_v13  ;;  %v4737_v22 = vld [vmem:[%s7195_s0 + $0x70] sm:$0xff]   ;;  %v4738_v23 = vld [vmem:[%s7195_s0 + $0x78] sm:$0xff]   ;;  %v4739_v24 = vld [vmem:[%s7195_s0 + $0x80] sm:$0xff]  }
   0x9   :  { %4303 = vmatprep.subr.bf16.mxu0 %v4756_v14  ;;  %4704 = vmatprep.subr.bf16.mxu1 %v4756_v14  ;;  %v4740_v25 = vld [vmem:[%s7195_s0 + $0x88] sm:$0xff]   ;;  %v4741_v26 = vld [vmem:[%s7195_s0 + $0x90] sm:$0xff]   ;;  %v4742_v27 = vld [vmem:[%s7195_s0 + $0x98] sm:$0xff]  }
   0xa   :  { %v4743_v28 = vld [vmem:[%s7195_s0 + $0xa0] sm:$0xff]   ;;  %v4744_v29 = vld [vmem:[%s7195_s0 + $0xa8] sm:$0xff]   ;;  %v4745_v30 = vld [vmem:[%s7195_s0 + $0xb0] sm:$0xff]  }
   0xb   :  { %v4746_v31 = vld [vmem:[%s7195_s0 + $0xb8] sm:$0xff]   ;;  %v4761_v32 = vld [vmem:[%s7196_s6 + $0x30] sm:$0xff]   ;;  %v4747_v33 = vld [vmem:[%s7195_s0 + $0xc0] sm:$0xff]  }
   0xc   :  { %4304 = vmatpush3.bf16.msra.mxu0 %v4756_v14  ;;  %4712 = vmatpush3.bf16.msra.mxu1 %v4756_v14  ;;  %v4762_v34 = vld [vmem:[%s7196_s6 + $0x38] sm:$0xff]   ;;  %v4748_v35 = vld [vmem:[%s7195_s0 + $0xc8] sm:$0xff]   ;;  %v4749_v36 = vld [vmem:[%s7195_s0 + $0xd0] sm:$0xff]  }
   0xd   :  { %4305 = vmatprep.subr.bf16.mxu0 %v4757_v15  ;;  %4705 = vmatprep.subr.bf16.mxu1 %v4757_v15  ;;  %v4750_v37 = vld [vmem:[%s7195_s0 + $0xd8] sm:$0xff]   ;;  %v4751_v38 = vld [vmem:[%s7195_s0 + $0xe0] sm:$0xff]   ;;  %v4752_v39 = vld [vmem:[%s7195_s0 + $0xe8] sm:$0xff]  }
   0xe   :  { %4242 = vmatmul.mubr.msk.bf16.gmra.mrb[4].mxu0 %vm277_vm1, %v4726_v5  ;;  %v4753_v40 = vld [vmem:[%s7195_s0 + $0xf0] sm:$0xff]   ;;  %v4754_v41 = vld [vmem:[%s7195_s0 + $0xf8] sm:$0xff]   ;;  %v5066_v42 = vld [vmem:[%s7197_s5] ss:$0 sm:$0xff] }
   0xf   :  { %4245 = vmatprep.mubr.msk.bf16.mxu0 %vm277_vm1, %v4727_v6  ;;  %v4763_v51 = vld [vmem:[%s7198_s8] sm:$0xff]   ;;  %v4764_v60 = vld [vmem:[%s7198_s8 + $0x8] sm:$0xff]  }
  0x10   :  { %4306 = vmatpush3.bf16.msra.mxu0 %v4757_v15  ;;  %4713 = vmatpush3.bf16.msra.mxu1 %v4757_v15 }
  0x11   :  { %4307 = vmatprep.subr.bf16.mxu0 %v4758_v17  ;;  %4706 = vmatprep.subr.bf16.mxu1 %v4758_v17 }
  0x14   :  { %4308 = vmatpush3.bf16.msra.mxu0 %v4758_v17  ;;  %4714 = vmatpush3.bf16.msra.mxu1 %v4758_v17 }
  0x15   :  { %4309 = vmatprep.subr.bf16.mxu0 %v4759_v19  ;;  %4707 = vmatprep.subr.bf16.mxu1 %v4759_v19 }
  0x16   :  { %4246 = vmatmul.mubr.msk.bf16.gmra.mrb[8].mxu0 %vm277_vm1, %v4728_v7 }
  0x17   :  { %4249 = vmatprep.mubr.msk.bf16.mxu0 %vm277_vm1, %v4729_v8 }
  0x18   :  { %4310 = vmatpush3.bf16.msra.mxu0 %v4759_v19  ;;  %4715 = vmatpush3.bf16.msra.mxu1 %v4759_v19 }
  0x19   :  { %4311 = vmatprep.subr.bf16.mxu0 %v4760_v21  ;;  %4708 = vmatprep.subr.bf16.mxu1 %v4760_v21 }
  0x1c   :  { %4312 = vmatpush3.bf16.msra.mxu0 %v4760_v21  ;;  %4716 = vmatpush3.bf16.msra.mxu1 %v4760_v21 }
  0x1d   :  { %4313 = vmatprep.subr.bf16.mxu0 %v4761_v32  ;;  %4709 = vmatprep.subr.bf16.mxu1 %v4761_v32 }
  0x1e   :  { %4250 = vmatmul.mubr.msk.bf16.gmra.mrb[12].mxu0 %vm277_vm1, %v4730_v9 }
  0x1f   :  { %4253 = vmatprep.mubr.msk.bf16.mxu0 %vm277_vm1, %v4731_v10 }
  0x20   :  { %4314 = vmatpush3.bf16.msra.mxu0 %v4761_v32  ;;  %4717 = vmatpush3.bf16.msra.mxu1 %v4761_v32 }
  0x21   :  { %4315 = vmatprep.subr.bf16.mxu0 %v4762_v34  ;;  %4710 = vmatprep.subr.bf16.mxu1 %v4762_v34 }
  0x24   :  { %4316 = vmatpush3.bf16.msra.mxu0 %v4762_v34  ;;  %4718 = vmatpush3.bf16.msra.mxu1 %v4762_v34 }
  0x25   :  { %4381 = vmatprep.subr.bf16.mxu0 %v4763_v51 }
  0x26   :  { %4254 = vmatmul.mubr.msk.bf16.gmra.mrb[16].mxu0 %vm277_vm1, %v4732_v11 }
  0x27   :  { %4257 = vmatprep.mubr.msk.bf16.mxu0 %vm277_vm1, %v4733_v12 }
  0x2e   :  { %4258 = vmatmul.mubr.msk.bf16.gmra.mrb[20].mxu0 %vm277_vm1, %v4734_v16 }
  0x2f   :  { %4261 = vmatprep.mubr.msk.bf16.mxu0 %vm277_vm1, %v4735_v18 }
  0x36   :  { %4262 = vmatmul.mubr.msk.bf16.gmra.mrb[24].mxu0 %vm277_vm1, %v4736_v20 }
  0x37   :  { %4265 = vmatprep.mubr.msk.bf16.mxu0 %vm277_vm1, %v4737_v22 }
  0x3e   :  { %4266 = vmatmul.mubr.msk.bf16.gmra.mrb[28].mxu0 %vm277_vm1, %v4738_v23 }
  0x3f   :  { %4269 = vmatprep.mubr.msk.bf16.mxu0 %vm277_vm1, %v4739_v24 }
  0x46   :  { %4270 = vmatmul.mubr.msk.bf16.gmra.mrb[32].mxu0 %vm277_vm1, %v4740_v25 }
  0x47   :  { %4273 = vmatprep.mubr.msk.bf16.mxu0 %vm277_vm1, %v4741_v26 }
  0x4e   :  { %4274 = vmatmul.mubr.msk.bf16.gmra.mrb[36].mxu0 %vm277_vm1, %v4742_v27 }
  0x4f   :  { %4277 = vmatprep.mubr.msk.bf16.mxu0 %vm277_vm1, %v4743_v28 }
  0x56   :  { %4278 = vmatmul.mubr.msk.bf16.gmra.mrb[40].mxu0 %vm277_vm1, %v4744_v29 }
  0x57   :  { %4281 = vmatprep.mubr.msk.bf16.mxu0 %vm277_vm1, %v4745_v30 }
  0x5e   :  { %4282 = vmatmul.mubr.msk.bf16.gmra.mrb[44].mxu0 %vm277_vm1, %v4746_v31 }
  0x5f   :  { %4285 = vmatprep.mubr.msk.bf16.mxu0 %vm277_vm1, %v4747_v33 }
  0x66   :  { %4286 = vmatmul.mubr.msk.bf16.gmra.mrb[48].mxu0 %vm277_vm1, %v4748_v35 }
  0x67   :  { %4289 = vmatprep.mubr.msk.bf16.mxu0 %vm277_vm1, %v4749_v36 }
  0x6e   :  { %4290 = vmatmul.mubr.msk.bf16.gmra.mrb[52].mxu0 %vm277_vm1, %v4750_v37 }
  0x6f   :  { %4293 = vmatprep.mubr.msk.bf16.mxu0 %vm277_vm1, %v4751_v38 }
  0x76   :  { %4294 = vmatmul.mubr.msk.bf16.gmra.mrb[56].mxu0 %vm277_vm1, %v4752_v39 }
  0x77   :  { %4297 = vmatprep.mubr.msk.bf16.mxu0 %vm277_vm1, %v4753_v40 }
  0x7e   :  { %4298 = vmatmul.mubr.msk.bf16.gmra.mrb[60].mxu0 %vm277_vm1, %v4754_v41 }
  0xd9   :  { %v4239_v43 = vpop.f32.mrb[0].mxu0 }
  0xda   :  { %v412_v44 = vpop.f32.mrb[1].mxu0  ;;  %v5072_v47 = vadd.f32 %v4239_v43, %v5066_v42 }
  0xdb   :  { %v5069_v45 = vadd.f32 %v5066_v42, %v412_v44  ;;  %v4240_v46 = vpop.f32.mrb[2].mxu0 }
  0xdc   :  { %v5075_v48 = vadd.f32 %v4240_v46, %v5066_v42  ;;  %v415_v49 = vpop.f32.mrb[3].mxu0  ;;  %v7255_v55 = vmax.f32 %v5072_v47, 0.0 }
  0xdd   :  { %v5078_v50 = vadd.f32 %v5066_v42, %v415_v49  ;;  %v7252_v53 = vmax.f32 %v5069_v45, 0.0 }
  0xde   :  { %v7249_v52 = vmax.f32 %v5075_v48, 0.0 }
  0xdf   :  { %v7248_v54 = vmax.f32 %v5078_v50, 0.0 }
  0xe0   :  { %v732_v58 = vpack.c.bf16 %v7249_v52, %v7255_v55 }
  0xe1   :  { %v731_v56 = vpack.c.bf16 %v7248_v54, %v7252_v53  ;;  %v4243_v57 = vpop.f32.mrb[4].mxu0 }
  0xe2   :  { %v428_v59 = vpop.f32.mrb[5].mxu0  ;;  %v5102_v63 = vadd.f32 %v4243_v57, %v5066_v42 }
  0xe3   :  { %v5099_v61 = vadd.f32 %v5066_v42, %v428_v59  ;;  %v4244_v62 = vpop.f32.mrb[6].mxu0  ;;  %4317 = vmatprep.mubr.bf16.mxu0 %v731_v56 }
  0xe4   :  { %v5105_v0 = vadd.f32 %v4244_v62, %v5066_v42  ;;  %v431_v2 = vpop.f32.mrb[7].mxu0  ;;  %4318 = vmatmul.mubr.bf16.vlgmr.msra.gmra.mrb[64].mxu0 %v732_v58  ;;  %v7247_v7 = vmax.f32 %v5102_v63, 0.0 }
  0xe5   :  { %v5108_v3 = vadd.f32 %v5066_v42, %v431_v2  ;;  %4382 = vmatpush3.bf16.msra.mxu0 %v4763_v51  ;;  %v7242_v5 = vmax.f32 %v5099_v61, 0.0 }
  0xe6   :  { %v7241_v4 = vmax.f32 %v5105_v0, 0.0  ;;  %4383 = vmatprep.subr.bf16.mxu0 %v4764_v60 }
  0xe7   :  { %v7240_v6 = vmax.f32 %v5108_v3, 0.0 }
  0xe8   :  { %v734_v10 = vpack.c.bf16 %v7241_v4, %v7247_v7 }
  0xe9   :  { %v733_v8 = vpack.c.bf16 %v7240_v6, %v7242_v5  ;;  %v4247_v9 = vpop.f32.mrb[8].mxu0  ;;  %4384 = vmatpush3.bf16.msra.mxu0 %v4764_v60 }
  0xea   :  { %v444_v11 = vpop.f32.mrb[9].mxu0  ;;  %v5126_v14 = vadd.f32 %v4247_v9, %v5066_v42 }
  0xeb   :  { %v5123_v12 = vadd.f32 %v5066_v42, %v444_v11  ;;  %v4248_v13 = vpop.f32.mrb[10].mxu0  ;;  %4321 = vmatprep.mubr.bf16.mxu0 %v733_v8 }
  0xec   :  { %v5129_v15 = vadd.f32 %v4248_v13, %v5066_v42  ;;  %v447_v16 = vpop.f32.mrb[11].mxu0  ;;  %4322 = vmatmul.mubr.bf16.gmra.mrb[68].mxu0 %v734_v10  ;;  %v7239_v21 = vmax.f32 %v5126_v14, 0.0 }
  0xed   :  { %v5132_v17 = vadd.f32 %v5066_v42, %v447_v16  ;;  %v7234_v19 = vmax.f32 %v5123_v12, 0.0 }
  0xee   :  { %v7233_v18 = vmax.f32 %v5129_v15, 0.0 }
  0xef   :  { %v7232_v20 = vmax.f32 %v5132_v17, 0.0 }
  0xf0   :  { %v736_v24 = vpack.c.bf16 %v7233_v18, %v7239_v21 }
  0xf1   :  { %v735_v22 = vpack.c.bf16 %v7232_v20, %v7234_v19  ;;  %v4251_v23 = vpop.f32.mrb[12].mxu0 }
  0xf2   :  { %v460_v25 = vpop.f32.mrb[13].mxu0  ;;  %v5150_v28 = vadd.f32 %v4251_v23, %v5066_v42 }
  0xf3   :  { %v5147_v26 = vadd.f32 %v5066_v42, %v460_v25  ;;  %v4252_v27 = vpop.f32.mrb[14].mxu0  ;;  %4325 = vmatprep.mubr.bf16.mxu0 %v735_v22 }
  0xf4   :  { %v5153_v29 = vadd.f32 %v4252_v27, %v5066_v42  ;;  %v463_v30 = vpop.f32.mrb[15].mxu0  ;;  %4326 = vmatmul.mubr.bf16.gmra.mrb[72].mxu0 %v736_v24  ;;  %v7231_v35 = vmax.f32 %v5150_v28, 0.0 }
  0xf5   :  { %v5156_v31 = vadd.f32 %v5066_v42, %v463_v30  ;;  %v7226_v33 = vmax.f32 %v5147_v26, 0.0 }
  0xf6   :  { %v7225_v32 = vmax.f32 %v5153_v29, 0.0 }
  0xf7   :  { %v7224_v34 = vmax.f32 %v5156_v31, 0.0 }
  0xf8   :  { %v738_v38 = vpack.c.bf16 %v7225_v32, %v7231_v35 }
  0xf9   :  { %v4255_v36 = vpop.f32.mrb[16].mxu0  ;;  %v737_v37 = vpack.c.bf16 %v7224_v34, %v7226_v33 }
  0xfa   :  { %v476_v39 = vpop.f32.mrb[17].mxu0  ;;  %v5174_v43 = vadd.f32 %v4255_v36, %v5066_v42 }
  0xfb   :  { %v5171_v40 = vadd.f32 %v5066_v42, %v476_v39  ;;  %v4256_v41 = vpop.f32.mrb[18].mxu0  ;;  %4329 = vmatprep.mubr.bf16.mxu1 %v737_v37 }
  0xfc   :  { %v5177_v44 = vadd.f32 %v4256_v41, %v5066_v42  ;;  %v479_v46 = vpop.f32.mrb[19].mxu0  ;;  %4330 = vmatmul.mubr.bf16.vlgmr.msra.gmra.mrb[0].mxu1 %v738_v38  ;;  %v7223_v58 = vmax.f32 %v5174_v43, 0.0 }
  0xfd   :  { %v5180_v49 = vadd.f32 %v5066_v42, %v479_v46  ;;  %v7218_v56 = vmax.f32 %v5171_v40, 0.0 }
  0xfe   :  { %v7217_v51 = vmax.f32 %v5177_v44, 0.0 }
  0xff   :  { %v7216_v57 = vmax.f32 %v5180_v49, 0.0 }
 0x100   :  { %v740_v62 = vpack.c.bf16 %v7217_v51, %v7223_v58 }
 0x101   :  { %v739_v59 = vpack.c.bf16 %v7216_v57, %v7218_v56  ;;  %v4259_v60 = vpop.f32.mrb[20].mxu0 }
 0x102   :  { %v492_v2 = vpop.f32.mrb[21].mxu0  ;;  %v5198_v10 = vadd.f32 %v4259_v60, %v5066_v42 }
 0x103   :  { %v5195_v8 = vadd.f32 %v5066_v42, %v492_v2  ;;  %v4260_v9 = vpop.f32.mrb[22].mxu0  ;;  %4333 = vmatprep.mubr.bf16.mxu1 %v739_v59 }
 0x104   :  { %v5201_v11 = vadd.f32 %v4260_v9, %v5066_v42  ;;  %v495_v13 = vpop.f32.mrb[23].mxu0  ;;  %4334 = vmatmul.mubr.bf16.gmra.mrb[4].mxu1 %v740_v62  ;;  %v7215_v25 = vmax.f32 %v5198_v10, 0.0 }
 0x105   :  { %v5204_v16 = vadd.f32 %v5066_v42, %v495_v13  ;;  %v7210_v23 = vmax.f32 %v5195_v8, 0.0 }
 0x106   :  { %7410 = vst [vmem:[#allocation3_spill] sm:$0xff] %v5201_v11  ;;  %v7209_v22 = vmax.f32 %v5201_v11, 0.0 }
 0x107   :  { %7411 = vst [vmem:[#allocation4_spill] sm:$0xff] %v5204_v16  ;;  %v7208_v24 = vmax.f32 %v5204_v16, 0.0 }
 0x108   :  { %v742_v36 = vpack.c.bf16 %v7209_v22, %v7215_v25 }
 0x109   :  { %v741_v27 = vpack.c.bf16 %v7208_v24, %v7210_v23  ;;  %v4263_v30 = vpop.f32.mrb[24].mxu0 }
 0x10a   :  { %v508_v37 = vpop.f32.mrb[25].mxu0  ;;  %v5222_v41 = vadd.f32 %v4263_v30, %v5066_v42 }
 0x10b   :  { %v5219_v38 = vadd.f32 %v5066_v42, %v508_v37  ;;  %v4264_v39 = vpop.f32.mrb[26].mxu0  ;;  %4337 = vmatprep.mubr.bf16.mxu1 %v741_v27 }
 0x10c   :  { %7413 = vst [vmem:[#allocation6_spill] sm:$0xff] %v5222_v41  ;;  %v5225_v46 = vadd.f32 %v4264_v39, %v5066_v42  ;;  %v511_v59 = vpop.f32.mrb[27].mxu0  ;;  %4338 = vmatmul.mubr.bf16.gmra.mrb[8].mxu1 %v742_v36  ;;  %v7214_v13 = vmax.f32 %v5222_v41, 0.0 }
 0x10d   :  { %7412 = vst [vmem:[#allocation5_spill] sm:$0xff] %v5219_v38  ;;  %v5228_v60 = vadd.f32 %v5066_v42, %v511_v59  ;;  %v7212_v2 = vmax.f32 %v5219_v38, 0.0 }
 0x10e   :  { %7414 = vst [vmem:[#allocation7_spill] sm:$0xff] %v5225_v46  ;;  %v7213_v62 = vmax.f32 %v5225_v46, 0.0 }
 0x10f   :  { %7415 = vst [vmem:[#allocation8_spill] sm:$0xff] %v5228_v60  ;;  %v7211_v9 = vmax.f32 %v5228_v60, 0.0 }
 0x110   :  { %v744_v36 = vpack.c.bf16 %v7213_v62, %v7214_v13 }
 0x111   :  { %v743_v27 = vpack.c.bf16 %v7211_v9, %v7212_v2  ;;  %v4267_v30 = vpop.f32.mrb[28].mxu0 }
 0x112   :  { %v524_v37 = vpop.f32.mrb[29].mxu0  ;;  %v5246_v24 = vadd.f32 %v4267_v30, %v5066_v42 }
 0x113   :  { %v5243_v39 = vadd.f32 %v5066_v42, %v524_v37  ;;  %v4268_v59 = vpop.f32.mrb[30].mxu0  ;;  %4341 = vmatprep.mubr.bf16.mxu1 %v743_v27 }
 0x114   :  { %7417 = vst [vmem:[#allocation10_spill] sm:$0xff] %v5246_v24  ;;  %v5249_v22 = vadd.f32 %v4268_v59, %v5066_v42  ;;  %v527_v23 = vpop.f32.mrb[31].mxu0  ;;  %4342 = vmatmul.mubr.bf16.gmra.mrb[12].mxu1 %v744_v36  ;;  %v7222_v13 = vmax.f32 %v5246_v24, 0.0 }
 0x115   :  { %7416 = vst [vmem:[#allocation9_spill] sm:$0xff] %v5243_v39  ;;  %v5252_v9 = vadd.f32 %v5066_v42, %v527_v23  ;;  %v7220_v62 = vmax.f32 %v5243_v39, 0.0 }
 0x116   :  { %7418 = vst [vmem:[#allocation11_spill] sm:$0xff] %v5249_v22  ;;  %v7221_v2 = vmax.f32 %v5249_v22, 0.0 }
 0x117   :  { %7419 = vst [vmem:[#allocation12_spill] sm:$0xff] %v5252_v9  ;;  %v7219_v37 = vmax.f32 %v5252_v9, 0.0 }
 0x118   :  { %v746_v23 = vpack.c.bf16 %v7221_v2, %v7222_v13 }
 0x119   :  { %v745_v27 = vpack.c.bf16 %v7219_v37, %v7220_v62  ;;  %v4271_v30 = vpop.f32.mrb[32].mxu0 }
 0x11a   :  { %v5267_v36 = vadd.f32 %v4271_v30, %v5066_v42  ;;  %v540_v59 = vpop.f32.mrb[33].mxu0 }
 0x11b   :  { %v5270_v25 = vadd.f32 %v5066_v42, %v540_v59  ;;  %v4272_v57 = vpop.f32.mrb[34].mxu0  ;;  %4345 = vmatprep.mubr.bf16.mxu1 %v745_v27 }
 0x11c   :  { %7420 = vst [vmem:[#allocation13_spill] sm:$0xff] %v5267_v36  ;;  %v7228_v51 = vmax.f32 %v5267_v36, 0.0  ;;  %v5274_v56 = vadd.f32 %v4272_v57, %v5066_v42  ;;  %v543_v37 = vpop.f32.mrb[35].mxu0  ;;  %4346 = vmatmul.mubr.bf16.gmra.mrb[16].mxu1 %v746_v23 }
 0x11d   :  { %7421 = vst [vmem:[#allocation14_spill] sm:$0xff] %v5270_v25  ;;  %v7230_v62 = vmax.f32 %v5270_v25, 0.0  ;;  %v5278_v2 = vadd.f32 %v5066_v42, %v543_v37 }
 0x11e   :  { %7422 = vst [vmem:[#allocation15_spill] sm:$0xff] %v5274_v56  ;;  %v7227_v30 = vmax.f32 %v5274_v56, 0.0 }
 0x11f   :  { %7423 = vst [vmem:[#allocation16_spill] sm:$0xff] %v5278_v2  ;;  %v7229_v13 = vmax.f32 %v5278_v2, 0.0 }
 0x120   :  { %v748_v27 = vpack.c.bf16 %v7227_v30, %v7228_v51 }
 0x121   :  { %v747_v57 = vpack.c.bf16 %v7229_v13, %v7230_v62  ;;  %v4275_v23 = vpop.f32.mrb[36].mxu0 }
 0x122   :  { %v5291_v59 = vadd.f32 %v4275_v23, %v5066_v42  ;;  %v556_v37 = vpop.f32.mrb[37].mxu0 }
 0x123   :  { %v5294_v58 = vadd.f32 %v5066_v42, %v556_v37  ;;  %v4276_v34 = vpop.f32.mrb[38].mxu0  ;;  %4349 = vmatprep.mubr.bf16.mxu1 %v747_v57 }
 0x124   :  { %7424 = vst [vmem:[#allocation17_spill] sm:$0xff] %v5291_v59  ;;  %v7236_v32 = vmax.f32 %v5291_v59, 0.0  ;;  %v5298_v33 = vadd.f32 %v4276_v34, %v5066_v42  ;;  %v559_v30 = vpop.f32.mrb[39].mxu0  ;;  %4350 = vmatmul.mubr.bf16.gmra.mrb[20].mxu1 %v748_v27 }
 0x125   :  { %7425 = vst [vmem:[#allocation18_spill] sm:$0xff] %v5294_v58  ;;  %v7238_v51 = vmax.f32 %v5294_v58, 0.0  ;;  %v5302_v13 = vadd.f32 %v5066_v42, %v559_v30 }
 0x126   :  { %7426 = vst [vmem:[#allocation19_spill] sm:$0xff] %v5298_v33  ;;  %v7235_v23 = vmax.f32 %v5298_v33, 0.0 }
 0x127   :  { %7427 = vst [vmem:[#allocation20_spill] sm:$0xff] %v5302_v13  ;;  %v7237_v62 = vmax.f32 %v5302_v13, 0.0 }
 0x128   :  { %v750_v57 = vpack.c.bf16 %v7235_v23, %v7236_v32 }
 0x129   :  { %v749_v34 = vpack.c.bf16 %v7237_v62, %v7238_v51  ;;  %v4279_v27 = vpop.f32.mrb[40].mxu0 }
 0x12a   :  { %v5315_v37 = vadd.f32 %v4279_v27, %v5066_v42  ;;  %v572_v30 = vpop.f32.mrb[41].mxu0 }
 0x12b   :  { %v5318_v35 = vadd.f32 %v5066_v42, %v572_v30  ;;  %v4280_v20 = vpop.f32.mrb[42].mxu0  ;;  %4353 = vmatprep.mubr.bf16.mxu1 %v749_v34 }
 0x12c   :  { %7428 = vst [vmem:[#allocation21_spill] sm:$0xff] %v5315_v37  ;;  %v7244_v18 = vmax.f32 %v5315_v37, 0.0  ;;  %v5322_v19 = vadd.f32 %v4280_v20, %v5066_v42  ;;  %v575_v23 = vpop.f32.mrb[43].mxu0  ;;  %4354 = vmatmul.mubr.bf16.gmra.mrb[24].mxu1 %v750_v57 }
 0x12d   :  { %7429 = vst [vmem:[#allocation22_spill] sm:$0xff] %v5318_v35  ;;  %v7246_v32 = vmax.f32 %v5318_v35, 0.0  ;;  %v5326_v62 = vadd.f32 %v5066_v42, %v575_v23 }
 0x12e   :  { %7430 = vst [vmem:[#allocation23_spill] sm:$0xff] %v5322_v19  ;;  %v7243_v27 = vmax.f32 %v5322_v19, 0.0 }
 0x12f   :  { %7431 = vst [vmem:[#allocation24_spill] sm:$0xff] %v5326_v62  ;;  %v7245_v51 = vmax.f32 %v5326_v62, 0.0 }
 0x130   :  { %v752_v34 = vpack.c.bf16 %v7243_v27, %v7244_v18 }
 0x131   :  { %v751_v20 = vpack.c.bf16 %v7245_v51, %v7246_v32  ;;  %v4283_v57 = vpop.f32.mrb[44].mxu0 }
 0x132   :  { %v5339_v30 = vadd.f32 %v4283_v57, %v5066_v42  ;;  %v588_v23 = vpop.f32.mrb[45].mxu0 }
 0x133   :  { %v5342_v21 = vadd.f32 %v5066_v42, %v588_v23  ;;  %v4284_v6 = vpop.f32.mrb[46].mxu0  ;;  %4357 = vmatprep.mubr.bf16.mxu1 %v751_v20 }
 0x134   :  { %7432 = vst [vmem:[#allocation25_spill] sm:$0xff] %v5339_v30  ;;  %v7251_v4 = vmax.f32 %v5339_v30, 0.0  ;;  %v5346_v5 = vadd.f32 %v4284_v6, %v5066_v42  ;;  %v591_v27 = vpop.f32.mrb[47].mxu0  ;;  %4358 = vmatmul.mubr.bf16.gmra.mrb[28].mxu1 %v752_v34  ;;  %v4765_v6 = vld [vmem:[%s7198_s8 + $0x10] sm:$0xff]  }
 0x135   :  { %7433 = vst [vmem:[#allocation26_spill] sm:$0xff] %v5342_v21  ;;  %v7254_v18 = vmax.f32 %v5342_v21, 0.0  ;;  %v5350_v51 = vadd.f32 %v5066_v42, %v591_v27  ;;  %4385 = vmatprep.subr.bf16.mxu0 %v4765_v6 }
 0x136   :  { %7434 = vst [vmem:[#allocation27_spill] sm:$0xff] %v5346_v5  ;;  %v7250_v57 = vmax.f32 %v5346_v5, 0.0  ;;  %4386 = vmatpush3.bf16.msra.mxu0 %v4765_v6 }
 0x137   :  { %7435 = vst [vmem:[#allocation28_spill] sm:$0xff] %v5350_v51  ;;  %v7253_v32 = vmax.f32 %v5350_v51, 0.0 }
 0x138   :  { %v754_v20 = vpack.c.bf16 %v7250_v57, %v7251_v4 }
 0x139   :  { %v753_v34 = vpack.c.bf16 %v7253_v32, %v7254_v18  ;;  %v4287_v27 = vpop.f32.mrb[48].mxu0 }
 0x13a   :  { %v5366_v23 = vadd.f32 %v4287_v27, %v5066_v42  ;;  %v604_v7 = vpop.f32.mrb[49].mxu0  ;;  %v4766_v27 = vld [vmem:[%s7198_s8 + $0x18] sm:$0xff]  }
 0x13b   :  { %v5369_v54 = vadd.f32 %v5066_v42, %v604_v7  ;;  %v4288_v52 = vpop.f32.mrb[50].mxu0  ;;  %4361 = vmatprep.mubr.bf16.mxu1 %v753_v34  ;;  %4387 = vmatprep.subr.bf16.mxu0 %v4766_v27 }
 0x13c   :  { %7436 = vst [vmem:[#allocation29_spill] sm:$0xff] %v5366_v23  ;;  %v7260_v57 = vmax.f32 %v5366_v23, 0.0  ;;  %v5373_v4 = vadd.f32 %v4288_v52, %v5066_v42  ;;  %v607_v53 = vpop.f32.mrb[51].mxu0  ;;  %4362 = vmatmul.mubr.bf16.gmra.mrb[32].mxu1 %v754_v20  ;;  %4388 = vmatpush3.bf16.msra.mxu0 %v4766_v27 }
 0x13d   :  { %7437 = vst [vmem:[#allocation30_spill] sm:$0xff] %v5369_v54  ;;  %v7262_v32 = vmax.f32 %v5369_v54, 0.0  ;;  %v5380_v18 = vadd.f32 %v5066_v42, %v607_v53 }
 0x13e   :  { %7438 = vst [vmem:[#allocation31_spill] sm:$0xff] %v5373_v4  ;;  %v7259_v7 = vmax.f32 %v5373_v4, 0.0 }
 0x13f   :  { %7439 = vst [vmem:[#allocation32_spill] sm:$0xff] %v5380_v18  ;;  %v7261_v6 = vmax.f32 %v5380_v18, 0.0 }
 0x140   :  { %v756_v52 = vpack.c.bf16 %v7259_v7, %v7260_v57 }
 0x141   :  { %v755_v20 = vpack.c.bf16 %v7261_v6, %v7262_v32  ;;  %v4291_v34 = vpop.f32.mrb[52].mxu0 }
 0x142   :  { %v5393_v53 = vadd.f32 %v4291_v34, %v5066_v42  ;;  %v620_v55 = vpop.f32.mrb[53].mxu0 }
 0x143   :  { %v5396_v51 = vadd.f32 %v5066_v42, %v620_v55  ;;  %v4292_v5 = vpop.f32.mrb[54].mxu0  ;;  %4365 = vmatprep.mubr.bf16.mxu1 %v755_v20 }
 0x144   :  { %7440 = vst [vmem:[#allocation33_spill] sm:$0xff] %v5393_v53  ;;  %v7268_v27 = vmax.f32 %v5393_v53, 0.0  ;;  %v5400_v4 = vadd.f32 %v4292_v5, %v5066_v42  ;;  %v623_v7 = vpop.f32.mrb[55].mxu0  ;;  %4366 = vmatmul.mubr.bf16.gmra.mrb[36].mxu1 %v756_v52 }
 0x145   :  { %7441 = vst [vmem:[#allocation34_spill] sm:$0xff] %v5396_v51  ;;  %v7270_v57 = vmax.f32 %v5396_v51, 0.0  ;;  %v5404_v6 = vadd.f32 %v5066_v42, %v623_v7 }
 0x146   :  { %7442 = vst [vmem:[#allocation35_spill] sm:$0xff] %v5400_v4  ;;  %v7267_v34 = vmax.f32 %v5400_v4, 0.0 }
 0x147   :  { %7443 = vst [vmem:[#allocation36_spill] sm:$0xff] %v5404_v6  ;;  %v7269_v32 = vmax.f32 %v5404_v6, 0.0 }
 0x148   :  { %v758_v55 = vpack.c.bf16 %v7267_v34, %v7268_v27 }
 0x149   :  { %v757_v5 = vpack.c.bf16 %v7269_v32, %v7270_v57  ;;  %v4295_v52 = vpop.f32.mrb[56].mxu0 }
 0x14a   :  { %v5417_v20 = vadd.f32 %v4295_v52, %v5066_v42  ;;  %v636_v7 = vpop.f32.mrb[57].mxu0 }
 0x14b   :  { %v5420_v18 = vadd.f32 %v5066_v42, %v636_v7  ;;  %v4296_v54 = vpop.f32.mrb[58].mxu0  ;;  %4369 = vmatprep.mubr.bf16.mxu1 %v757_v5 }
 0x14c   :  { %7444 = vst [vmem:[#allocation37_spill] sm:$0xff] %v5417_v20  ;;  %v7276_v53 = vmax.f32 %v5417_v20, 0.0  ;;  %v5424_v4 = vadd.f32 %v4296_v54, %v5066_v42  ;;  %v639_v34 = vpop.f32.mrb[59].mxu0  ;;  %4370 = vmatmul.mubr.bf16.gmra.mrb[40].mxu1 %v758_v55 }
 0x14d   :  { %7445 = vst [vmem:[#allocation38_spill] sm:$0xff] %v5420_v18  ;;  %v7278_v27 = vmax.f32 %v5420_v18, 0.0  ;;  %v5428_v32 = vadd.f32 %v5066_v42, %v639_v34 }
 0x14e   :  { %7446 = vst [vmem:[#allocation39_spill] sm:$0xff] %v5424_v4  ;;  %v7275_v52 = vmax.f32 %v5424_v4, 0.0 }
 0x14f   :  { %7447 = vst [vmem:[#allocation40_spill] sm:$0xff] %v5428_v32  ;;  %v7277_v57 = vmax.f32 %v5428_v32, 0.0 }
 0x150   :  { %v760_v5 = vpack.c.bf16 %v7275_v52, %v7276_v53 }
 0x151   :  { %v759_v54 = vpack.c.bf16 %v7277_v57, %v7278_v27  ;;  %v4299_v55 = vpop.f32.mrb[60].mxu0 }
 0x152   :  { %v5441_v7 = vadd.f32 %v4299_v55, %v5066_v42  ;;  %v652_v34 = vpop.f32.mrb[61].mxu0 }
 0x153   :  { %v5444_v6 = vadd.f32 %v5066_v42, %v652_v34  ;;  %v4300_v51 = vpop.f32.mrb[62].mxu0  ;;  %4373 = vmatprep.mubr.bf16.mxu1 %v759_v54 }
 0x154   :  { %7448 = vst [vmem:[#allocation41_spill] sm:$0xff] %v5441_v7  ;;  %v7282_v20 = vmax.f32 %v5441_v7, 0.0  ;;  %v5448_v4 = vadd.f32 %v4300_v51, %v5066_v42  ;;  %v655_v52 = vpop.f32.mrb[63].mxu0  ;;  %4374 = vmatmul.mubr.bf16.gmra.mrb[44].mxu1 %v760_v5 }
 0x155   :  { %7449 = vst [vmem:[#allocation42_spill] sm:$0xff] %v5444_v6  ;;  %v7285_v53 = vmax.f32 %v5444_v6, 0.0  ;;  %v5452_v57 = vadd.f32 %v5066_v42, %v655_v52  ;;  %v5467_v42 = vld [vmem:[%s7199_s7] ss:$0 sm:$0xff] }
 0x156   :  { %7450 = vst [vmem:[#allocation43_spill] sm:$0xff] %v5448_v4  ;;  %v7281_v55 = vmax.f32 %v5448_v4, 0.0 }
 0x157   :  { %7451 = vst [vmem:[#allocation44_spill] sm:$0xff] %v5452_v57  ;;  %v7284_v27 = vmax.f32 %v5452_v57, 0.0 }
 0x158   :  { %v762_v54 = vpack.c.bf16 %v7281_v55, %v7282_v20 }
 0x159   :  { %v761_v51 = vpack.c.bf16 %v7284_v27, %v7285_v53  ;;  %v4768_v53 = vld [vmem:[%s7200_s10 + $0x8] sm:$0xff]  }
 0x15b   :  { %4377 = vmatprep.mubr.bf16.mxu1 %v761_v51 }
 0x15c   :  { %4378 = vmatmul.mubr.bf16.gmra.mrb[48].mxu1 %v762_v54  ;;  %v4767_v54 = vld [vmem:[%s7200_s10] sm:$0xff]  }
 0x15d   :  { %4453 = vmatprep.subr.bf16.mxu1 %v4767_v54 }
 0x15e   :  { %4454 = vmatpush3.bf16.msra.mxu1 %v4767_v54 }
 0x15f   :  { %4455 = vmatprep.subr.bf16.mxu1 %v4768_v53 }
 0x162   :  { %4456 = vmatpush3.bf16.msra.mxu1 %v4768_v53 }
 0x1b7   :  { %v4319_v52 = vpop.f32.mrb[64].mxu0 }
 0x1b8   :  { %v877_v5 = vadd.f32 %v4319_v52, %v5467_v42  ;;  %v868_v34 = vpop.f32.mrb[65].mxu0 }
 0x1b9   :  { %v869_v7 = vadd.f32 %v5467_v42, %v868_v34  ;;  %v4320_v4 = vpop.f32.mrb[66].mxu0 }
 0x1ba   :  { %v880_v55 = vadd.f32 %v4320_v4, %v5467_v42  ;;  %v871_v20 = vpop.f32.mrb[67].mxu0  ;;  %v1125_v6 = vmax.f32 %v877_v5, 0.0 }
 0x1bb   :  { %v872_v27 = vadd.f32 %v5467_v42, %v871_v20  ;;  %v1123_v52 = vmax.f32 %v869_v7, 0.0  ;;  %v4769_v20 = vld [vmem:[%s7200_s10 + $0x10] sm:$0xff]   ;;  %v4770_v7 = vld [vmem:[%s7200_s10 + $0x18] sm:$0xff]  }
 0x1bc   :  { %v1126_v51 = vmax.f32 %v880_v55, 0.0  ;;  %4457 = vmatprep.subr.bf16.mxu1 %v4769_v20 }
 0x1bd   :  { %v1124_v57 = vmax.f32 %v872_v27, 0.0  ;;  %4458 = vmatpush3.bf16.msra.mxu1 %v4769_v20 }
 0x1be   :  { %v1188_v34 = vpack.c.bf16 %v1126_v51, %v1125_v6  ;;  %4459 = vmatprep.subr.bf16.mxu1 %v4770_v7 }
 0x1bf   :  { %v1187_v4 = vpack.c.bf16 %v1124_v57, %v1123_v52  ;;  %v4323_v32 = vpop.f32.mrb[68].mxu0 }
 0x1c0   :  { %v893_v5 = vadd.f32 %v4323_v32, %v5467_v42  ;;  %v884_v55 = vpop.f32.mrb[69].mxu0 }
 0x1c1   :  { %v885_v18 = vadd.f32 %v5467_v42, %v884_v55  ;;  %v4324_v23 = vpop.f32.mrb[70].mxu0  ;;  %4389 = vmatprep.mubr.msk.bf16.mxu0 %vm1258_vm2, %v1187_v4  ;;  %4460 = vmatpush3.bf16.msra.mxu1 %v4770_v7 }
 0x1c2   :  { %v896_v27 = vadd.f32 %v4324_v23, %v5467_v42  ;;  %v887_v6 = vpop.f32.mrb[71].mxu0  ;;  %4390 = vmatmul.mubr.msk.bf16.vlgmr.msra.gmra.mrb[76].mxu0 %vm1258_vm2, %v1188_v34  ;;  %v1129_v32 = vmax.f32 %v893_v5, 0.0  ;;  %v4771_v23 = vld [vmem:[%s7200_s10 + $0x20] sm:$0xff]  }
 0x1c3   :  { %v888_v57 = vadd.f32 %v5467_v42, %v887_v6  ;;  %v1127_v51 = vmax.f32 %v885_v18, 0.0  ;;  %4461 = vmatprep.subr.bf16.mxu1 %v4771_v23 }
 0x1c4   :  { %v1130_v54 = vmax.f32 %v896_v27, 0.0  ;;  %v4772_v27 = vld [vmem:[%s7200_s10 + $0x28] sm:$0xff]  }
 0x1c5   :  { %v1128_v52 = vmax.f32 %v888_v57, 0.0  ;;  %4462 = vmatpush3.bf16.msra.mxu1 %v4771_v23 }
 0x1c6   :  { %v1190_v55 = vpack.c.bf16 %v1130_v54, %v1129_v32  ;;  %4463 = vmatprep.subr.bf16.mxu1 %v4772_v27 }
 0x1c7   :  { %v1189_v4 = vpack.c.bf16 %v1128_v52, %v1127_v51  ;;  %v4327_v21 = vpop.f32.mrb[72].mxu0 }
 0x1c8   :  { %v909_v53 = vadd.f32 %v4327_v21, %v5467_v42  ;;  %v900_v34 = vpop.f32.mrb[73].mxu0 }
 0x1c9   :  { %v901_v6 = vadd.f32 %v5467_v42, %v900_v34  ;;  %v4328_v30 = vpop.f32.mrb[74].mxu0  ;;  %4393 = vmatprep.mubr.msk.bf16.mxu0 %vm1258_vm2, %v1189_v4  ;;  %4464 = vmatpush3.bf16.msra.mxu1 %v4772_v27 }
 0x1ca   :  { %v912_v18 = vadd.f32 %v4328_v30, %v5467_v42  ;;  %v903_v5 = vpop.f32.mrb[75].mxu0  ;;  %4394 = vmatmul.mubr.msk.bf16.gmra.mrb[80].mxu0 %vm1258_vm2, %v1190_v55  ;;  %v1133_v21 = vmax.f32 %v909_v53, 0.0 }
 0x1cb   :  { %v904_v20 = vadd.f32 %v5467_v42, %v903_v5  ;;  %v1131_v32 = vmax.f32 %v901_v6, 0.0 }
 0x1cc   :  { %v1134_v57 = vmax.f32 %v912_v18, 0.0 }
 0x1cd   :  { %v1132_v54 = vmax.f32 %v904_v20, 0.0 }
 0x1ce   :  { %v1192_v51 = vpack.c.bf16 %v1134_v57, %v1133_v21 }
 0x1cf   :  { %v1191_v52 = vpack.c.bf16 %v1132_v54, %v1131_v32  ;;  %v4331_v4 = vpop.f32.mrb[0].mxu1 }
 0x1d0   :  { %v925_v30 = vadd.f32 %v4331_v4, %v5467_v42  ;;  %v916_v55 = vpop.f32.mrb[1].mxu1 }
 0x1d1   :  { %v917_v7 = vadd.f32 %v5467_v42, %v916_v55  ;;  %v4332_v34 = vpop.f32.mrb[2].mxu1  ;;  %4397 = vmatprep.mubr.msk.bf16.mxu0 %vm1258_vm2, %v1191_v52 }
 0x1d2   :  { %v928_v5 = vadd.f32 %v4332_v34, %v5467_v42  ;;  %v919_v62 = vpop.f32.mrb[3].mxu1  ;;  %4398 = vmatmul.mubr.msk.bf16.gmra.mrb[84].mxu0 %vm1258_vm2, %v1192_v51  ;;  %v1137_v23 = vmax.f32 %v925_v30, 0.0 }
 0x1d3   :  { %v920_v53 = vadd.f32 %v5467_v42, %v919_v62  ;;  %v1135_v18 = vmax.f32 %v917_v7, 0.0 }
 0x1d4   :  { %v1138_v6 = vmax.f32 %v928_v5, 0.0 }
 0x1d5   :  { %v1136_v20 = vmax.f32 %v920_v53, 0.0 }
 0x1d6   :  { %v1194_v21 = vpack.c.bf16 %v1138_v6, %v1137_v23 }
 0x1d7   :  { %v1193_v57 = vpack.c.bf16 %v1136_v20, %v1135_v18  ;;  %v4335_v32 = vpop.f32.mrb[4].mxu1 }
 0x1d8   :  { %v941_v54 = vadd.f32 %v4335_v32, %v5467_v42  ;;  %v932_v4 = vpop.f32.mrb[5].mxu1 }
 0x1d9   :  { %v933_v52 = vadd.f32 %v5467_v42, %v932_v4  ;;  %v4336_v55 = vpop.f32.mrb[6].mxu1  ;;  %4401 = vmatprep.mubr.msk.bf16.mxu0 %vm1258_vm2, %v1193_v57 }
 0x1da   :  { %v944_v51 = vadd.f32 %v4336_v55, %v5467_v42  ;;  %v935_v27 = vpop.f32.mrb[7].mxu1  ;;  %4402 = vmatmul.mubr.msk.bf16.gmra.mrb[88].mxu0 %vm1258_vm2, %v1194_v21  ;;  %v1141_v30 = vmax.f32 %v941_v54, 0.0 }
 0x1db   :  { %v936_v62 = vadd.f32 %v5467_v42, %v935_v27  ;;  %v1139_v34 = vmax.f32 %v933_v52, 0.0 }
 0x1dc   :  { %v1142_v7 = vmax.f32 %v944_v51, 0.0 }
 0x1dd   :  { %v1140_v5 = vmax.f32 %v936_v62, 0.0 }
 0x1de   :  { %v1196_v53 = vpack.c.bf16 %v1142_v7, %v1141_v30 }
 0x1df   :  { %v1195_v23 = vpack.c.bf16 %v1140_v5, %v1139_v34  ;;  %v4339_v6 = vpop.f32.mrb[8].mxu1 }
 0x1e0   :  { %v957_v18 = vadd.f32 %v4339_v6, %v5467_v42  ;;  %v948_v20 = vpop.f32.mrb[9].mxu1 }
 0x1e1   :  { %v949_v32 = vadd.f32 %v5467_v42, %v948_v20  ;;  %v4340_v57 = vpop.f32.mrb[10].mxu1  ;;  %4405 = vmatprep.mubr.msk.bf16.mxu0 %vm1258_vm2, %v1195_v23 }
 0x1e2   :  { %v960_v4 = vadd.f32 %v4340_v57, %v5467_v42  ;;  %v951_v21 = vpop.f32.mrb[11].mxu1  ;;  %4406 = vmatmul.mubr.msk.bf16.gmra.mrb[92].mxu0 %vm1258_vm2, %v1196_v53  ;;  %v1145_v52 = vmax.f32 %v957_v18, 0.0 }
 0x1e3   :  { %v952_v54 = vadd.f32 %v5467_v42, %v951_v21  ;;  %v1143_v51 = vmax.f32 %v949_v32, 0.0 }
 0x1e4   :  { %v1146_v55 = vmax.f32 %v960_v4, 0.0 }
 0x1e5   :  { %v1144_v27 = vmax.f32 %v952_v54, 0.0 }
 0x1e6   :  { %v1198_v62 = vpack.c.bf16 %v1146_v55, %v1145_v52 }
 0x1e7   :  { %v1197_v30 = vpack.c.bf16 %v1144_v27, %v1143_v51  ;;  %v4343_v7 = vpop.f32.mrb[12].mxu1 }
 0x1e8   :  { %v973_v34 = vadd.f32 %v4343_v7, %v5467_v42  ;;  %v964_v5 = vpop.f32.mrb[13].mxu1 }
 0x1e9   :  { %v965_v6 = vadd.f32 %v5467_v42, %v964_v5  ;;  %v4344_v23 = vpop.f32.mrb[14].mxu1  ;;  %4409 = vmatprep.mubr.msk.bf16.mxu0 %vm1258_vm2, %v1197_v30 }
 0x1ea   :  { %v976_v20 = vadd.f32 %v4344_v23, %v5467_v42  ;;  %v967_v53 = vpop.f32.mrb[15].mxu1  ;;  %4410 = vmatmul.mubr.msk.bf16.gmra.mrb[96].mxu0 %vm1258_vm2, %v1198_v62  ;;  %v1149_v32 = vmax.f32 %v973_v34, 0.0 }
 0x1eb   :  { %v968_v18 = vadd.f32 %v5467_v42, %v967_v53  ;;  %v1147_v4 = vmax.f32 %v965_v6, 0.0 }
 0x1ec   :  { %v1150_v57 = vmax.f32 %v976_v20, 0.0 }
 0x1ed   :  { %v1148_v21 = vmax.f32 %v968_v18, 0.0 }
 0x1ee   :  { %v1200_v54 = vpack.c.bf16 %v1150_v57, %v1149_v32 }
 0x1ef   :  { %v1199_v52 = vpack.c.bf16 %v1148_v21, %v1147_v4  ;;  %v4347_v55 = vpop.f32.mrb[16].mxu1 }
 0x1f0   :  { %v989_v51 = vadd.f32 %v4347_v55, %v5467_v42  ;;  %v980_v27 = vpop.f32.mrb[17].mxu1 }
 0x1f1   :  { %v981_v7 = vadd.f32 %v5467_v42, %v980_v27  ;;  %v4348_v30 = vpop.f32.mrb[18].mxu1  ;;  %4413 = vmatprep.mubr.msk.bf16.mxu0 %vm1258_vm2, %v1199_v52 }
 0x1f2   :  { %v992_v5 = vadd.f32 %v4348_v30, %v5467_v42  ;;  %v983_v62 = vpop.f32.mrb[19].mxu1  ;;  %4414 = vmatmul.mubr.msk.bf16.gmra.mrb[100].mxu0 %vm1258_vm2, %v1200_v54  ;;  %v1153_v6 = vmax.f32 %v989_v51, 0.0 }
 0x1f3   :  { %v984_v34 = vadd.f32 %v5467_v42, %v983_v62  ;;  %v1151_v20 = vmax.f32 %v981_v7, 0.0 }
 0x1f4   :  { %v1154_v23 = vmax.f32 %v992_v5, 0.0 }
 0x1f5   :  { %v1152_v53 = vmax.f32 %v984_v34, 0.0 }
 0x1f6   :  { %v1202_v18 = vpack.c.bf16 %v1154_v23, %v1153_v6 }
 0x1f7   :  { %v1201_v32 = vpack.c.bf16 %v1152_v53, %v1151_v20  ;;  %v4351_v57 = vpop.f32.mrb[20].mxu1 }
 0x1f8   :  { %v1005_v4 = vadd.f32 %v4351_v57, %v5467_v42  ;;  %v996_v21 = vpop.f32.mrb[21].mxu1 }
 0x1f9   :  { %v997_v55 = vadd.f32 %v5467_v42, %v996_v21  ;;  %v4352_v52 = vpop.f32.mrb[22].mxu1  ;;  %4417 = vmatprep.mubr.msk.bf16.mxu0 %vm1258_vm2, %v1201_v32 }
 0x1fa   :  { %v1157_v27 = vmax.f32 %v1005_v4, 0.0  ;;  %v1008_v54 = vadd.f32 %v4352_v52, %v5467_v42  ;;  %v999_v30 = vpop.f32.mrb[23].mxu1  ;;  %4418 = vmatmul.mubr.msk.bf16.gmra.mrb[104].mxu0 %vm1258_vm2, %v1202_v18 }
 0x1fb   :  { %v1155_v51 = vmax.f32 %v997_v55, 0.0  ;;  %v1000_v7 = vadd.f32 %v5467_v42, %v999_v30 }
 0x1fc   :  { %v1158_v5 = vmax.f32 %v1008_v54, 0.0 }
 0x1fd   :  { %v1156_v62 = vmax.f32 %v1000_v7, 0.0 }
 0x1fe   :  { %v1204_v34 = vpack.c.bf16 %v1158_v5, %v1157_v27 }
 0x1ff   :  { %v1203_v6 = vpack.c.bf16 %v1156_v62, %v1155_v51  ;;  %v4355_v23 = vpop.f32.mrb[24].mxu1 }
 0x200   :  { %v1021_v20 = vadd.f32 %v4355_v23, %v5467_v42  ;;  %v1012_v53 = vpop.f32.mrb[25].mxu1 }
 0x201   :  { %v1013_v57 = vadd.f32 %v5467_v42, %v1012_v53  ;;  %v4356_v32 = vpop.f32.mrb[26].mxu1  ;;  %4421 = vmatprep.mubr.msk.bf16.mxu0 %vm1258_vm2, %v1203_v6 }
 0x202   :  { %v1161_v4 = vmax.f32 %v1021_v20, 0.0  ;;  %v1024_v21 = vadd.f32 %v4356_v32, %v5467_v42  ;;  %v1015_v18 = vpop.f32.mrb[27].mxu1  ;;  %4422 = vmatmul.mubr.msk.bf16.gmra.mrb[108].mxu0 %vm1258_vm2, %v1204_v34 }
 0x203   :  { %v1159_v55 = vmax.f32 %v1013_v57, 0.0  ;;  %v1016_v52 = vadd.f32 %v5467_v42, %v1015_v18 }
 0x204   :  { %v1162_v27 = vmax.f32 %v1024_v21, 0.0 }
 0x205   :  { %v1160_v54 = vmax.f32 %v1016_v52, 0.0 }
 0x206   :  { %v1206_v30 = vpack.c.bf16 %v1162_v27, %v1161_v4 }
 0x207   :  { %v1205_v51 = vpack.c.bf16 %v1160_v54, %v1159_v55  ;;  %v4359_v7 = vpop.f32.mrb[28].mxu1 }
 0x208   :  { %v1037_v5 = vadd.f32 %v4359_v7, %v5467_v42  ;;  %v1028_v62 = vpop.f32.mrb[29].mxu1 }
 0x209   :  { %v1029_v23 = vadd.f32 %v5467_v42, %v1028_v62  ;;  %v4360_v6 = vpop.f32.mrb[30].mxu1  ;;  %4425 = vmatprep.mubr.msk.bf16.mxu0 %vm1258_vm2, %v1205_v51 }
 0x20a   :  { %v1165_v20 = vmax.f32 %v1037_v5, 0.0  ;;  %v1040_v53 = vadd.f32 %v4360_v6, %v5467_v42  ;;  %v1031_v34 = vpop.f32.mrb[31].mxu1  ;;  %4426 = vmatmul.mubr.msk.bf16.gmra.mrb[112].mxu0 %vm1258_vm2, %v1206_v30 }
 0x20b   :  { %v1163_v57 = vmax.f32 %v1029_v23, 0.0  ;;  %v1032_v32 = vadd.f32 %v5467_v42, %v1031_v34 }
 0x20c   :  { %v1166_v4 = vmax.f32 %v1040_v53, 0.0 }
 0x20d   :  { %v1164_v21 = vmax.f32 %v1032_v32, 0.0 }
 0x20e   :  { %v1208_v18 = vpack.c.bf16 %v1166_v4, %v1165_v20 }
 0x20f   :  { %v1207_v55 = vpack.c.bf16 %v1164_v21, %v1163_v57  ;;  %v4363_v52 = vpop.f32.mrb[32].mxu1  ;;  %v4773_v57 = vld [vmem:[%s7200_s10 + $0x30] sm:$0xff]  }
 0x210   :  { %v1053_v27 = vadd.f32 %v4363_v52, %v5467_v42  ;;  %v1044_v54 = vpop.f32.mrb[33].mxu1  ;;  %4465 = vmatprep.subr.bf16.mxu1 %v4773_v57 }
 0x211   :  { %v1045_v7 = vadd.f32 %v5467_v42, %v1044_v54  ;;  %v4364_v51 = vpop.f32.mrb[34].mxu1  ;;  %4429 = vmatprep.mubr.msk.bf16.mxu0 %vm1258_vm2, %v1207_v55  ;;  %4466 = vmatpush3.bf16.msra.mxu1 %v4773_v57 }
 0x212   :  { %v1169_v5 = vmax.f32 %v1053_v27, 0.0  ;;  %v1056_v62 = vadd.f32 %v4364_v51, %v5467_v42  ;;  %v1047_v30 = vpop.f32.mrb[35].mxu1  ;;  %4430 = vmatmul.mubr.msk.bf16.gmra.mrb[116].mxu0 %vm1258_vm2, %v1208_v18  ;;  %v4774_v51 = vld [vmem:[%s7200_s10 + $0x38] sm:$0xff]  }
 0x213   :  { %v1167_v23 = vmax.f32 %v1045_v7, 0.0  ;;  %v1048_v6 = vadd.f32 %v5467_v42, %v1047_v30  ;;  %4467 = vmatprep.subr.bf16.mxu1 %v4774_v51 }
 0x214   :  { %v1170_v20 = vmax.f32 %v1056_v62, 0.0 }
 0x215   :  { %v1168_v53 = vmax.f32 %v1048_v6, 0.0  ;;  %4468 = vmatpush3.bf16.msra.mxu1 %v4774_v51 }
 0x216   :  { %v1210_v34 = vpack.c.bf16 %v1170_v20, %v1169_v5 }
 0x217   :  { %v1209_v32 = vpack.c.bf16 %v1168_v53, %v1167_v23  ;;  %v4367_v4 = vpop.f32.mrb[36].mxu1 }
 0x218   :  { %v1069_v21 = vadd.f32 %v4367_v4, %v5467_v42  ;;  %v1060_v55 = vpop.f32.mrb[37].mxu1 }
 0x219   :  { %v1061_v52 = vadd.f32 %v5467_v42, %v1060_v55  ;;  %v4368_v27 = vpop.f32.mrb[38].mxu1  ;;  %4433 = vmatprep.mubr.msk.bf16.mxu0 %vm1258_vm2, %v1209_v32 }
 0x21a   :  { %v1173_v18 = vmax.f32 %v1069_v21, 0.0  ;;  %v1072_v54 = vadd.f32 %v4368_v27, %v5467_v42  ;;  %v1063_v7 = vpop.f32.mrb[39].mxu1  ;;  %4434 = vmatmul.mubr.msk.bf16.gmra.mrb[120].mxu0 %vm1258_vm2, %v1210_v34 }
 0x21b   :  { %v1171_v5 = vmax.f32 %v1061_v52, 0.0  ;;  %v1064_v62 = vadd.f32 %v5467_v42, %v1063_v7 }
 0x21c   :  { %v1174_v30 = vmax.f32 %v1072_v54, 0.0 }
 0x21d   :  { %v1172_v23 = vmax.f32 %v1064_v62, 0.0 }
 0x21e   :  { %v1212_v6 = vpack.c.bf16 %v1174_v30, %v1173_v18 }
 0x21f   :  { %v1211_v20 = vpack.c.bf16 %v1172_v23, %v1171_v5  ;;  %v4371_v53 = vpop.f32.mrb[40].mxu1 }
 0x220   :  { %v1085_v57 = vadd.f32 %v4371_v53, %v5467_v42  ;;  %v1076_v32 = vpop.f32.mrb[41].mxu1 }
 0x221   :  { %v1077_v4 = vadd.f32 %v5467_v42, %v1076_v32  ;;  %v4372_v34 = vpop.f32.mrb[42].mxu1  ;;  %4437 = vmatprep.mubr.msk.bf16.mxu0 %vm1258_vm2, %v1211_v20 }
 0x222   :  { %v1177_v21 = vmax.f32 %v1085_v57, 0.0  ;;  %v1088_v55 = vadd.f32 %v4372_v34, %v5467_v42  ;;  %v1079_v52 = vpop.f32.mrb[43].mxu1  ;;  %4438 = vmatmul.mubr.msk.bf16.gmra.mrb[124].mxu0 %vm1258_vm2, %v1212_v6 }
 0x223   :  { %v1175_v27 = vmax.f32 %v1077_v4, 0.0  ;;  %v1080_v54 = vadd.f32 %v5467_v42, %v1079_v52 }
 0x224   :  { %v1178_v18 = vmax.f32 %v1088_v55, 0.0 }
 0x225   :  { %v1176_v7 = vmax.f32 %v1080_v54, 0.0 }
 0x226   :  { %v1214_v51 = vpack.c.bf16 %v1178_v18, %v1177_v21 }
 0x227   :  { %v1213_v5 = vpack.c.bf16 %v1176_v7, %v1175_v27  ;;  %v4375_v62 = vpop.f32.mrb[44].mxu1 }
 0x228   :  { %v1101_v30 = vadd.f32 %v4375_v62, %v5467_v42  ;;  %v1092_v23 = vpop.f32.mrb[45].mxu1 }
 0x229   :  { %v1093_v53 = vadd.f32 %v5467_v42, %v1092_v23  ;;  %v4376_v20 = vpop.f32.mrb[46].mxu1  ;;  %4441 = vmatprep.mubr.msk.bf16.mxu0 %vm1258_vm2, %v1213_v5 }
 0x22a   :  { %v1181_v57 = vmax.f32 %v1101_v30, 0.0  ;;  %v1104_v32 = vadd.f32 %v4376_v20, %v5467_v42  ;;  %v1095_v6 = vpop.f32.mrb[47].mxu1  ;;  %4442 = vmatmul.mubr.msk.bf16.gmra.mrb[128].mxu0 %vm1258_vm2, %v1214_v51 }
 0x22b   :  { %v1179_v4 = vmax.f32 %v1093_v53, 0.0  ;;  %v1096_v34 = vadd.f32 %v5467_v42, %v1095_v6 }
 0x22c   :  { %v1182_v21 = vmax.f32 %v1104_v32, 0.0 }
 0x22d   :  { %v1180_v55 = vmax.f32 %v1096_v34, 0.0  ;;  %v5592_v34 = vld [vmem:[%s7201_s9] ss:$0 sm:$0xff] }
 0x22e   :  { %v1216_v52 = vpack.c.bf16 %v1182_v21, %v1181_v57 }
 0x22f   :  { %v1215_v27 = vpack.c.bf16 %v1180_v55, %v1179_v4  ;;  %v4379_v54 = vpop.f32.mrb[48].mxu1 }
 0x230   :  { %v1117_v18 = vadd.f32 %v4379_v54, %v5467_v42  ;;  %v1108_v7 = vpop.f32.mrb[49].mxu1 }
 0x231   :  { %v1109_v62 = vadd.f32 %v5467_v42, %v1108_v7  ;;  %v4380_v5 = vpop.f32.mrb[50].mxu1  ;;  %4445 = vmatprep.mubr.msk.bf16.mxu0 %vm1258_vm2, %v1215_v27 }
 0x232   :  { %v1185_v30 = vmax.f32 %v1117_v18, 0.0  ;;  %v1120_v23 = vadd.f32 %v4380_v5, %v5467_v42  ;;  %v1111_v51 = vpop.f32.mrb[51].mxu1  ;;  %4446 = vmatmul.mubr.msk.bf16.gmra.mrb[132].mxu0 %vm1258_vm2, %v1216_v52 }
 0x233   :  { %v1183_v53 = vmax.f32 %v1109_v62, 0.0  ;;  %v1112_v20 = vadd.f32 %v5467_v42, %v1111_v51 }
 0x234   :  { %v1186_v57 = vmax.f32 %v1120_v23, 0.0 }
 0x235   :  { %v1184_v32 = vmax.f32 %v1112_v20, 0.0 }
 0x236   :  { %v1218_v6 = vpack.c.bf16 %v1186_v57, %v1185_v30 }
 0x237   :  { %v1217_v4 = vpack.c.bf16 %v1184_v32, %v1183_v53 }
 0x239   :  { %4449 = vmatprep.mubr.msk.bf16.mxu0 %vm1258_vm2, %v1217_v4 }
 0x23a   :  { %4450 = vmatmul.mubr.msk.bf16.gmra.mrb[136].mxu0 %vm1258_vm2, %v1218_v6 }
 0x295   :  { %v4391_v21 = vpop.f32.mrb[76].mxu0 }
 0x296   :  { %v5595_v55 = vadd.f32 %v4391_v21, %v5592_v34  ;;  %v1389_v52 = vpop.f32.mrb[77].mxu0 }
 0x297   :  { %v5598_v42 = vadd.f32 %v5592_v34, %v1389_v52  ;;  %v4392_v27 = vpop.f32.mrb[78].mxu0 }
 0x298   :  { %v5601_v54 = vadd.f32 %v4392_v27, %v5592_v34  ;;  %v1392_v18 = vpop.f32.mrb[79].mxu0  ;;  %v1715_v62 = vmax.f32 %v5595_v55, 0.0 }
 0x299   :  { %v5604_v7 = vadd.f32 %v5592_v34, %v1392_v18  ;;  %v1713_v30 = vmax.f32 %v5598_v42, 0.0 }
 0x29a   :  { %v1716_v5 = vmax.f32 %v5601_v54, 0.0 }
 0x29b   :  { %v1714_v23 = vmax.f32 %v5604_v7, 0.0 }
 0x29c   :  { %v1778_v51 = vpack.c.bf16 %v1716_v5, %v1715_v62 }
 0x29d   :  { %v4395_v53 = vpop.f32.mrb[80].mxu0  ;;  %v1777_v20 = vpack.c.bf16 %v1714_v23, %v1713_v30 }
 0x29e   :  { %v5611_v57 = vadd.f32 %v4395_v53, %v5592_v34  ;;  %v1405_v32 = vpop.f32.mrb[81].mxu0 }
 0x29f   :  { %v5614_v6 = vadd.f32 %v5592_v34, %v1405_v32  ;;  %v4396_v4 = vpop.f32.mrb[82].mxu0  ;;  %4469 = vmatprep.mubr.bf16.mxu1 %v1777_v20 }
 0x2a0   :  { %v5617_v21 = vadd.f32 %v4396_v4, %v5592_v34  ;;  %v1408_v52 = vpop.f32.mrb[83].mxu0  ;;  %4470 = vmatmul.mubr.bf16.vlgmr.msra.gmra.mrb[52].mxu1 %v1778_v51  ;;  %v1719_v18 = vmax.f32 %v5611_v57, 0.0 }
 0x2a1   :  { %v5620_v27 = vadd.f32 %v5592_v34, %v1408_v52  ;;  %v1717_v5 = vmax.f32 %v5614_v6, 0.0 }
 0x2a2   :  { %v1720_v62 = vmax.f32 %v5617_v21, 0.0 }
 0x2a3   :  { %v1718_v30 = vmax.f32 %v5620_v27, 0.0 }
 0x2a4   :  { %v1780_v23 = vpack.c.bf16 %v1720_v62, %v1719_v18 }
 0x2a5   :  { %v4399_v53 = vpop.f32.mrb[84].mxu0  ;;  %v1779_v32 = vpack.c.bf16 %v1718_v30, %v1717_v5 }
 0x2a6   :  { %v5627_v20 = vadd.f32 %v4399_v53, %v5592_v34  ;;  %v1421_v4 = vpop.f32.mrb[85].mxu0 }
 0x2a7   :  { %v5630_v51 = vadd.f32 %v5592_v34, %v1421_v4  ;;  %v4400_v52 = vpop.f32.mrb[86].mxu0  ;;  %4473 = vmatprep.mubr.bf16.mxu1 %v1779_v32 }
 0x2a8   :  { %v5633_v19 = vadd.f32 %v4400_v52, %v5592_v34  ;;  %v1424_v35 = vpop.f32.mrb[87].mxu0  ;;  %4474 = vmatmul.mubr.bf16.gmra.mrb[56].mxu1 %v1780_v23  ;;  %v1723_v18 = vmax.f32 %v5627_v20, 0.0 }
 0x2a9   :  { %v5636_v37 = vadd.f32 %v5592_v34, %v1424_v35  ;;  %v1721_v5 = vmax.f32 %v5630_v51, 0.0 }
 0x2aa   :  { %v1724_v62 = vmax.f32 %v5633_v19, 0.0 }
 0x2ab   :  { %v1722_v30 = vmax.f32 %v5636_v37, 0.0 }
 0x2ac   :  { %v1782_v53 = vpack.c.bf16 %v1724_v62, %v1723_v18 }
 0x2ad   :  { %v4403_v4 = vpop.f32.mrb[88].mxu0  ;;  %v1781_v13 = vpack.c.bf16 %v1722_v30, %v1721_v5 }
 0x2ae   :  { %v5643_v32 = vadd.f32 %v4403_v4, %v5592_v34  ;;  %v1437_v52 = vpop.f32.mrb[89].mxu0 }
 0x2af   :  { %v5646_v23 = vadd.f32 %v5592_v34, %v1437_v52  ;;  %v4404_v35 = vpop.f32.mrb[90].mxu0  ;;  %4477 = vmatprep.mubr.bf16.mxu1 %v1781_v13 }
 0x2b0   :  { %v5649_v1 = vadd.f32 %v4404_v35, %v5592_v34  ;;  %v1440_v33 = vpop.f32.mrb[91].mxu0  ;;  %4478 = vmatmul.mubr.bf16.gmra.mrb[60].mxu1 %v1782_v53  ;;  %v1727_v18 = vmax.f32 %v5643_v32, 0.0 }
 0x2b1   :  { %v5652_v58 = vadd.f32 %v5592_v34, %v1440_v33  ;;  %v1725_v5 = vmax.f32 %v5646_v23, 0.0 }
 0x2b2   :  { %v1728_v62 = vmax.f32 %v5649_v1, 0.0 }
 0x2b3   :  { %v1726_v30 = vmax.f32 %v5652_v58, 0.0 }
 0x2b4   :  { %v1784_v4 = vpack.c.bf16 %v1728_v62, %v1727_v18 }
 0x2b5   :  { %v4407_v52 = vpop.f32.mrb[92].mxu0  ;;  %v1783_v59 = vpack.c.bf16 %v1726_v30, %v1725_v5 }
 0x2b6   :  { %v5659_v13 = vadd.f32 %v4407_v52, %v5592_v34  ;;  %v1453_v35 = vpop.f32.mrb[93].mxu0 }
 0x2b7   :  { %v5662_v53 = vadd.f32 %v5592_v34, %v1453_v35  ;;  %v4408_v33 = vpop.f32.mrb[94].mxu0  ;;  %4481 = vmatprep.mubr.bf16.mxu1 %v1783_v59 }
 0x2b8   :  { %v5665_v2 = vadd.f32 %v4408_v33, %v5592_v34  ;;  %v1456_v56 = vpop.f32.mrb[95].mxu0  ;;  %4482 = vmatmul.mubr.bf16.gmra.mrb[64].mxu1 %v1784_v4  ;;  %v1731_v18 = vmax.f32 %v5659_v13, 0.0 }
 0x2b9   :  { %v5668_v25 = vadd.f32 %v5592_v34, %v1456_v56  ;;  %v1729_v5 = vmax.f32 %v5662_v53, 0.0 }
 0x2ba   :  { %v1732_v62 = vmax.f32 %v5665_v2, 0.0 }
 0x2bb   :  { %v1730_v30 = vmax.f32 %v5668_v25, 0.0 }
 0x2bc   :  { %v1786_v52 = vpack.c.bf16 %v1732_v62, %v1731_v18 }
 0x2bd   :  { %v4411_v35 = vpop.f32.mrb[96].mxu0  ;;  %v1785_v36 = vpack.c.bf16 %v1730_v30, %v1729_v5 }
 0x2be   :  { %v5675_v59 = vadd.f32 %v4411_v35, %v5592_v34  ;;  %v1469_v33 = vpop.f32.mrb[97].mxu0 }
 0x2bf   :  { %v5678_v4 = vadd.f32 %v5592_v34, %v1469_v33  ;;  %v4412_v56 = vpop.f32.mrb[98].mxu0  ;;  %4485 = vmatprep.mubr.bf16.mxu1 %v1785_v36 }
 0x2c0   :  { %v5681_v9 = vadd.f32 %v4412_v56, %v5592_v34  ;;  %v1472_v22 = vpop.f32.mrb[99].mxu0  ;;  %4486 = vmatmul.mubr.bf16.gmra.mrb[68].mxu1 %v1786_v52  ;;  %v1735_v18 = vmax.f32 %v5675_v59, 0.0 }
 0x2c1   :  { %v5684_v39 = vadd.f32 %v5592_v34, %v1472_v22  ;;  %v1733_v5 = vmax.f32 %v5678_v4, 0.0 }
 0x2c2   :  { %v1736_v62 = vmax.f32 %v5681_v9, 0.0 }
 0x2c3   :  { %v1734_v30 = vmax.f32 %v5684_v39, 0.0 }
 0x2c4   :  { %v1788_v35 = vpack.c.bf16 %v1736_v62, %v1735_v18 }
 0x2c5   :  { %v4415_v33 = vpop.f32.mrb[100].mxu0  ;;  %v1787_v24 = vpack.c.bf16 %v1734_v30, %v1733_v5 }
 0x2c6   :  { %v5691_v36 = vadd.f32 %v4415_v33, %v5592_v34  ;;  %v1485_v56 = vpop.f32.mrb[101].mxu0 }
 0x2c7   :  { %v5694_v52 = vadd.f32 %v5592_v34, %v1485_v56  ;;  %v4416_v22 = vpop.f32.mrb[102].mxu0  ;;  %4489 = vmatprep.mubr.bf16.mxu1 %v1787_v24 }
 0x2c8   :  { %7452 = vst [vmem:[#allocation45_spill] sm:$0xff] %v5691_v36  ;;  %v5697_v60 = vadd.f32 %v4416_v22, %v5592_v34  ;;  %v1488_v46 = vpop.f32.mrb[103].mxu0  ;;  %4490 = vmatmul.mubr.bf16.gmra.mrb[72].mxu1 %v1788_v35  ;;  %v1739_v18 = vmax.f32 %v5691_v36, 0.0 }
 0x2c9   :  { %7453 = vst [vmem:[#allocation46_spill] sm:$0xff] %v5694_v52  ;;  %v5700_v38 = vadd.f32 %v5592_v34, %v1488_v46  ;;  %v1737_v5 = vmax.f32 %v5694_v52, 0.0 }
 0x2ca   :  { %7454 = vst [vmem:[#allocation47_spill] sm:$0xff] %v5697_v60  ;;  %v1740_v62 = vmax.f32 %v5697_v60, 0.0 }
 0x2cb   :  { %7455 = vst [vmem:[#allocation48_spill] sm:$0xff] %v5700_v38  ;;  %v1738_v30 = vmax.f32 %v5700_v38, 0.0 }
 0x2cc   :  { %v1790_v33 = vpack.c.bf16 %v1740_v62, %v1739_v18 }
 0x2cd   :  { %v4419_v56 = vpop.f32.mrb[104].mxu0  ;;  %v1789_v41 = vpack.c.bf16 %v1738_v30, %v1737_v5 }
 0x2ce   :  { %v5707_v24 = vadd.f32 %v4419_v56, %v5592_v34  ;;  %v1501_v22 = vpop.f32.mrb[105].mxu0 }
 0x2cf   :  { %v5710_v35 = vadd.f32 %v5592_v34, %v1501_v22  ;;  %v4420_v46 = vpop.f32.mrb[106].mxu0  ;;  %4493 = vmatprep.mubr.bf16.mxu1 %v1789_v41 }
 0x2d0   :  { %7456 = vst [vmem:[#allocation49_spill] sm:$0xff] %v5707_v24  ;;  %v5713_v36 = vadd.f32 %v4420_v46, %v5592_v34  ;;  %v1504_v60 = vpop.f32.mrb[107].mxu0  ;;  %4494 = vmatmul.mubr.bf16.gmra.mrb[76].mxu1 %v1790_v33  ;;  %v1743_v18 = vmax.f32 %v5707_v24, 0.0 }
 0x2d1   :  { %7457 = vst [vmem:[#allocation50_spill] sm:$0xff] %v5710_v35  ;;  %v5716_v52 = vadd.f32 %v5592_v34, %v1504_v60  ;;  %v1741_v5 = vmax.f32 %v5710_v35, 0.0 }
 0x2d2   :  { %7458 = vst [vmem:[#allocation51_spill] sm:$0xff] %v5713_v36  ;;  %v1744_v62 = vmax.f32 %v5713_v36, 0.0 }
 0x2d3   :  { %7459 = vst [vmem:[#allocation52_spill] sm:$0xff] %v5716_v52  ;;  %v1742_v30 = vmax.f32 %v5716_v52, 0.0 }
 0x2d4   :  { %v1792_v56 = vpack.c.bf16 %v1744_v62, %v1743_v18 }
 0x2d5   :  { %v4423_v22 = vpop.f32.mrb[108].mxu0  ;;  %v1791_v38 = vpack.c.bf16 %v1742_v30, %v1741_v5 }
 0x2d6   :  { %v5723_v41 = vadd.f32 %v4423_v22, %v5592_v34  ;;  %v1517_v46 = vpop.f32.mrb[109].mxu0 }
 0x2d7   :  { %v5726_v33 = vadd.f32 %v5592_v34, %v1517_v46  ;;  %v4424_v60 = vpop.f32.mrb[110].mxu0  ;;  %4497 = vmatprep.mubr.bf16.mxu1 %v1791_v38 }
 0x2d8   :  { %7460 = vst [vmem:[#allocation53_spill] sm:$0xff] %v5723_v41  ;;  %v1747_v24 = vmax.f32 %v5723_v41, 0.0  ;;  %v5730_v36 = vadd.f32 %v4424_v60, %v5592_v34  ;;  %v1520_v35 = vpop.f32.mrb[111].mxu0  ;;  %4498 = vmatmul.mubr.bf16.gmra.mrb[80].mxu1 %v1792_v56 }
 0x2d9   :  { %7461 = vst [vmem:[#allocation54_spill] sm:$0xff] %v5726_v33  ;;  %v1745_v18 = vmax.f32 %v5726_v33, 0.0  ;;  %v5734_v62 = vadd.f32 %v5592_v34, %v1520_v35 }
 0x2da   :  { %7462 = vst [vmem:[#allocation55_spill] sm:$0xff] %v5730_v36  ;;  %v1748_v5 = vmax.f32 %v5730_v36, 0.0 }
 0x2db   :  { %7463 = vst [vmem:[#allocation56_spill] sm:$0xff] %v5734_v62  ;;  %v1746_v30 = vmax.f32 %v5734_v62, 0.0 }
 0x2dc   :  { %v1794_v22 = vpack.c.bf16 %v1748_v5, %v1747_v24 }
 0x2dd   :  { %v4427_v46 = vpop.f32.mrb[112].mxu0  ;;  %v1793_v52 = vpack.c.bf16 %v1746_v30, %v1745_v18 }
 0x2de   :  { %v5739_v38 = vadd.f32 %v4427_v46, %v5592_v34  ;;  %v1533_v41 = vpop.f32.mrb[113].mxu0 }
 0x2df   :  { %v5742_v60 = vadd.f32 %v5592_v34, %v1533_v41  ;;  %v4428_v56 = vpop.f32.mrb[114].mxu0  ;;  %4501 = vmatprep.mubr.bf16.mxu1 %v1793_v52 }
 0x2e0   :  { %7464 = vst [vmem:[#allocation57_spill] sm:$0xff] %v5739_v38  ;;  %v1751_v33 = vmax.f32 %v5739_v38, 0.0  ;;  %v5746_v35 = vadd.f32 %v4428_v56, %v5592_v34  ;;  %v1536_v36 = vpop.f32.mrb[115].mxu0  ;;  %4502 = vmatmul.mubr.bf16.gmra.mrb[84].mxu1 %v1794_v22 }
 0x2e1   :  { %7465 = vst [vmem:[#allocation58_spill] sm:$0xff] %v5742_v60  ;;  %v1749_v24 = vmax.f32 %v5742_v60, 0.0  ;;  %v5750_v18 = vadd.f32 %v5592_v34, %v1536_v36 }
 0x2e2   :  { %7466 = vst [vmem:[#allocation59_spill] sm:$0xff] %v5746_v35  ;;  %v1752_v5 = vmax.f32 %v5746_v35, 0.0 }
 0x2e3   :  { %7467 = vst [vmem:[#allocation60_spill] sm:$0xff] %v5750_v18  ;;  %v1750_v30 = vmax.f32 %v5750_v18, 0.0 }
 0x2e4   :  { %v1796_v41 = vpack.c.bf16 %v1752_v5, %v1751_v33 }
 0x2e5   :  { %v4431_v46 = vpop.f32.mrb[116].mxu0  ;;  %v1795_v62 = vpack.c.bf16 %v1750_v30, %v1749_v24 }
 0x2e6   :  { %v5755_v52 = vadd.f32 %v4431_v46, %v5592_v34  ;;  %v1549_v38 = vpop.f32.mrb[117].mxu0 }
 0x2e7   :  { %v5758_v56 = vadd.f32 %v5592_v34, %v1549_v38  ;;  %v4432_v22 = vpop.f32.mrb[118].mxu0  ;;  %4505 = vmatprep.mubr.bf16.mxu1 %v1795_v62 }
 0x2e8   :  { %7468 = vst [vmem:[#allocation61_spill] sm:$0xff] %v5755_v52  ;;  %v1755_v60 = vmax.f32 %v5755_v52, 0.0  ;;  %v5762_v36 = vadd.f32 %v4432_v22, %v5592_v34  ;;  %v1552_v35 = vpop.f32.mrb[119].mxu0  ;;  %4506 = vmatmul.mubr.bf16.gmra.mrb[88].mxu1 %v1796_v41 }
 0x2e9   :  { %7469 = vst [vmem:[#allocation62_spill] sm:$0xff] %v5758_v56  ;;  %v1753_v33 = vmax.f32 %v5758_v56, 0.0  ;;  %v5766_v24 = vadd.f32 %v5592_v34, %v1552_v35 }
 0x2ea   :  { %7470 = vst [vmem:[#allocation63_spill] sm:$0xff] %v5762_v36  ;;  %v1756_v5 = vmax.f32 %v5762_v36, 0.0 }
 0x2eb   :  { %7471 = vst [vmem:[#allocation64_spill] sm:$0xff] %v5766_v24  ;;  %v1754_v30 = vmax.f32 %v5766_v24, 0.0 }
 0x2ec   :  { %v1798_v38 = vpack.c.bf16 %v1756_v5, %v1755_v60 }
 0x2ed   :  { %v4435_v46 = vpop.f32.mrb[120].mxu0  ;;  %v1797_v18 = vpack.c.bf16 %v1754_v30, %v1753_v33 }
 0x2ee   :  { %v5771_v62 = vadd.f32 %v4435_v46, %v5592_v34  ;;  %v1565_v52 = vpop.f32.mrb[121].mxu0 }
 0x2ef   :  { %v5774_v22 = vadd.f32 %v5592_v34, %v1565_v52  ;;  %v4436_v41 = vpop.f32.mrb[122].mxu0  ;;  %4509 = vmatprep.mubr.bf16.mxu1 %v1797_v18 }
 0x2f0   :  { %7472 = vst [vmem:[#allocation65_spill] sm:$0xff] %v5771_v62  ;;  %v1759_v56 = vmax.f32 %v5771_v62, 0.0  ;;  %v5778_v35 = vadd.f32 %v4436_v41, %v5592_v34  ;;  %v1568_v36 = vpop.f32.mrb[123].mxu0  ;;  %4510 = vmatmul.mubr.bf16.gmra.mrb[92].mxu1 %v1798_v38 }
 0x2f1   :  { %7473 = vst [vmem:[#allocation66_spill] sm:$0xff] %v5774_v22  ;;  %v1757_v60 = vmax.f32 %v5774_v22, 0.0  ;;  %v5782_v33 = vadd.f32 %v5592_v34, %v1568_v36 }
 0x2f2   :  { %7474 = vst [vmem:[#allocation67_spill] sm:$0xff] %v5778_v35  ;;  %v1760_v5 = vmax.f32 %v5778_v35, 0.0 }
 0x2f3   :  { %7475 = vst [vmem:[#allocation68_spill] sm:$0xff] %v5782_v33  ;;  %v1758_v30 = vmax.f32 %v5782_v33, 0.0 }
 0x2f4   :  { %v1800_v52 = vpack.c.bf16 %v1760_v5, %v1759_v56 }
 0x2f5   :  { %v4439_v46 = vpop.f32.mrb[124].mxu0  ;;  %v1799_v24 = vpack.c.bf16 %v1758_v30, %v1757_v60 }
 0x2f6   :  { %v5787_v18 = vadd.f32 %v4439_v46, %v5592_v34  ;;  %v1581_v62 = vpop.f32.mrb[125].mxu0 }
 0x2f7   :  { %v5790_v41 = vadd.f32 %v5592_v34, %v1581_v62  ;;  %v4440_v38 = vpop.f32.mrb[126].mxu0  ;;  %4513 = vmatprep.mubr.bf16.mxu1 %v1799_v24 }
 0x2f8   :  { %7476 = vst [vmem:[#allocation69_spill] sm:$0xff] %v5787_v18  ;;  %v1763_v22 = vmax.f32 %v5787_v18, 0.0  ;;  %v5794_v36 = vadd.f32 %v4440_v38, %v5592_v34  ;;  %v1584_v35 = vpop.f32.mrb[127].mxu0  ;;  %4514 = vmatmul.mubr.bf16.gmra.mrb[96].mxu1 %v1800_v52 }
 0x2f9   :  { %7477 = vst [vmem:[#allocation70_spill] sm:$0xff] %v5790_v41  ;;  %v1761_v56 = vmax.f32 %v5790_v41, 0.0  ;;  %v5798_v60 = vadd.f32 %v5592_v34, %v1584_v35 }
 0x2fa   :  { %7478 = vst [vmem:[#allocation71_spill] sm:$0xff] %v5794_v36  ;;  %v1764_v5 = vmax.f32 %v5794_v36, 0.0 }
 0x2fb   :  { %7479 = vst [vmem:[#allocation72_spill] sm:$0xff] %v5798_v60  ;;  %v1762_v30 = vmax.f32 %v5798_v60, 0.0 }
 0x2fc   :  { %v1802_v62 = vpack.c.bf16 %v1764_v5, %v1763_v22 }
 0x2fd   :  { %v4443_v46 = vpop.f32.mrb[128].mxu0  ;;  %v1801_v33 = vpack.c.bf16 %v1762_v30, %v1761_v56 }
 0x2fe   :  { %v5803_v24 = vadd.f32 %v4443_v46, %v5592_v34  ;;  %v1597_v18 = vpop.f32.mrb[129].mxu0 }
 0x2ff   :  { %v5806_v38 = vadd.f32 %v5592_v34, %v1597_v18  ;;  %v4444_v52 = vpop.f32.mrb[130].mxu0  ;;  %4517 = vmatprep.mubr.bf16.mxu1 %v1801_v33 }
 0x300   :  { %7480 = vst [vmem:[#allocation73_spill] sm:$0xff] %v5803_v24  ;;  %v1767_v41 = vmax.f32 %v5803_v24, 0.0  ;;  %v5810_v35 = vadd.f32 %v4444_v52, %v5592_v34  ;;  %v1600_v36 = vpop.f32.mrb[131].mxu0  ;;  %4518 = vmatmul.mubr.bf16.gmra.mrb[100].mxu1 %v1802_v62 }
 0x301   :  { %7481 = vst [vmem:[#allocation74_spill] sm:$0xff] %v5806_v38  ;;  %v1765_v22 = vmax.f32 %v5806_v38, 0.0  ;;  %v5814_v56 = vadd.f32 %v5592_v34, %v1600_v36 }
 0x302   :  { %7482 = vst [vmem:[#allocation75_spill] sm:$0xff] %v5810_v35  ;;  %v1768_v5 = vmax.f32 %v5810_v35, 0.0 }
 0x303   :  { %7483 = vst [vmem:[#allocation76_spill] sm:$0xff] %v5814_v56  ;;  %v1766_v30 = vmax.f32 %v5814_v56, 0.0 }
 0x304   :  { %v1804_v18 = vpack.c.bf16 %v1768_v5, %v1767_v41 }
 0x305   :  { %v4447_v46 = vpop.f32.mrb[132].mxu0  ;;  %v1803_v60 = vpack.c.bf16 %v1766_v30, %v1765_v22 }
 0x306   :  { %v5819_v33 = vadd.f32 %v4447_v46, %v5592_v34  ;;  %v1613_v24 = vpop.f32.mrb[133].mxu0 }
 0x307   :  { %v5822_v52 = vadd.f32 %v5592_v34, %v1613_v24  ;;  %v4448_v62 = vpop.f32.mrb[134].mxu0  ;;  %4521 = vmatprep.mubr.bf16.mxu1 %v1803_v60 }
 0x308   :  { %7484 = vst [vmem:[#allocation77_spill] sm:$0xff] %v5819_v33  ;;  %v1771_v38 = vmax.f32 %v5819_v33, 0.0  ;;  %v5826_v36 = vadd.f32 %v4448_v62, %v5592_v34  ;;  %v1616_v35 = vpop.f32.mrb[135].mxu0  ;;  %4522 = vmatmul.mubr.bf16.gmra.mrb[104].mxu1 %v1804_v18 }
 0x309   :  { %7485 = vst [vmem:[#allocation78_spill] sm:$0xff] %v5822_v52  ;;  %v1769_v41 = vmax.f32 %v5822_v52, 0.0  ;;  %v5830_v22 = vadd.f32 %v5592_v34, %v1616_v35 }
 0x30a   :  { %7486 = vst [vmem:[#allocation79_spill] sm:$0xff] %v5826_v36  ;;  %v1772_v5 = vmax.f32 %v5826_v36, 0.0 }
 0x30b   :  { %7487 = vst [vmem:[#allocation80_spill] sm:$0xff] %v5830_v22  ;;  %v1770_v30 = vmax.f32 %v5830_v22, 0.0 }
 0x30c   :  { %v1806_v24 = vpack.c.bf16 %v1772_v5, %v1771_v38 }
 0x30d   :  { %v4451_v46 = vpop.f32.mrb[136].mxu0  ;;  %v1805_v56 = vpack.c.bf16 %v1770_v30, %v1769_v41 }
 0x30e   :  { %v5835_v60 = vadd.f32 %v4451_v46, %v5592_v34  ;;  %v1629_v33 = vpop.f32.mrb[137].mxu0 }
 0x30f   :  { %v5838_v62 = vadd.f32 %v5592_v34, %v1629_v33  ;;  %v4452_v18 = vpop.f32.mrb[138].mxu0  ;;  %4525 = vmatprep.mubr.bf16.mxu1 %v1805_v56  ;;  %v1644_v56 = vlaneseq }
 0x310   :  { %7488 = vst [vmem:[#allocation81_spill] sm:$0xff] %v5835_v60  ;;  %v1775_v52 = vmax.f32 %v5835_v60, 0.0  ;;  %v5842_v35 = vadd.f32 %v4452_v18, %v5592_v34  ;;  %v1632_v36 = vpop.f32.mrb[139].mxu0  ;;  %4526 = vmatmul.mubr.bf16.gmra.mrb[108].mxu1 %v1806_v24  ;;  %v4831_v60 = vmov 1983009808  }
 0x311   :  { %7489 = vst [vmem:[#allocation82_spill] sm:$0xff] %v5838_v62  ;;  %v1773_v38 = vmax.f32 %v5838_v62, 0.0  ;;  %v5846_v41 = vadd.f32 %v5592_v34, %v1632_v36  ;;  %v2333_v22 = vunpack.c.l.s4 %v4831_v60  ;;  %v5850_v16 = vshrl.u32 %v1644_v56, 7  ;;  %v2329_v34 = vld [vmem:[%s7202_s2] sm:$0xff] }
 0x312   :  { %7490 = vst [vmem:[#allocation83_spill] sm:$0xff] %v5842_v35  ;;  %v1776_v5 = vmax.f32 %v5842_v35, 0.0  ;;  %v7498_v62 = vmax.f32 %v5075_v48, 0.0 }
 0x313   :  { %7491 = vst [vmem:[#allocation84_spill] sm:$0xff] %v5846_v41  ;;  %v1774_v30 = vmax.f32 %v5846_v41, 0.0  ;;  %v2334_v18 = vunpack.c.0.s8 %v2333_v22  ;;  %7492 = vst [vmem:[#allocation85_spill] sm:$0xff] %v5850_v16 }
 0x314   :  { %v1808_v33 = vpack.c.bf16 %v1776_v5, %v1775_v52  ;;  %v5870_v5 = vld [vmem:[%s7204_s11] ss:$0 sm:$0xff] }
 0x315   :  { %v1807_v46 = vpack.c.bf16 %v1774_v30, %v1773_v38  ;;  %v2337_v24 = vsub.s32 %v2334_v18, %v5850_v16  ;;  %v1645_v38 = vand.u32 127, %v1644_v56  ;;  %v7496_v56 = vmax.f32 %v5072_v47, 0.0 }
 0x316   :  { %v7497_v16 = vmax.f32 %v5069_v45, 0.0 }
 0x317   :  { %4529 = vmatprep.mubr.bf16.mxu1 %v1807_v46  ;;  %v5856_v36 = vrot.slane %v2329_v34, %v2337_v24  ;;  %vm1646_vm3 = vcmp.ge.s32.totalorder %v1645_v38, 24  ;;  %vm1647_vm4 = vcmp.lt.s32.totalorder %v1645_v38, 56 }
 0x318   :  { %4530 = vmatmul.mubr.bf16.gmra.mrb[112].mxu1 %v1808_v33  ;;  %vm5860_vm5 = vmand %vm1646_vm3, %vm1647_vm4 }
 0x319   :  { %7493 = vst [vmem:[#allocation86_spill] sm:$0xff] %v5856_v36  ;;  %v2346_v52 = vcombine.high %v5856_v36, %v5856_v36  ;;  %v1651_v22 = vsel %vm5860_vm5, %v5595_v55, 0.0  ;;  %v1649_v30 = vsel %vm5860_vm5, %v5598_v42, 0.0  ;;  %v1652_v33 = vsel %vm5860_vm5, %v5601_v54, 0.0 }
 0x31a   :  { %v2171_v18 = vadd.f32 %v1651_v22, %v7496_v56  ;;  %v1650_v55 = vsel %vm5860_vm5, %v5604_v7, 0.0  ;;  %v2169_v41 = vadd.f32 %v1649_v30, %v7497_v16  ;;  %v2172_v54 = vadd.f32 %v1652_v33, %v7498_v62 }
 0x31b   :  { %2384 = vmatprep.mubr.bf16.mxu0 %v2346_v52  ;;  %v2331_v56 = vcombine.high %v2329_v34, %v2329_v34  ;;  %v7499_v7 = vmax.f32 %v5078_v50, 0.0  ;;  %v1655_v48 = vsel %vm5860_vm5, %v5611_v57, 0.0 }
 0x31d   :  { %v2170_v11 = vadd.f32 %v1650_v55, %v7499_v7  ;;  %v5899_v30 = vrot.slane %v2331_v56, %v2337_v24  ;;  %v1656_v24 = vsel %vm5860_vm5, %v5617_v21, 0.0 }
 0x373   :  { %v4471_v46 = vpop.f32.mrb[52].mxu1 }
 0x374   :  { %v1923_v52 = vadd.f32 %v4471_v46, %v5870_v5  ;;  %v1914_v38 = vpop.f32.mrb[53].mxu1 }
 0x375   :  { %v1915_v42 = vadd.f32 %v5870_v5, %v1914_v38  ;;  %v4472_v35 = vpop.f32.mrb[54].mxu1 }
 0x376   :  { %v5889_v36 = vadd.f32 %v2171_v18, %v1923_v52  ;;  %v1926_v47 = vadd.f32 %v4472_v35, %v5870_v5  ;;  %v1917_v22 = vpop.f32.mrb[55].mxu1  ;;  %v1653_v35 = vsel %vm5860_vm5, %v5614_v6, 0.0  ;;  %v1654_v6 = vsel %vm5860_vm5, %v5620_v27, 0.0 }
 0x377   :  { %v5894_v46 = vadd.f32 %v2169_v41, %v1915_v42  ;;  %v1918_v45 = vadd.f32 %v5870_v5, %v1917_v22  ;;  %v2347_v41 = vcombine.high %v5899_v30, %v5899_v30  ;;  %v7501_v52 = vmax.f32 %v5099_v61, 0.0 }
 0x378   :  { %v5897_v16 = vadd.f32 %v2172_v54, %v1926_v47  ;;  %v7502_v54 = vmax.f32 %v5105_v0, 0.0  ;;  %v7503_v27 = vmax.f32 %v5108_v3, 0.0 }
 0x379   :  { %v5904_v62 = vadd.f32 %v2170_v11, %v1918_v45  ;;  %v7500_v11 = vmax.f32 %v5102_v63, 0.0  ;;  %2424 = vmatprep.mubr.bf16.mxu1 %v2347_v41  ;;  %v2173_v38 = vadd.f32 %v1653_v35, %v7501_v52  ;;  %v1659_v35 = vsel %vm5860_vm5, %v5627_v20, 0.0 }
 0x37a   :  { %v2298_v50 = vpack.c.bf16 %v5897_v16, %v5889_v36  ;;  %v2176_v47 = vadd.f32 %v1656_v24, %v7502_v54  ;;  %v2174_v7 = vadd.f32 %v1654_v6, %v7503_v27  ;;  %v1657_v41 = vsel %vm5860_vm5, %v5630_v51, 0.0 }
 0x37b   :  { %v2297_v34 = vpack.c.bf16 %v5904_v62, %v5894_v46  ;;  %v4475_v57 = vpop.f32.mrb[56].mxu1  ;;  %v2175_v33 = vadd.f32 %v1655_v48, %v7500_v11  ;;  %v1660_v24 = vsel %vm5860_vm5, %v5633_v19, 0.0  ;;  %v1658_v6 = vsel %vm5860_vm5, %v5636_v37, 0.0  ;;  %v7524_v62 = vld [vmem:[#allocation47_spill] sm:$0xff] }
 0x37c   :  { %v1939_v18 = vadd.f32 %v4475_v57, %v5870_v5  ;;  %v1930_v55 = vpop.f32.mrb[57].mxu1 }
 0x37d   :  { %v1931_v21 = vadd.f32 %v5870_v5, %v1930_v55  ;;  %v4476_v42 = vpop.f32.mrb[58].mxu1  ;;  %v7505_v55 = vmax.f32 %v5123_v12, 0.0 }
 0x37e   :  { %v5929_v22 = vadd.f32 %v2175_v33, %v1939_v18  ;;  %v1942_v63 = vadd.f32 %v4476_v42, %v5870_v5  ;;  %v1933_v56 = vpop.f32.mrb[59].mxu1  ;;  %v7504_v33 = vmax.f32 %v5126_v14, 0.0 }
 0x37f   :  { %v5934_v45 = vadd.f32 %v2173_v38, %v1931_v21  ;;  %v1934_v48 = vadd.f32 %v5870_v5, %v1933_v56  ;;  %v2177_v52 = vadd.f32 %v1657_v41, %v7505_v55  ;;  %v7506_v21 = vmax.f32 %v5129_v15, 0.0 }
 0x380   :  { %v5937_v61 = vadd.f32 %v2176_v47, %v1942_v63  ;;  %v2179_v20 = vadd.f32 %v1659_v35, %v7504_v33  ;;  %v7507_v63 = vmax.f32 %v5132_v17, 0.0  ;;  %v1664_v35 = vsel %vm5860_vm5, %v5649_v1, 0.0 }
 0x381   :  { %v5942_v0 = vadd.f32 %v2174_v7, %v1934_v48  ;;  %v2180_v42 = vadd.f32 %v1660_v24, %v7506_v21  ;;  %v1663_v7 = vsel %vm5860_vm5, %v5643_v32, 0.0  ;;  %v1661_v48 = vsel %vm5860_vm5, %v5646_v23, 0.0 }
 0x382   :  { %v2300_v3 = vpack.c.bf16 %v5937_v61, %v5929_v22  ;;  %v2178_v37 = vadd.f32 %v1658_v6, %v7507_v63  ;;  %v1662_v33 = vsel %vm5860_vm5, %v5652_v58, 0.0  ;;  %v7509_v6 = vmax.f32 %v5147_v26, 0.0 }
 0x383   :  { %v2299_v57 = vpack.c.bf16 %v5942_v0, %v5934_v45  ;;  %v4479_v11 = vpop.f32.mrb[60].mxu1  ;;  %v7510_v55 = vmax.f32 %v5153_v29, 0.0  ;;  %v7511_v21 = vmax.f32 %v5156_v31, 0.0  ;;  %v1665_v63 = vsel %vm5860_vm5, %v5662_v53, 0.0  ;;  %v7536_v0 = vld [vmem:[#allocation51_spill] sm:$0xff] }
 0x384   :  { %v1955_v51 = vadd.f32 %v4479_v11, %v5870_v5  ;;  %v1946_v18 = vpop.f32.mrb[61].mxu1  ;;  %v7508_v11 = vmax.f32 %v5150_v28, 0.0 }
 0x385   :  { %v1947_v38 = vadd.f32 %v5870_v5, %v1946_v18  ;;  %v4480_v19 = vpop.f32.mrb[62].mxu1  ;;  %v2182_v58 = vadd.f32 %v1662_v33, %v7511_v21  ;;  %v1672_v21 = vsel %vm5860_vm5, %v5681_v9, 0.0  ;;  %v7518_v9 = vld [vmem:[#allocation3_spill] sm:$0xff] }
 0x386   :  { %v5965_v54 = vadd.f32 %v2179_v20, %v1955_v51  ;;  %v1958_v14 = vadd.f32 %v4480_v19, %v5870_v5  ;;  %v1949_v47 = vpop.f32.mrb[63].mxu1  ;;  %v2183_v32 = vadd.f32 %v1663_v7, %v7508_v11  ;;  %v2181_v51 = vadd.f32 %v1661_v48, %v7509_v6 }
 0x387   :  { %v5970_v56 = vadd.f32 %v2177_v52, %v1947_v38  ;;  %v1950_v27 = vadd.f32 %v5870_v5, %v1949_v47  ;;  %v2184_v52 = vadd.f32 %v1664_v35, %v7510_v55  ;;  %v1667_v47 = vsel %vm5860_vm5, %v5659_v13, 0.0 }
 0x388   :  { %v5973_v12 = vadd.f32 %v2180_v42, %v1958_v14  ;;  %v7512_v48 = vmax.f32 %v5174_v43, 0.0  ;;  %v1666_v35 = vsel %vm5860_vm5, %v5668_v25, 0.0  ;;  %v7513_v11 = vmax.f32 %v5171_v40, 0.0 }
 0x389   :  { %v5978_v15 = vadd.f32 %v2178_v37, %v1950_v27  ;;  %v1668_v37 = vsel %vm5860_vm5, %v5665_v2, 0.0  ;;  %v1671_v40 = vsel %vm5860_vm5, %v5675_v59, 0.0 }
 0x38a   :  { %v2302_v17 = vpack.c.bf16 %v5973_v12, %v5965_v54  ;;  %v2187_v13 = vadd.f32 %v1667_v47, %v7512_v48 }
 0x38b   :  { %v2301_v41 = vpack.c.bf16 %v5978_v15, %v5970_v56  ;;  %v4483_v24 = vpop.f32.mrb[64].mxu1  ;;  %v7548_v15 = vld [vmem:[#allocation55_spill] sm:$0xff] }
 0x38c   :  { %v1971_v23 = vadd.f32 %v4483_v24, %v5870_v5  ;;  %v1962_v20 = vpop.f32.mrb[65].mxu1 }
 0x38d   :  { %v1963_v18 = vadd.f32 %v5870_v5, %v1962_v20  ;;  %v4484_v1 = vpop.f32.mrb[66].mxu1 }
 0x38e   :  { %v6001_v38 = vadd.f32 %v2183_v32, %v1971_v23  ;;  %v1974_v28 = vadd.f32 %v4484_v1, %v5870_v5  ;;  %v1965_v19 = vpop.f32.mrb[67].mxu1  ;;  %v2185_v32 = vadd.f32 %v1665_v63, %v7513_v11  ;;  %v7514_v23 = vmax.f32 %v5177_v44, 0.0 }
 0x38f   :  { %v6006_v42 = vadd.f32 %v2181_v51, %v1963_v18  ;;  %v1966_v14 = vadd.f32 %v5870_v5, %v1965_v19  ;;  %v7515_v18 = vmax.f32 %v5180_v49, 0.0  ;;  %v1669_v44 = vsel %vm5860_vm5, %v5678_v4, 0.0 }
 0x390   :  { %v6009_v26 = vadd.f32 %v2184_v52, %v1974_v28  ;;  %v2188_v20 = vadd.f32 %v1668_v37, %v7514_v23  ;;  %v1670_v63 = vsel %vm5860_vm5, %v5684_v39, 0.0  ;;  %v7520_v39 = vld [vmem:[#allocation4_spill] sm:$0xff] }
 0x391   :  { %v6014_v29 = vadd.f32 %v2182_v58, %v1966_v14  ;;  %v2186_v1 = vadd.f32 %v1666_v35, %v7515_v18  ;;  %v7516_v14 = vmax.f32 %v5198_v10, 0.0  ;;  %v7519_v35 = vmax.f32 %v7518_v9, 0.0 }
 0x392   :  { %v2304_v31 = vpack.c.bf16 %v6009_v26, %v6001_v38  ;;  %v7561_v38 = vld [vmem:[#allocation17_spill] sm:$0xff] }
 0x393   :  { %v2303_v27 = vpack.c.bf16 %v6014_v29, %v6006_v42  ;;  %v4487_v7 = vpop.f32.mrb[68].mxu1  ;;  %v2191_v47 = vadd.f32 %v1671_v40, %v7516_v14  ;;  %v7530_v14 = vld [vmem:[#allocation7_spill] sm:$0xff]  ;;  %v7562_v26 = vmax.f32 %v7561_v38, 0.0 }
 0x394   :  { %v1987_v53 = vadd.f32 %v4487_v7, %v5870_v5  ;;  %v1978_v24 = vpop.f32.mrb[69].mxu1  ;;  %v7517_v7 = vmax.f32 %v5195_v8, 0.0 }
 0x395   :  { %v1979_v33 = vadd.f32 %v5870_v5, %v1978_v24  ;;  %v4488_v2 = vpop.f32.mrb[70].mxu1 }
 0x396   :  { %v2251_v6 = vadd.f32 %v2187_v13, %v1987_v53  ;;  %v1990_v43 = vadd.f32 %v4488_v2, %v5870_v5  ;;  %v1981_v51 = vpop.f32.mrb[71].mxu1  ;;  %v2189_v4 = vadd.f32 %v1669_v44, %v7517_v7  ;;  %v2192_v53 = vadd.f32 %v1672_v21, %v7519_v35 }
 0x397   :  { %v2249_v25 = vadd.f32 %v2185_v32, %v1979_v33  ;;  %v1982_v55 = vadd.f32 %v5870_v5, %v1981_v51  ;;  %v7521_v32 = vmax.f32 %v7520_v39, 0.0  ;;  %v7523_v51 = vld [vmem:[#allocation46_spill] sm:$0xff] }
 0x398   :  { %v2252_v52 = vadd.f32 %v2188_v20, %v1990_v43  ;;  %v7522_v20 = vld [vmem:[#allocation45_spill] sm:$0xff]  ;;  %v1673_v18 = vsel %vm5860_vm5, %v7523_v51, 0.0  ;;  %v7535_v39 = vld [vmem:[#allocation50_spill] sm:$0xff] }
 0x399   :  { %v2250_v28 = vadd.f32 %v2186_v1, %v1982_v55  ;;  %v2190_v33 = vadd.f32 %v1670_v63, %v7521_v32  ;;  %v7525_v55 = vld [vmem:[#allocation6_spill] sm:$0xff]  ;;  %v1677_v32 = vsel %vm5860_vm5, %v7535_v39, 0.0 }
 0x39a   :  { %v2306_v19 = vpack.c.bf16 %v2252_v52, %v2251_v6  ;;  %v1675_v6 = vsel %vm5860_vm5, %v7522_v20, 0.0  ;;  %v7526_v52 = vmax.f32 %v7525_v55, 0.0 }
 0x39b   :  { %v4491_v49 = vpop.f32.mrb[72].mxu1  ;;  %v2305_v58 = vpack.c.bf16 %v2250_v28, %v2249_v25  ;;  %v7527_v28 = vld [vmem:[#allocation48_spill] sm:$0xff] }
 0x39c   :  { %v2003_v59 = vadd.f32 %v4491_v49, %v5870_v5  ;;  %v1994_v37 = vpop.f32.mrb[73].mxu1  ;;  %v2195_v40 = vadd.f32 %v1675_v6, %v7526_v52  ;;  %v1674_v44 = vsel %vm5860_vm5, %v7527_v28, 0.0  ;;  %v7528_v49 = vld [vmem:[#allocation5_spill] sm:$0xff]  ;;  %v7539_v6 = vld [vmem:[#allocation52_spill] sm:$0xff] }
 0x39d   :  { %v1995_v48 = vadd.f32 %v5870_v5, %v1994_v37  ;;  %v4492_v13 = vpop.f32.mrb[74].mxu1  ;;  %4070 = vmatprep.subr.bf16.mxu0 %v2305_v58  ;;  %v7529_v36 = vmax.f32 %v7528_v49, 0.0  ;;  %v7544_v28 = vld [vmem:[#allocation12_spill] sm:$0xff] }
 0x39e   :  { %v2255_v24 = vadd.f32 %v2191_v47, %v2003_v59  ;;  %v2006_v10 = vadd.f32 %v4492_v13, %v5870_v5  ;;  %v1997_v11 = vpop.f32.mrb[75].mxu1  ;;  %4071 = vmatpush3.bf16.msra.mxu0 %v2297_v34  ;;  %v1676_v34 = vsel %vm5860_vm5, %v7524_v62, 0.0  ;;  %v7531_v47 = vmax.f32 %v7530_v14, 0.0  ;;  %v7547_v14 = vld [vmem:[#allocation54_spill] sm:$0xff] }
 0x39f   :  { %v2253_v8 = vadd.f32 %v2189_v4, %v1995_v48  ;;  %v1998_v2 = vadd.f32 %v5870_v5, %v1997_v11  ;;  %4072 = vmatprep.subr.bf16.mxu0 %v2306_v19  ;;  %v2193_v16 = vadd.f32 %v1673_v18, %v7529_v36  ;;  %v7532_v4 = vld [vmem:[#allocation8_spill] sm:$0xff] }
 0x3a0   :  { %v2256_v23 = vadd.f32 %v2192_v53, %v2006_v10  ;;  %v2196_v63 = vadd.f32 %v1676_v34, %v7531_v47  ;;  %v7533_v48 = vmax.f32 %v7532_v4, 0.0  ;;  %v7542_v34 = vld [vmem:[#allocation11_spill] sm:$0xff]  ;;  %v1681_v47 = vsel %vm5860_vm5, %v7547_v14, 0.0 }
 0x3a1   :  { %v2254_v43 = vadd.f32 %v2190_v33, %v1998_v2  ;;  %v7537_v2 = vld [vmem:[#allocation10_spill] sm:$0xff] }
 0x3a2   :  { %4073 = vmatpush3.bf16.msra.mxu0 %v2298_v50  ;;  %v2308_v46 = vpack.c.bf16 %v2256_v23, %v2255_v24  ;;  %v2194_v13 = vadd.f32 %v1674_v44, %v7533_v48  ;;  %v7534_v24 = vld [vmem:[#allocation49_spill] sm:$0xff]  ;;  %v7538_v23 = vmax.f32 %v7537_v2, 0.0  ;;  %v7545_v44 = vmax.f32 %v7544_v28, 0.0  ;;  %v7551_v48 = vld [vmem:[#allocation56_spill] sm:$0xff] }
 0x3a3   :  { %v4495_v1 = vpop.f32.mrb[76].mxu1  ;;  %v2307_v25 = vpack.c.bf16 %v2254_v43, %v2253_v8  ;;  %v1679_v10 = vsel %vm5860_vm5, %v7534_v24, 0.0  ;;  %v1678_v43 = vsel %vm5860_vm5, %v7539_v6, 0.0  ;;  %v7558_v6 = vld [vmem:[#allocation57_spill] sm:$0xff] }
 0x3a4   :  { %v2019_v19 = vadd.f32 %v4495_v1, %v5870_v5  ;;  %v2010_v21 = vpop.f32.mrb[77].mxu1  ;;  %v2199_v20 = vadd.f32 %v1679_v10, %v7538_v23  ;;  %v7543_v1 = vmax.f32 %v7542_v34, 0.0  ;;  %v7554_v10 = vld [vmem:[#allocation15_spill] sm:$0xff]  ;;  %v7563_v34 = vld [vmem:[#allocation60_spill] sm:$0xff] }
 0x3a5   :  { %v2011_v50 = vadd.f32 %v5870_v5, %v2010_v21  ;;  %v4496_v58 = vpop.f32.mrb[78].mxu1  ;;  %4074 = vmatprep.subr.bf16.mxu0 %v2307_v25 }
 0x3a6   :  { %v2259_v59 = vadd.f32 %v2195_v40, %v2019_v19  ;;  %v2022_v37 = vadd.f32 %v4496_v58, %v5870_v5  ;;  %v2013_v7 = vpop.f32.mrb[79].mxu1  ;;  %4075 = vmatpush3.bf16.msra.mxu0 %v2299_v57  ;;  %v1680_v57 = vsel %vm5860_vm5, %v7536_v0, 0.0  ;;  %v2198_v19 = vadd.f32 %v1678_v43, %v7545_v44 }
 0x3a7   :  { %v2257_v9 = vadd.f32 %v2193_v16, %v2011_v50  ;;  %v2014_v35 = vadd.f32 %v5870_v5, %v2013_v7  ;;  %4076 = vmatprep.subr.bf16.mxu0 %v2308_v46  ;;  %v7540_v46 = vld [vmem:[#allocation9_spill] sm:$0xff]  ;;  %v2200_v25 = vadd.f32 %v1680_v57, %v7543_v1  ;;  %v7556_v57 = vld [vmem:[#allocation16_spill] sm:$0xff]  ;;  %v1687_v43 = vsel %vm5860_vm5, %v7558_v6, 0.0  ;;  %v7578_v6 = vld [vmem:[#allocation22_spill] sm:$0xff] }
 0x3a8   :  { %v2260_v53 = vadd.f32 %v2196_v63, %v2022_v37  ;;  %v7541_v22 = vmax.f32 %v7540_v46, 0.0  ;;  %v7546_v16 = vld [vmem:[#allocation53_spill] sm:$0xff]  ;;  %v7560_v46 = vld [vmem:[#allocation59_spill] sm:$0xff]  ;;  %v1686_v1 = vsel %vm5860_vm5, %v7563_v34, 0.0 }
 0x3a9   :  { %v2258_v11 = vadd.f32 %v2194_v13, %v2014_v35  ;;  %v1683_v50 = vsel %vm5860_vm5, %v7546_v16, 0.0  ;;  %v7549_v37 = vld [vmem:[#allocation13_spill] sm:$0xff]  ;;  %v1682_v13 = vsel %vm5860_vm5, %v7551_v48, 0.0 }
 0x3aa   :  { %4077 = vmatpush3.bf16.msra.mxu0 %v2300_v3  ;;  %v2310_v45 = vpack.c.bf16 %v2260_v53, %v2259_v59  ;;  %v2197_v61 = vadd.f32 %v1677_v32, %v7541_v22  ;;  %v7550_v7 = vmax.f32 %v7549_v37, 0.0  ;;  %v7552_v53 = vld [vmem:[#allocation14_spill] sm:$0xff]  ;;  %v1688_v22 = vsel %vm5860_vm5, %v7560_v46, 0.0  ;;  %v7580_v46 = vld [vmem:[#allocation23_spill] sm:$0xff] }
 0x3ab   :  { %v4499_v33 = vpop.f32.mrb[80].mxu1  ;;  %v2309_v8 = vpack.c.bf16 %v2258_v11, %v2257_v9  ;;  %v7553_v54 = vmax.f32 %v7552_v53, 0.0  ;;  %v7555_v11 = vmax.f32 %v7554_v10, 0.0  ;;  %v4807_v37 = vld [vmem:[%s7198_s8] sm:$0xff]  }
 0x3ac   :  { %v2035_v51 = vadd.f32 %v4499_v33, %v5870_v5  ;;  %v2026_v18 = vpop.f32.mrb[81].mxu1  ;;  %v2203_v4 = vadd.f32 %v1683_v50, %v7550_v7  ;;  %v7557_v33 = vmax.f32 %v7556_v57, 0.0  ;;  %v7577_v57 = vld [vmem:[#allocation64_spill] sm:$0xff] }
 0x3ad   :  { %v2027_v3 = vadd.f32 %v5870_v5, %v2026_v18  ;;  %v4500_v62 = vpop.f32.mrb[82].mxu1  ;;  %4078 = vmatprep.subr.bf16.mxu0 %v2309_v8  ;;  %v2201_v12 = vadd.f32 %v1681_v47, %v7553_v54  ;;  %v7559_v18 = vld [vmem:[#allocation58_spill] sm:$0xff] }
 0x3ae   :  { %v2263_v55 = vadd.f32 %v2199_v20, %v2035_v51  ;;  %v2038_v52 = vadd.f32 %v4500_v62, %v5870_v5  ;;  %v2029_v40 = vpop.f32.mrb[83].mxu1  ;;  %4079 = vmatpush3.bf16.msra.mxu0 %v2301_v41  ;;  %v1684_v41 = vsel %vm5860_vm5, %v7548_v15, 0.0  ;;  %v2202_v8 = vadd.f32 %v1682_v13, %v7557_v33  ;;  %v4806_v62 = vld [vmem:[%s7194_s4] sm:$0xf] }
 0x3af   :  { %v2261_v21 = vadd.f32 %v2197_v61, %v2027_v3  ;;  %v2030_v49 = vadd.f32 %v5870_v5, %v2029_v40  ;;  %4080 = vmatprep.subr.bf16.mxu0 %v2310_v45  ;;  %v2204_v39 = vadd.f32 %v1684_v41, %v7555_v11  ;;  %v1685_v42 = vsel %vm5860_vm5, %v7559_v18, 0.0  ;;  %v7569_v47 = vld [vmem:[#allocation2_spill] sm:$0xff] }
 0x3b0   :  { %v2264_v36 = vadd.f32 %v2200_v25, %v2038_v52  ;;  %v7564_v52 = vld [vmem:[#allocation18_spill] sm:$0xff]  ;;  %v1690_v33 = vsel %vm5860_vm5, %v7577_v57, 0.0 }
 0x3b1   :  { %v2262_v58 = vadd.f32 %v2198_v19, %v2030_v49  ;;  %v7565_v40 = vmax.f32 %v7564_v52, 0.0  ;;  %v7567_v49 = vld [vmem:[#allocation19_spill] sm:$0xff] }
 0x3b2   :  { %4081 = vmatpush3.bf16.msra.mxu0 %v2302_v17  ;;  %v2312_v56 = vpack.c.bf16 %v2264_v36, %v2263_v55  ;;  %v7568_v36 = vmax.f32 %v7567_v49, 0.0  ;;  %v4808_v52 = vld [vmem:[%s7198_s8 + $0x8] sm:$0xff]   ;;  %v7585_v49 = vld [vmem:[#allocation66_spill] sm:$0xff] }
 0x3b3   :  { %v4503_v63 = vpop.f32.mrb[84].mxu1  ;;  %v2311_v59 = vpack.c.bf16 %v2262_v58, %v2261_v21  ;;  %v2205_v28 = vadd.f32 %v1685_v42, %v7565_v40  ;;  %v7566_v21 = vld [vmem:[#allocation86_spill] sm:$0xff] }
 0x3b4   :  { %v2051_v9 = vadd.f32 %v4503_v63, %v5870_v5  ;;  %v2042_v35 = vpop.f32.mrb[85].mxu1  ;;  %v2208_v16 = vadd.f32 %v1688_v22, %v7568_v36  ;;  %v7581_v22 = vmax.f32 %v7580_v46, 0.0  ;;  %v1693_v36 = vsel %vm5860_vm5, %v7585_v49, 0.0  ;;  %v4810_v46 = vld [vmem:[%s7198_s8 + $0x18] sm:$0xff]  }
 0x3b5   :  { %v2043_v17 = vadd.f32 %v5870_v5, %v2042_v35  ;;  %v4504_v24 = vpop.f32.mrb[86].mxu1  ;;  %4082 = vmatprep.subr.bf16.mxu0 %v2311_v59  ;;  %v7573_v35 = vld [vmem:[#allocation62_spill] sm:$0xff] }
 0x3b6   :  { %v6151_v32 = vadd.f32 %v2203_v4, %v2051_v9  ;;  %v2054_v45 = vadd.f32 %v4504_v24, %v5870_v5  ;;  %v2045_v0 = vpop.f32.mrb[87].mxu1  ;;  %4083 = vmatpush3.bf16.msra.mxu0 %v2303_v27  ;;  %v4775_v27 = vld [vmem:[%s7203_s1] sm:$0xff]   ;;  %v7572_v4 = vld [vmem:[#allocation61_spill] sm:$0xff]  ;;  %v4776_v9 = vld [vmem:[%s7203_s1 + $0x8] sm:$0xff]   ;;  %v1689_v53 = vsel %vm5860_vm5, %v7573_v35, 0.0 }
 0x3b7   :  { %v6159_v2 = vadd.f32 %v2201_v12, %v2043_v17  ;;  %v2046_v23 = vadd.f32 %v5870_v5, %v2045_v0  ;;  %4084 = vmatprep.subr.bf16.mxu0 %v2312_v56  ;;  %v7570_v56 = vld [vmem:[#allocation20_spill] sm:$0xff]  ;;  %v1691_v48 = vsel %vm5860_vm5, %v7572_v4, 0.0  ;;  %v7574_v17 = vld [vmem:[#allocation63_spill] sm:$0xff] }
 0x3b8   :  { %v6162_v20 = vadd.f32 %v2204_v39, %v2054_v45  ;;  %v7571_v15 = vmax.f32 %v7570_v56, 0.0  ;;  %v4777_v12 = vld [vmem:[%s7203_s1 + $0x10] sm:$0xff]   ;;  %v1692_v24 = vsel %vm5860_vm5, %v7574_v17, 0.0  ;;  %v7575_v39 = vld [vmem:[#allocation21_spill] sm:$0xff] }
 0x3b9   :  { %v6167_v51 = vadd.f32 %v2202_v8, %v2046_v23  ;;  %v7576_v45 = vmax.f32 %v7575_v39, 0.0 }
 0x3ba   :  { %v2314_v29 = vpack.c.bf16 %v6162_v20, %v6151_v32  ;;  %4085 = vmatpush3.bf16.msra.mxu0 %v2304_v31  ;;  %v2207_v31 = vadd.f32 %v1687_v43, %v7562_v26  ;;  %v2206_v41 = vadd.f32 %v1686_v1, %v7571_v15  ;;  %v7579_v43 = vmax.f32 %v7578_v6, 0.0  ;;  %v7594_v6 = vld [vmem:[#allocation28_spill] sm:$0xff] }
 0x3bb   :  { %v2313_v61 = vpack.c.bf16 %v6167_v51, %v6159_v2  ;;  %v4507_v3 = vpop.f32.mrb[88].mxu1  ;;  %4720 = vmatprep.subr.msk.bf16.mxu0 %vm374_vm0, %v4806_v62  ;;  %v2211_v0 = vadd.f32 %v1691_v48, %v7576_v45  ;;  %v7589_v48 = vld [vmem:[#allocation68_spill] sm:$0xff]  ;;  %v7592_v45 = vld [vmem:[#allocation27_spill] sm:$0xff]  ;;  %v7621_v51 = vld [vmem:[#allocation78_spill] sm:$0xff] }
 0x3bc   :  { %v2067_v25 = vadd.f32 %v4507_v3, %v5870_v5  ;;  %v2058_v55 = vpop.f32.mrb[89].mxu1  ;;  %v2209_v18 = vadd.f32 %v1689_v53, %v7579_v43  ;;  %v2212_v3 = vadd.f32 %v1692_v24, %v7581_v22  ;;  %v7595_v43 = vmax.f32 %v7594_v6, 0.0  ;;  %v4784_v2 = vld [vmem:[%s7203_s1 + $0x48] sm:$0xff]  }
 0x3bd   :  { %v2059_v44 = vadd.f32 %v5870_v5, %v2058_v55  ;;  %v4508_v19 = vpop.f32.mrb[90].mxu1  ;;  %2385 = vmatmul.mubr.bf16.vlgmr.msra.gmra.mrb[140].mxu0 %v7566_v21  ;;  %v4778_v21 = vld [vmem:[%s7203_s1 + $0x18] sm:$0xff]  }
 0x3be   :  { %v6201_v50 = vadd.f32 %v2207_v31, %v2067_v25  ;;  %v2070_v58 = vadd.f32 %v4508_v19, %v5870_v5  ;;  %v2061_v14 = vpop.f32.mrb[91].mxu1  ;;  %4534 = vmatpush3.bf16.msra.mxu0 %v7569_v47  ;;  %4535 = vmatprep.mubr.msk.bf16.mxu0 %vm277_vm1, %v4775_v27  ;;  %v7582_v31 = vld [vmem:[#allocation24_spill] sm:$0xff] }
 0x3bf   :  { %v6208_v63 = vadd.f32 %v2205_v28, %v2059_v44  ;;  %v2062_v59 = vadd.f32 %v5870_v5, %v2061_v14  ;;  %4615 = vmatprep.subr.bf16.mxu0 %v4807_v37  ;;  %v7583_v34 = vmax.f32 %v7582_v31, 0.0  ;;  %v7584_v28 = vld [vmem:[#allocation65_spill] sm:$0xff]  ;;  %v7586_v14 = vld [vmem:[#allocation67_spill] sm:$0xff] }
 0x3c0   :  { %v6214_v7 = vadd.f32 %v2208_v16, %v2070_v58  ;;  %v1695_v44 = vsel %vm5860_vm5, %v7584_v28, 0.0  ;;  %v4779_v58 = vld [vmem:[%s7203_s1 + $0x20] sm:$0xff]   ;;  %v1696_v47 = vsel %vm5860_vm5, %v7586_v14, 0.0  ;;  %v4780_v31 = vld [vmem:[%s7203_s1 + $0x28] sm:$0xff]  }
 0x3c1   :  { %v6219_v13 = vadd.f32 %v2206_v41, %v2062_v59  ;;  %v2210_v1 = vadd.f32 %v1690_v33, %v7583_v34  ;;  %v4809_v41 = vld [vmem:[%s7198_s8 + $0x10] sm:$0xff]   ;;  %v7587_v59 = vld [vmem:[#allocation25_spill] sm:$0xff]  ;;  %v7597_v34 = vld [vmem:[#allocation70_spill] sm:$0xff] }
 0x3c2   :  { %v2316_v54 = vpack.c.bf16 %v6214_v7, %v6201_v50  ;;  %v7598_v28 = vld [vmem:[#allocation71_spill] sm:$0xff] }
 0x3c3   :  { %v2315_v10 = vpack.c.bf16 %v6219_v13, %v6208_v63  ;;  %v4511_v11 = vpop.f32.mrb[92].mxu1  ;;  %v4786_v63 = vld [vmem:[%s7203_s1 + $0x58] sm:$0xff]   ;;  %v7633_v13 = vld [vmem:[#allocation82_spill] sm:$0xff] }
 0x3c4   :  { %v2083_v8 = vadd.f32 %v4511_v11, %v5870_v5  ;;  %v2074_v23 = vpop.f32.mrb[93].mxu1 }
 0x3c5   :  { %v2075_v42 = vadd.f32 %v5870_v5, %v2074_v23  ;;  %v4512_v27 = vpop.f32.mrb[94].mxu1  ;;  %4536 = vmatmul.mubr.msk.bf16.vlgmr.msra.gmra.mrb[144].mxu0 %vm277_vm1, %v4776_v9  ;;  %v1694_v9 = vsel %vm5860_vm5, %v7589_v48, 0.0 }
 0x3c6   :  { %v6249_v62 = vadd.f32 %v2211_v0, %v2083_v8  ;;  %v2086_v38 = vadd.f32 %v4512_v27, %v5870_v5  ;;  %v2077_v26 = vpop.f32.mrb[95].mxu1  ;;  %4539 = vmatprep.mubr.msk.bf16.mxu0 %vm277_vm1, %v4777_v12  ;;  %4616 = vmatpush3.bf16.msra.mxu0 %v4807_v37  ;;  %v7588_v37 = vmax.f32 %v7587_v59, 0.0  ;;  %v7590_v12 = vld [vmem:[#allocation26_spill] sm:$0xff]  ;;  %v7593_v0 = vmax.f32 %v7592_v45, 0.0  ;;  %v7606_v45 = vld [vmem:[#allocation32_spill] sm:$0xff] }
 0x3c7   :  { %v6255_v25 = vadd.f32 %v2209_v18, %v2075_v42  ;;  %v2078_v55 = vadd.f32 %v5870_v5, %v2077_v26  ;;  %4617 = vmatprep.subr.bf16.mxu0 %v4808_v52  ;;  %v7591_v17 = vmax.f32 %v7590_v12, 0.0  ;;  %v2214_v18 = vadd.f32 %v1694_v9, %v7595_v43  ;;  %v7608_v43 = vld [vmem:[#allocation73_spill] sm:$0xff] }
 0x3c8   :  { %v6261_v40 = vadd.f32 %v2212_v3, %v2086_v38  ;;  %v2215_v4 = vadd.f32 %v1695_v44, %v7588_v37  ;;  %v2216_v57 = vadd.f32 %v1696_v47, %v7593_v0  ;;  %v7596_v3 = vld [vmem:[#allocation69_spill] sm:$0xff]  ;;  %v1700_v44 = vsel %vm5860_vm5, %v7598_v28, 0.0  ;;  %v7601_v47 = vld [vmem:[#allocation72_spill] sm:$0xff]  ;;  %v7602_v37 = vld [vmem:[#allocation30_spill] sm:$0xff] }
 0x3c9   :  { %v6266_v19 = vadd.f32 %v2210_v1, %v2078_v55  ;;  %v2213_v24 = vadd.f32 %v1693_v36, %v7591_v17  ;;  %v1699_v38 = vsel %vm5860_vm5, %v7596_v3, 0.0  ;;  %v1697_v1 = vsel %vm5860_vm5, %v7597_v34, 0.0  ;;  %v7599_v36 = vld [vmem:[#allocation29_spill] sm:$0xff]  ;;  %v7609_v3 = vld [vmem:[#allocation74_spill] sm:$0xff] }
 0x3ca   :  { %v2318_v16 = vpack.c.bf16 %v6261_v40, %v6249_v62  ;;  %4618 = vmatpush3.bf16.msra.mxu0 %v4808_v52  ;;  %v4781_v52 = vld [vmem:[%s7203_s1 + $0x30] sm:$0xff]   ;;  %v7607_v0 = vmax.f32 %v7606_v45, 0.0  ;;  %v4783_v34 = vld [vmem:[%s7203_s1 + $0x40] sm:$0xff]   ;;  %v4812_v40 = vld [vmem:[%s7196_s6 + $0x8] sm:$0xff]  }
 0x3cb   :  { %v2317_v56 = vpack.c.bf16 %v6266_v19, %v6255_v25  ;;  %v4515_v15 = vpop.f32.mrb[96].mxu1  ;;  %4619 = vmatprep.subr.bf16.mxu0 %v4809_v41  ;;  %v4790_v19 = vld [vmem:[%s7203_s1 + $0x70] sm:$0xff]   ;;  %v4811_v62 = vld [vmem:[%s7196_s6] sm:$0xff]  }
 0x3cc   :  { %v2099_v35 = vadd.f32 %v4515_v15, %v5870_v5  ;;  %v2090_v53 = vpop.f32.mrb[97].mxu1  ;;  %v1698_v15 = vsel %vm5860_vm5, %v7601_v47, 0.0 }
 0x3cd   :  { %v2091_v11 = vadd.f32 %v5870_v5, %v2090_v53  ;;  %v4516_v39 = vpop.f32.mrb[98].mxu1  ;;  %4540 = vmatmul.mubr.msk.bf16.gmra.mrb[148].mxu0 %vm277_vm1, %v4778_v21  ;;  %v7604_v53 = vld [vmem:[#allocation31_spill] sm:$0xff] }
 0x3ce   :  { %v6299_v33 = vadd.f32 %v2215_v4, %v2099_v35  ;;  %v2102_v8 = vadd.f32 %v4516_v39, %v5870_v5  ;;  %v2093_v23 = vpop.f32.mrb[99].mxu1  ;;  %4543 = vmatprep.mubr.msk.bf16.mxu0 %vm277_vm1, %v4779_v58  ;;  %4620 = vmatpush3.bf16.msra.mxu0 %v4809_v41  ;;  %v7600_v58 = vmax.f32 %v7599_v36, 0.0  ;;  %v7603_v4 = vmax.f32 %v7602_v37, 0.0 }
 0x3cf   :  { %v6305_v42 = vadd.f32 %v2213_v24, %v2091_v11  ;;  %v2094_v27 = vadd.f32 %v5870_v5, %v2093_v23  ;;  %4621 = vmatprep.subr.bf16.mxu0 %v4810_v46  ;;  %v7605_v12 = vmax.f32 %v7604_v53, 0.0 }
 0x3d0   :  { %v6311_v22 = vadd.f32 %v2216_v57, %v2102_v8  ;;  %v2219_v14 = vadd.f32 %v1699_v38, %v7600_v58  ;;  %v2217_v48 = vadd.f32 %v1697_v1, %v7603_v4  ;;  %v2218_v57 = vadd.f32 %v1698_v15, %v7607_v0  ;;  %v7610_v1 = vld [vmem:[#allocation75_spill] sm:$0xff] }
 0x3d1   :  { %v6316_v26 = vadd.f32 %v2214_v18, %v2094_v27  ;;  %v2220_v17 = vadd.f32 %v1700_v44, %v7605_v12  ;;  %v1703_v18 = vsel %vm5860_vm5, %v7608_v43, 0.0  ;;  %v1701_v38 = vsel %vm5860_vm5, %v7609_v3, 0.0  ;;  %v7622_v3 = vld [vmem:[#allocation79_spill] sm:$0xff] }
 0x3d2   :  { %v2320_v55 = vpack.c.bf16 %v6311_v22, %v6299_v33  ;;  %4622 = vmatpush3.bf16.msra.mxu0 %v4810_v46  ;;  %v4782_v46 = vld [vmem:[%s7203_s1 + $0x38] sm:$0xff]   ;;  %v4817_v22 = vld [vmem:[%s7196_s6 + $0x30] sm:$0xff]  }
 0x3d3   :  { %v2319_v21 = vpack.c.bf16 %v6316_v26, %v6305_v42  ;;  %v4519_v49 = vpop.f32.mrb[100].mxu1  ;;  %v4814_v33 = vld [vmem:[%s7196_s6 + $0x18] sm:$0xff]   ;;  %v4816_v42 = vld [vmem:[%s7196_s6 + $0x28] sm:$0xff]  }
 0x3d4   :  { %v2115_v41 = vadd.f32 %v4519_v49, %v5870_v5  ;;  %v2106_v59 = vpop.f32.mrb[101].mxu1  ;;  %v7611_v49 = vld [vmem:[#allocation33_spill] sm:$0xff] }
 0x3d5   :  { %v2107_v9 = vadd.f32 %v5870_v5, %v2106_v59  ;;  %v4520_v35 = vpop.f32.mrb[102].mxu1  ;;  %4544 = vmatmul.mubr.msk.bf16.gmra.mrb[152].mxu0 %vm277_vm1, %v4780_v31  ;;  %v7612_v36 = vmax.f32 %v7611_v49, 0.0  ;;  %v7614_v59 = vld [vmem:[#allocation34_spill] sm:$0xff]  ;;  %v4818_v26 = vld [vmem:[%s7196_s6 + $0x38] sm:$0xff]  }
 0x3d6   :  { %v2283_v24 = vadd.f32 %v2219_v14, %v2115_v41  ;;  %v2118_v11 = vadd.f32 %v4520_v35, %v5870_v5  ;;  %v2109_v39 = vpop.f32.mrb[103].mxu1  ;;  %4547 = vmatprep.mubr.msk.bf16.mxu0 %vm277_vm1, %v4781_v52  ;;  %v1704_v52 = vsel %vm5860_vm5, %v7610_v1, 0.0  ;;  %v7613_v14 = vld [vmem:[#allocation76_spill] sm:$0xff]  ;;  %v7615_v37 = vmax.f32 %v7614_v59, 0.0  ;;  %v7616_v35 = vld [vmem:[#allocation35_spill] sm:$0xff]  ;;  %v7623_v1 = vld [vmem:[#allocation37_spill] sm:$0xff] }
 0x3d7   :  { %v2281_v8 = vadd.f32 %v2217_v48, %v2107_v9  ;;  %v2110_v23 = vadd.f32 %v5870_v5, %v2109_v39  ;;  %v2223_v58 = vadd.f32 %v1703_v18, %v7612_v36  ;;  %v1702_v47 = vsel %vm5860_vm5, %v7613_v14, 0.0  ;;  %v7618_v39 = vld [vmem:[#allocation36_spill] sm:$0xff] }
 0x3d8   :  { %v2284_v6 = vadd.f32 %v2220_v17, %v2118_v11  ;;  %v2221_v4 = vadd.f32 %v1701_v38, %v7615_v37  ;;  %v7617_v53 = vmax.f32 %v7616_v35, 0.0  ;;  %v7619_v45 = vmax.f32 %v7618_v39, 0.0 }
 0x3d9   :  { %v2282_v27 = vadd.f32 %v2218_v57, %v2110_v23  ;;  %v1708_v38 = vsel %vm5860_vm5, %v7622_v3, 0.0 }
 0x3da   :  { %v2322_v31 = vpack.c.bf16 %v2284_v6, %v2283_v24  ;;  %v2224_v12 = vadd.f32 %v1704_v52, %v7617_v53  ;;  %v2222_v0 = vadd.f32 %v1702_v47, %v7619_v45  ;;  %v7620_v6 = vld [vmem:[#allocation77_spill] sm:$0xff]  ;;  %v7624_v52 = vmax.f32 %v7623_v1, 0.0 }
 0x3db   :  { %v4523_v28 = vpop.f32.mrb[104].mxu1  ;;  %v2321_v44 = vpack.c.bf16 %v2282_v27, %v2281_v8  ;;  %v1707_v43 = vsel %vm5860_vm5, %v7620_v6, 0.0 }
 0x3dc   :  { %v2131_v15 = vadd.f32 %v4523_v28, %v5870_v5  ;;  %v2122_v41 = vpop.f32.mrb[105].mxu1  ;;  %v2227_v28 = vadd.f32 %v1707_v43, %v7624_v52 }
 0x3dd   :  { %v2123_v48 = vadd.f32 %v5870_v5, %v2122_v41  ;;  %v4524_v9 = vpop.f32.mrb[106].mxu1  ;;  %4092 = vmatprep.subr.bf16.mxu1 %v2321_v44  ;;  %4548 = vmatmul.mubr.msk.bf16.gmra.mrb[156].mxu0 %vm277_vm1, %v4782_v46  ;;  %v4785_v46 = vld [vmem:[%s7203_s1 + $0x50] sm:$0xff]  }
 0x3de   :  { %v2287_v17 = vadd.f32 %v2223_v58, %v2131_v15  ;;  %v2134_v24 = vadd.f32 %v4524_v9, %v5870_v5  ;;  %v2125_v11 = vpop.f32.mrb[107].mxu1  ;;  %4093 = vmatpush3.bf16.msra.mxu1 %v2313_v61  ;;  %4551 = vmatprep.mubr.msk.bf16.mxu0 %vm277_vm1, %v4783_v34  ;;  %v1705_v61 = vsel %vm5860_vm5, %v7621_v51, 0.0  ;;  %v7625_v44 = vld [vmem:[#allocation80_spill] sm:$0xff]  ;;  %v7628_v15 = vld [vmem:[#allocation39_spill] sm:$0xff] }
 0x3df   :  { %v2285_v57 = vadd.f32 %v2221_v4, %v2123_v48  ;;  %v2126_v8 = vadd.f32 %v5870_v5, %v2125_v11  ;;  %4094 = vmatprep.subr.bf16.mxu1 %v2322_v31  ;;  %v1706_v49 = vsel %vm5860_vm5, %v7625_v44, 0.0  ;;  %v7629_v41 = vmax.f32 %v7628_v15, 0.0  ;;  %v7630_v9 = vld [vmem:[#allocation40_spill] sm:$0xff]  ;;  %v7632_v11 = vld [vmem:[#allocation81_spill] sm:$0xff]  ;;  %v4788_v15 = vld [vmem:[%s7203_s1 + $0x68] sm:$0xff]  }
 0x3e0   :  { %v2288_v23 = vadd.f32 %v2224_v12, %v2134_v24  ;;  %v7631_v35 = vmax.f32 %v7630_v9, 0.0  ;;  %v1711_v39 = vsel %vm5860_vm5, %v7632_v11, 0.0 }
 0x3e1   :  { %v2286_v18 = vadd.f32 %v2222_v0, %v2126_v8  ;;  %v2228_v59 = vadd.f32 %v1708_v38, %v7629_v41  ;;  %v7634_v8 = vld [vmem:[#allocation83_spill] sm:$0xff] }
 0x3e2   :  { %4095 = vmatpush3.bf16.msra.mxu1 %v2314_v29  ;;  %v2324_v27 = vpack.c.bf16 %v2288_v23, %v2287_v17  ;;  %v7626_v29 = vld [vmem:[#allocation38_spill] sm:$0xff]  ;;  %v2226_v53 = vadd.f32 %v1706_v49, %v7631_v35  ;;  %v1712_v23 = vsel %vm5860_vm5, %v7634_v8, 0.0 }
 0x3e3   :  { %v4527_v31 = vpop.f32.mrb[108].mxu1  ;;  %v2323_v34 = vpack.c.bf16 %v2286_v18, %v2285_v57  ;;  %v7627_v36 = vmax.f32 %v7626_v29, 0.0  ;;  %v4787_v57 = vld [vmem:[%s7203_s1 + $0x60] sm:$0xff]   ;;  %v7635_v18 = vld [vmem:[#allocation41_spill] sm:$0xff] }
 0x3e4   :  { %v2147_v32 = vadd.f32 %v4527_v31, %v5870_v5  ;;  %v2138_v20 = vpop.f32.mrb[109].mxu1  ;;  %v6516_v35 = vld [vmem:[%s7197_s5] ss:$0 sm:$0xff] }
 0x3e5   :  { %v2225_v58 = vadd.f32 %v1705_v61, %v7627_v36  ;;  %v2139_v14 = vadd.f32 %v5870_v5, %v2138_v20  ;;  %v4528_v47 = vpop.f32.mrb[110].mxu1  ;;  %4096 = vmatprep.subr.bf16.mxu1 %v2323_v34  ;;  %4552 = vmatmul.mubr.msk.bf16.gmra.mrb[160].mxu0 %vm277_vm1, %v4784_v2  ;;  %v7636_v2 = vmax.f32 %v7635_v18, 0.0  ;;  %v7637_v61 = vld [vmem:[#allocation84_spill] sm:$0xff]  ;;  %v7640_v34 = vld [vmem:[#allocation43_spill] sm:$0xff] }
 0x3e6   :  { %v2291_v37 = vadd.f32 %v2227_v28, %v2147_v32  ;;  %v2150_v4 = vadd.f32 %v4528_v47, %v5870_v5  ;;  %v2141_v48 = vpop.f32.mrb[111].mxu1  ;;  %4097 = vmatpush3.bf16.msra.mxu1 %v2315_v10  ;;  %4555 = vmatprep.mubr.msk.bf16.mxu0 %vm277_vm1, %v4785_v46  ;;  %v1709_v10 = vsel %vm5860_vm5, %v7633_v13, 0.0  ;;  %v7641_v1 = vmax.f32 %v7640_v34, 0.0  ;;  %v7642_v32 = vld [vmem:[#allocation44_spill] sm:$0xff] }
 0x3e7   :  { %v2289_v12 = vadd.f32 %v2225_v58, %v2139_v14  ;;  %v2142_v17 = vadd.f32 %v5870_v5, %v2141_v48  ;;  %4098 = vmatprep.subr.bf16.mxu1 %v2324_v27  ;;  %v2231_v51 = vadd.f32 %v1711_v39, %v7636_v2  ;;  %v1710_v27 = vsel %vm5860_vm5, %v7637_v61, 0.0 }
 0x3e8   :  { %v2292_v24 = vadd.f32 %v2228_v59, %v2150_v4  ;;  %v2232_v52 = vadd.f32 %v1712_v23, %v7641_v1  ;;  %v7643_v20 = vmax.f32 %v7642_v32, 0.0  ;;  %v4822_v1 = vld [vmem:[%s7200_s10 + $0x10] sm:$0xff]  }
 0x3e9   :  { %v2290_v45 = vadd.f32 %v2226_v53, %v2142_v17 }
 0x3ea   :  { %4099 = vmatpush3.bf16.msra.mxu1 %v2316_v54  ;;  %v2326_v0 = vpack.c.bf16 %v2292_v24, %v2291_v37  ;;  %v7638_v54 = vld [vmem:[#allocation42_spill] sm:$0xff]  ;;  %v2230_v29 = vadd.f32 %v1710_v27, %v7643_v20 }
 0x3eb   :  { %v4531_v6 = vpop.f32.mrb[112].mxu1  ;;  %v2325_v43 = vpack.c.bf16 %v2290_v45, %v2289_v12  ;;  %v7639_v46 = vmax.f32 %v7638_v54, 0.0 }
 0x3ec   :  { %v2163_v50 = vadd.f32 %v4531_v6, %v5870_v5  ;;  %v2154_v7 = vpop.f32.mrb[113].mxu1 }
 0x3ed   :  { %v2229_v3 = vadd.f32 %v1709_v10, %v7639_v46  ;;  %v2155_v38 = vadd.f32 %v5870_v5, %v2154_v7  ;;  %v4532_v31 = vpop.f32.mrb[114].mxu1  ;;  %4100 = vmatprep.subr.bf16.mxu1 %v2325_v43  ;;  %4556 = vmatmul.mubr.msk.bf16.gmra.mrb[164].mxu0 %vm277_vm1, %v4786_v63 }
 0x3ee   :  { %v2295_v28 = vadd.f32 %v2231_v51, %v2163_v50  ;;  %v2166_v44 = vadd.f32 %v4532_v31, %v5870_v5  ;;  %v2157_v49 = vpop.f32.mrb[115].mxu1  ;;  %4101 = vmatpush3.bf16.msra.mxu1 %v2317_v56  ;;  %4559 = vmatprep.mubr.msk.bf16.mxu0 %vm277_vm1, %v4787_v57  ;;  %v4821_v50 = vld [vmem:[%s7200_s10 + $0x8] sm:$0xff]  }
 0x3ef   :  { %v2293_v36 = vadd.f32 %v2229_v3, %v2155_v38  ;;  %v2158_v58 = vadd.f32 %v5870_v5, %v2157_v49  ;;  %4102 = vmatprep.subr.bf16.mxu1 %v2326_v0  ;;  %v4791_v5 = vld [vmem:[%s7203_s1 + $0x78] sm:$0xff]  }
 0x3f0   :  { %v2296_v14 = vadd.f32 %v2232_v52, %v2166_v44 }
 0x3f1   :  { %v2294_v47 = vadd.f32 %v2230_v29, %v2158_v58 }
 0x3f2   :  { %4103 = vmatpush3.bf16.msra.mxu1 %v2318_v16  ;;  %v2328_v25 = vpack.c.bf16 %v2296_v14, %v2295_v28  ;;  %v4813_v16 = vld [vmem:[%s7196_s6 + $0x10] sm:$0xff]  }
 0x3f3   :  { %v2327_v56 = vpack.c.bf16 %v2294_v47, %v2293_v36  ;;  %v4823_v36 = vld [vmem:[%s7200_s10 + $0x18] sm:$0xff]  }
 0x3f5   :  { %4104 = vmatprep.subr.bf16.mxu1 %v2327_v56  ;;  %4560 = vmatmul.mubr.msk.bf16.gmra.mrb[168].mxu0 %vm277_vm1, %v4788_v15 }
 0x3f6   :  { %4105 = vmatpush3.bf16.msra.mxu1 %v2319_v21  ;;  %4563 = vmatprep.mubr.msk.bf16.mxu0 %vm277_vm1, %v4790_v19 }
 0x3f7   :  { %4106 = vmatprep.subr.bf16.mxu1 %v2328_v25 }
 0x3fa   :  { %4107 = vmatpush3.bf16.msra.mxu1 %v2320_v55  ;;  %v4819_v55 = vld [vmem:[%s7200_s10] sm:$0xff]  }
 0x3fb   :  { %4567 = vmatprep.subr.bf16.mxu1 %v4811_v62 }
 0x3fd   :  { %2425 = vmatmul.mubr.bf16.vlgmr.msra.gmra.mrb[116].mxu1 %v5899_v30  ;;  %4564 = vmatmul.mubr.msk.bf16.gmra.mrb[172].mxu0 %vm277_vm1, %v4791_v5  ;;  %v4815_v30 = vld [vmem:[%s7196_s6 + $0x20] sm:$0xff]  }
 0x3fe   :  { %4568 = vmatpush3.bf16.msra.mxu1 %v4811_v62  ;;  %v4824_v5 = vld [vmem:[%s7200_s10 + $0x20] sm:$0xff]  }
 0x3ff   :  { %4569 = vmatprep.subr.bf16.mxu1 %v4812_v40 }
 0x402   :  { %4570 = vmatpush3.bf16.msra.mxu1 %v4812_v40 }
 0x403   :  { %4571 = vmatprep.subr.bf16.mxu1 %v4813_v16 }
 0x406   :  { %4572 = vmatpush3.bf16.msra.mxu1 %v4813_v16 }
 0x407   :  { %4573 = vmatprep.subr.bf16.mxu1 %v4814_v33 }
 0x40a   :  { %4574 = vmatpush3.bf16.msra.mxu1 %v4814_v33 }
 0x40b   :  { %4575 = vmatprep.subr.bf16.mxu1 %v4815_v30 }
 0x40e   :  { %4576 = vmatpush3.bf16.msra.mxu1 %v4815_v30 }
 0x40f   :  { %4577 = vmatprep.subr.bf16.mxu1 %v4816_v42 }
 0x412   :  { %4578 = vmatpush3.bf16.msra.mxu1 %v4816_v42 }
 0x413   :  { %4579 = vmatprep.subr.bf16.mxu1 %v4817_v22 }
 0x416   :  { %4580 = vmatpush3.bf16.msra.mxu1 %v4817_v22 }
 0x417   :  { %4581 = vmatprep.subr.bf16.mxu1 %v4818_v26 }
 0x41a   :  { %4582 = vmatpush3.bf16.msra.mxu1 %v4818_v26  ;;  %v4825_v26 = vld [vmem:[%s7200_s10 + $0x28] sm:$0xff]  }
 0x41b   :  { %4655 = vmatprep.subr.bf16.mxu1 %v4819_v55 }
 0x490   :  { %v4086_v21 = vpop.f32.mrb[140].mxu0 }
 0x491   :  { %v4087_v41 = vpop.f32.mrb[141].mxu0 }
 0x492   :  { %v6511_v59 = vadd.f32 %v4087_v41, %v4086_v21  ;;  %v4089_v37 = vpop.f32.mrb[142].mxu0 }
 0x493   :  { %v4090_v4 = vpop.f32.mrb[143].mxu0 }
 0x498   :  { %v4537_v48 = vpop.f32.mrb[144].mxu0 }
 0x499   :  { %v2635_v9 = vpop.f32.mrb[145].mxu0  ;;  %v6522_v17 = vadd.f32 %v6516_v35, %v4537_v48 }
 0x49a   :  { %v6519_v53 = vadd.f32 %v6516_v35, %v2635_v9  ;;  %v4538_v12 = vpop.f32.mrb[146].mxu0 }
 0x49b   :  { %v6525_v24 = vadd.f32 %v6516_v35, %v4538_v12  ;;  %v2638_v11 = vpop.f32.mrb[147].mxu0  ;;  %v7389_v10 = vmax.f32 %v6522_v17, 0.0  ;;  %v4826_v12 = vld [vmem:[%s7200_s10 + $0x30] sm:$0xff]  }
 0x49c   :  { %v6528_v39 = vadd.f32 %v6516_v35, %v2638_v11  ;;  %v7388_v63 = vmax.f32 %v6519_v53, 0.0 }
 0x49d   :  { %v7387_v45 = vmax.f32 %v6525_v24, 0.0 }
 0x49e   :  { %v7386_v13 = vmax.f32 %v6528_v39, 0.0 }
 0x49f   :  { %v2795_v8 = vpack.c.bf16 %v7387_v45, %v7389_v10 }
 0x4a0   :  { %v2794_v0 = vpack.c.bf16 %v7386_v13, %v7388_v63  ;;  %v4541_v57 = vpop.f32.mrb[148].mxu0 }
 0x4a1   :  { %v2651_v23 = vpop.f32.mrb[149].mxu0  ;;  %v6546_v18 = vadd.f32 %v6516_v35, %v4541_v57 }
 0x4a2   :  { %v6543_v6 = vadd.f32 %v6516_v35, %v2651_v23  ;;  %v4542_v43 = vpop.f32.mrb[150].mxu0  ;;  %4583 = vmatprep.mubr.bf16.mxu1 %v2794_v0 }
 0x4a3   :  { %v6549_v2 = vadd.f32 %v6516_v35, %v4542_v43  ;;  %v2654_v51 = vpop.f32.mrb[151].mxu0  ;;  %4584 = vmatmul.mubr.bf16.vlgmr.msra.gmra.mrb[120].mxu1 %v2795_v8  ;;  %v7385_v46 = vmax.f32 %v6546_v18, 0.0 }
 0x4a4   :  { %v6552_v61 = vadd.f32 %v6516_v35, %v2654_v51  ;;  %4656 = vmatpush3.bf16.msra.mxu1 %v4819_v55  ;;  %v7384_v7 = vmax.f32 %v6543_v6, 0.0 }
 0x4a5   :  { %v7383_v27 = vmax.f32 %v6549_v2, 0.0  ;;  %4657 = vmatprep.subr.bf16.mxu1 %v4821_v50 }
 0x4a6   :  { %v7382_v54 = vmax.f32 %v6552_v61, 0.0 }
 0x4a7   :  { %v2797_v31 = vpack.c.bf16 %v7383_v27, %v7385_v46 }
 0x4a8   :  { %v2796_v3 = vpack.c.bf16 %v7382_v54, %v7384_v7  ;;  %v4545_v38 = vpop.f32.mrb[152].mxu0  ;;  %4658 = vmatpush3.bf16.msra.mxu1 %v4821_v50  ;;  %v4827_v50 = vld [vmem:[%s7200_s10 + $0x38] sm:$0xff]  }
 0x4a9   :  { %v2667_v34 = vpop.f32.mrb[153].mxu0  ;;  %4659 = vmatprep.subr.bf16.mxu1 %v4822_v1  ;;  %v6576_v44 = vadd.f32 %v6516_v35, %v4545_v38 }
 0x4aa   :  { %v6573_v52 = vadd.f32 %v6516_v35, %v2667_v34  ;;  %v4546_v28 = vpop.f32.mrb[154].mxu0  ;;  %4587 = vmatprep.mubr.bf16.mxu1 %v2796_v3 }
 0x4ab   :  { %v6579_v49 = vadd.f32 %v6516_v35, %v4546_v28  ;;  %v2670_v32 = vpop.f32.mrb[155].mxu0  ;;  %4588 = vmatmul.mubr.bf16.gmra.mrb[124].mxu1 %v2797_v31  ;;  %v7381_v47 = vmax.f32 %v6576_v44, 0.0 }
 0x4ac   :  { %v6582_v20 = vadd.f32 %v6516_v35, %v2670_v32  ;;  %4660 = vmatpush3.bf16.msra.mxu1 %v4822_v1  ;;  %v7380_v58 = vmax.f32 %v6573_v52, 0.0 }
 0x4ad   :  { %v7379_v29 = vmax.f32 %v6579_v49, 0.0  ;;  %4661 = vmatprep.subr.bf16.mxu1 %v4823_v36 }
 0x4ae   :  { %v7378_v14 = vmax.f32 %v6582_v20, 0.0 }
 0x4af   :  { %v2799_v19 = vpack.c.bf16 %v7379_v29, %v7381_v47 }
 0x4b0   :  { %v2798_v15 = vpack.c.bf16 %v7378_v14, %v7380_v58  ;;  %v4549_v25 = vpop.f32.mrb[156].mxu0  ;;  %4662 = vmatpush3.bf16.msra.mxu1 %v4823_v36 }
 0x4b1   :  { %v2683_v56 = vpop.f32.mrb[157].mxu0  ;;  %4663 = vmatprep.subr.bf16.mxu1 %v4824_v5  ;;  %v6606_v16 = vadd.f32 %v6516_v35, %v4549_v25 }
 0x4b2   :  { %v6603_v62 = vadd.f32 %v6516_v35, %v2683_v56  ;;  %v4550_v40 = vpop.f32.mrb[158].mxu0  ;;  %4591 = vmatprep.mubr.bf16.mxu1 %v2798_v15 }
 0x4b3   :  { %v6609_v33 = vadd.f32 %v6516_v35, %v4550_v40  ;;  %v2686_v30 = vpop.f32.mrb[159].mxu0  ;;  %4592 = vmatmul.mubr.bf16.gmra.mrb[128].mxu1 %v2799_v19  ;;  %v7377_v41 = vmax.f32 %v6606_v16, 0.0 }
 0x4b4   :  { %v6612_v42 = vadd.f32 %v6516_v35, %v2686_v30  ;;  %4664 = vmatpush3.bf16.msra.mxu1 %v4824_v5  ;;  %v7376_v55 = vmax.f32 %v6603_v62, 0.0 }
 0x4b5   :  { %v7375_v22 = vmax.f32 %v6609_v33, 0.0  ;;  %4665 = vmatprep.subr.bf16.mxu1 %v4825_v26 }
 0x4b6   :  { %v7374_v21 = vmax.f32 %v6612_v42, 0.0 }
 0x4b7   :  { %v2801_v48 = vpack.c.bf16 %v7375_v22, %v7377_v41 }
 0x4b8   :  { %v2800_v37 = vpack.c.bf16 %v7374_v21, %v7376_v55  ;;  %v4553_v4 = vpop.f32.mrb[160].mxu0  ;;  %4666 = vmatpush3.bf16.msra.mxu1 %v4825_v26 }
 0x4b9   :  { %v2699_v9 = vpop.f32.mrb[161].mxu0  ;;  %4667 = vmatprep.subr.bf16.mxu1 %v4826_v12  ;;  %v6636_v57 = vadd.f32 %v6516_v35, %v4553_v4 }
 0x4ba   :  { %v6633_v11 = vadd.f32 %v6516_v35, %v2699_v9  ;;  %v4554_v0 = vpop.f32.mrb[162].mxu0  ;;  %4595 = vmatprep.mubr.bf16.mxu1 %v2800_v37 }
 0x4bb   :  { %v6639_v8 = vadd.f32 %v6516_v35, %v4554_v0  ;;  %v2702_v23 = vpop.f32.mrb[163].mxu0  ;;  %4596 = vmatmul.mubr.bf16.gmra.mrb[132].mxu1 %v2801_v48  ;;  %v7373_v31 = vmax.f32 %v6636_v57, 0.0 }
 0x4bc   :  { %v6642_v43 = vadd.f32 %v6516_v35, %v2702_v23  ;;  %4668 = vmatpush3.bf16.msra.mxu1 %v4826_v12  ;;  %v7368_v3 = vmax.f32 %v6633_v11, 0.0 }
 0x4bd   :  { %v7363_v51 = vmax.f32 %v6639_v8, 0.0  ;;  %4669 = vmatprep.subr.bf16.mxu1 %v4827_v50 }
 0x4be   :  { %v7362_v38 = vmax.f32 %v6642_v43, 0.0 }
 0x4bf   :  { %v2803_v28 = vpack.c.bf16 %v7363_v51, %v7373_v31 }
 0x4c0   :  { %v2802_v34 = vpack.c.bf16 %v7362_v38, %v7368_v3  ;;  %v4557_v1 = vpop.f32.mrb[164].mxu0  ;;  %4670 = vmatpush3.bf16.msra.mxu1 %v4827_v50 }
 0x4c1   :  { %v6660_v32 = vadd.f32 %v6516_v35, %v4557_v1  ;;  %v2715_v36 = vpop.f32.mrb[165].mxu0 }
 0x4c2   :  { %v6663_v15 = vadd.f32 %v6516_v35, %v2715_v36  ;;  %v4558_v25 = vpop.f32.mrb[166].mxu0  ;;  %4599 = vmatprep.mubr.bf16.mxu1 %v2802_v34 }
 0x4c3   :  { %v7361_v19 = vmax.f32 %v6660_v32, 0.0  ;;  %v6667_v56 = vadd.f32 %v6516_v35, %v4558_v25  ;;  %v2718_v5 = vpop.f32.mrb[167].mxu0  ;;  %4600 = vmatmul.mubr.bf16.gmra.mrb[136].mxu1 %v2803_v28 }
 0x4c4   :  { %v7360_v40 = vmax.f32 %v6663_v15, 0.0  ;;  %v6671_v30 = vadd.f32 %v6516_v35, %v2718_v5 }
 0x4c5   :  { %v7359_v26 = vmax.f32 %v6667_v56, 0.0 }
 0x4c6   :  { %7644 = vst [vmem:[#allocation3_spill] sm:$0xff] %v6671_v30  ;;  %v7358_v37 = vmax.f32 %v6671_v30, 0.0 }
 0x4c7   :  { %v2805_v4 = vpack.c.bf16 %v7359_v26, %v7361_v19 }
 0x4c8   :  { %v2804_v48 = vpack.c.bf16 %v7358_v37, %v7360_v40  ;;  %v4561_v9 = vpop.f32.mrb[168].mxu0 }
 0x4c9   :  { %v6684_v12 = vadd.f32 %v6516_v35, %v4561_v9  ;;  %v2731_v0 = vpop.f32.mrb[169].mxu0 }
 0x4ca   :  { %v6687_v23 = vadd.f32 %v6516_v35, %v2731_v0  ;;  %v4562_v50 = vpop.f32.mrb[170].mxu0  ;;  %4603 = vmatprep.mubr.bf16.mxu1 %v2804_v48 }
 0x4cb   :  { %7645 = vst [vmem:[#allocation4_spill] sm:$0xff] %v6684_v12  ;;  %v7365_v34 = vmax.f32 %v6684_v12, 0.0  ;;  %v6691_v1 = vadd.f32 %v6516_v35, %v4562_v50  ;;  %v2734_v28 = vpop.f32.mrb[171].mxu0  ;;  %4604 = vmatmul.mubr.bf16.gmra.mrb[140].mxu1 %v2805_v4 }
 0x4cc   :  { %7646 = vst [vmem:[#allocation45_spill] sm:$0xff] %v6687_v23  ;;  %v7367_v36 = vmax.f32 %v6687_v23, 0.0  ;;  %v6695_v25 = vadd.f32 %v6516_v35, %v2734_v28 }
 0x4cd   :  { %7647 = vst [vmem:[#allocation46_spill] sm:$0xff] %v6691_v1  ;;  %v7364_v5 = vmax.f32 %v6691_v1, 0.0 }
 0x4ce   :  { %7648 = vst [vmem:[#allocation47_spill] sm:$0xff] %v6695_v25  ;;  %v7366_v9 = vmax.f32 %v6695_v25, 0.0 }
 0x4cf   :  { %v2807_v48 = vpack.c.bf16 %v7364_v5, %v7365_v34 }
 0x4d0   :  { %v2806_v0 = vpack.c.bf16 %v7366_v9, %v7367_v36  ;;  %v4108_v4 = vpop.f32.mrb[116].mxu1  ;;  %v4565_v50 = vpop.f32.mrb[172].mxu0 }
 0x4d1   :  { %v6708_v37 = vadd.f32 %v6516_v35, %v4565_v50  ;;  %v4109_v28 = vpop.f32.mrb[117].mxu1  ;;  %v2747_v26 = vpop.f32.mrb[173].mxu0 }
 0x4d2   :  { %v4110_v40 = vadd.f32 %v4109_v28, %v4108_v4  ;;  %v6711_v19 = vadd.f32 %v6516_v35, %v2747_v26  ;;  %v4566_v38 = vpop.f32.mrb[174].mxu0  ;;  %4607 = vmatprep.mubr.bf16.mxu1 %v2806_v0  ;;  %v4111_v51 = vpop.f32.mrb[118].mxu1 }
 0x4d3   :  { %7649 = vst [vmem:[#allocation6_spill] sm:$0xff] %v6708_v37  ;;  %v7370_v5 = vmax.f32 %v6708_v37, 0.0  ;;  %v6715_v34 = vadd.f32 %v6516_v35, %v4566_v38  ;;  %v2750_v9 = vpop.f32.mrb[175].mxu0  ;;  %4608 = vmatmul.mubr.bf16.gmra.mrb[144].mxu1 %v2807_v48  ;;  %v4112_v36 = vpop.f32.mrb[119].mxu1 }
 0x4d4   :  { %7650 = vst [vmem:[#allocation48_spill] sm:$0xff] %v6711_v19  ;;  %v6718_v50 = vadd.f32 %v4110_v40, %v6511_v59  ;;  %v7372_v3 = vmax.f32 %v6711_v19, 0.0  ;;  %v6722_v4 = vadd.f32 %v6516_v35, %v2750_v9  ;;  %v6740_v9 = vld [vmem:[%s7199_s7] ss:$0 sm:$0xff] }
 0x4d5   :  { %7651 = vst [vmem:[#allocation5_spill] sm:$0xff] %v6715_v34  ;;  %v7369_v26 = vmax.f32 %v6715_v34, 0.0 }
 0x4d6   :  { %7652 = vst [vmem:[#allocation7_spill] sm:$0xff] %v6722_v4  ;;  %v7371_v51 = vmax.f32 %v6722_v4, 0.0  ;;  %v2432_v38 = vmul.f32 %v6718_v50, %v6718_v50 }
 0x4d7   :  { %v2809_v36 = vpack.c.bf16 %v7369_v26, %v7370_v5 }
 0x4d8   :  { %v2808_v59 = vpack.c.bf16 %v7371_v51, %v7372_v3  ;;  %v2434_v35 = vsel %vm2433_vm6, %v2432_v38, 0.0 }
 0x4d9   :  { %2435 = vadd.xlane.f32.xlu0 %v2434_v35 }
 0x4da   :  { %4611 = vmatprep.mubr.bf16.mxu1 %v2808_v59 }
 0x4db   :  { %4612 = vmatmul.mubr.bf16.gmra.mrb[148].mxu1 %v2809_v36 }
 0x576   :  { %v4585_v40 = vpop.f32.mrb[120].mxu1 }
 0x577   :  { %v2853_v48 = vadd.f32 %v6740_v9, %v4585_v40  ;;  %v2844_v0 = vpop.f32.mrb[121].mxu1 }
 0x578   :  { %v2845_v28 = vadd.f32 %v6740_v9, %v2844_v0  ;;  %v4586_v26 = vpop.f32.mrb[122].mxu1 }
 0x579   :  { %v2856_v5 = vadd.f32 %v6740_v9, %v4586_v26  ;;  %v2847_v51 = vpop.f32.mrb[123].mxu1  ;;  %v2973_v35 = vmax.f32 %v2853_v48, 0.0 }
 0x57a   :  { %v2848_v38 = vadd.f32 %v6740_v9, %v2847_v51  ;;  %v2971_v36 = vmax.f32 %v2845_v28, 0.0 }
 0x57b   :  { %v2974_v59 = vmax.f32 %v2856_v5, 0.0 }
 0x57c   :  { %v2972_v3 = vmax.f32 %v2848_v38, 0.0 }
 0x57d   :  { %v3004_v31 = vpack.c.bf16 %v2974_v59, %v2973_v35 }
 0x57e   :  { %v3003_v21 = vpack.c.bf16 %v2972_v3, %v2971_v36  ;;  %v4589_v22 = vpop.f32.mrb[124].mxu1 }
 0x57f   :  { %v2869_v55 = vadd.f32 %v6740_v9, %v4589_v22  ;;  %v2860_v41 = vpop.f32.mrb[125].mxu1 }
 0x580   :  { %v2861_v40 = vadd.f32 %v6740_v9, %v2860_v41  ;;  %v4590_v14 = vpop.f32.mrb[126].mxu1  ;;  %4623 = vmatprep.mubr.msk.bf16.mxu0 %vm1258_vm2, %v3003_v21 }
 0x581   :  { %v2872_v26 = vadd.f32 %v6740_v9, %v4590_v14  ;;  %v2863_v0 = vpop.f32.mrb[127].mxu1  ;;  %4624 = vmatmul.mubr.msk.bf16.vlgmr.msra.gmra.mrb[176].mxu0 %vm1258_vm2, %v3004_v31  ;;  %v2977_v51 = vmax.f32 %v2869_v55, 0.0 }
 0x582   :  { %v2864_v5 = vadd.f32 %v6740_v9, %v2863_v0  ;;  %v2975_v28 = vmax.f32 %v2861_v40, 0.0 }
 0x583   :  { %v2978_v48 = vmax.f32 %v2872_v26, 0.0 }
 0x584   :  { %v2976_v3 = vmax.f32 %v2864_v5, 0.0 }
 0x585   :  { %v3006_v38 = vpack.c.bf16 %v2978_v48, %v2977_v51 }
 0x586   :  { %v3005_v35 = vpack.c.bf16 %v2976_v3, %v2975_v28  ;;  %v4593_v22 = vpop.f32.mrb[128].mxu1 }
 0x587   :  { %v2885_v59 = vadd.f32 %v6740_v9, %v4593_v22  ;;  %v2876_v41 = vpop.f32.mrb[129].mxu1 }
 0x588   :  { %v2877_v36 = vadd.f32 %v6740_v9, %v2876_v41  ;;  %v4594_v21 = vpop.f32.mrb[130].mxu1  ;;  %4627 = vmatprep.mubr.msk.bf16.mxu0 %vm1258_vm2, %v3005_v35 }
 0x589   :  { %v2888_v14 = vadd.f32 %v6740_v9, %v4594_v21  ;;  %v2879_v31 = vpop.f32.mrb[131].mxu1  ;;  %4628 = vmatmul.mubr.msk.bf16.gmra.mrb[180].mxu0 %vm1258_vm2, %v3006_v38  ;;  %v2981_v40 = vmax.f32 %v2885_v59, 0.0 }
 0x58a   :  { %v2880_v55 = vadd.f32 %v6740_v9, %v2879_v31  ;;  %v2979_v0 = vmax.f32 %v2877_v36, 0.0 }
 0x58b   :  { %v2982_v26 = vmax.f32 %v2888_v14, 0.0 }
 0x58c   :  { %v2980_v5 = vmax.f32 %v2880_v55, 0.0 }
 0x58d   :  { %v3008_v51 = vpack.c.bf16 %v2982_v26, %v2981_v40 }
 0x58e   :  { %v3007_v48 = vpack.c.bf16 %v2980_v5, %v2979_v0  ;;  %v4597_v28 = vpop.f32.mrb[132].mxu1 }
 0x58f   :  { %v2901_v3 = vadd.f32 %v6740_v9, %v4597_v28  ;;  %v2892_v22 = vpop.f32.mrb[133].mxu1 }
 0x590   :  { %v2893_v41 = vadd.f32 %v6740_v9, %v2892_v22  ;;  %v4598_v35 = vpop.f32.mrb[134].mxu1  ;;  %4631 = vmatprep.mubr.msk.bf16.mxu0 %vm1258_vm2, %v3007_v48 }
 0x591   :  { %v2904_v21 = vadd.f32 %v6740_v9, %v4598_v35  ;;  %v2895_v38 = vpop.f32.mrb[135].mxu1  ;;  %4632 = vmatmul.mubr.msk.bf16.gmra.mrb[184].mxu0 %vm1258_vm2, %v3008_v51  ;;  %v2985_v36 = vmax.f32 %v2901_v3, 0.0 }
 0x592   :  { %v2896_v59 = vadd.f32 %v6740_v9, %v2895_v38  ;;  %v2983_v31 = vmax.f32 %v2893_v41, 0.0 }
 0x593   :  { %v2986_v14 = vmax.f32 %v2904_v21, 0.0 }
 0x594   :  { %v2984_v55 = vmax.f32 %v2896_v59, 0.0 }
 0x595   :  { %v3010_v40 = vpack.c.bf16 %v2986_v14, %v2985_v36 }
 0x596   :  { %v3009_v26 = vpack.c.bf16 %v2984_v55, %v2983_v31  ;;  %v4601_v0 = vpop.f32.mrb[136].mxu1 }
 0x597   :  { %v2917_v5 = vadd.f32 %v6740_v9, %v4601_v0  ;;  %v2908_v28 = vpop.f32.mrb[137].mxu1 }
 0x598   :  { %v2909_v22 = vadd.f32 %v6740_v9, %v2908_v28  ;;  %v4602_v48 = vpop.f32.mrb[138].mxu1  ;;  %4635 = vmatprep.mubr.msk.bf16.mxu0 %vm1258_vm2, %v3009_v26  ;;  %v2436_v28 = vpop.xlane.xlu0 %2435 }
 0x599   :  { %v2920_v35 = vadd.f32 %v6740_v9, %v4602_v48  ;;  %v2911_v51 = vpop.f32.mrb[139].mxu1  ;;  %4636 = vmatmul.mubr.msk.bf16.gmra.mrb[188].mxu0 %vm1258_vm2, %v3010_v40  ;;  %v2989_v41 = vmax.f32 %v2917_v5, 0.0 }
 0x59a   :  { %v2912_v3 = vadd.f32 %v6740_v9, %v2911_v51  ;;  %v2987_v38 = vmax.f32 %v2909_v22, 0.0 }
 0x59b   :  { %v2990_v21 = vmax.f32 %v2920_v35, 0.0  ;;  %v2437_v35 = vmax.f32 %v2436_v28, 1e-16 }
 0x59c   :  { %v2988_v59 = vmax.f32 %v2912_v3, 0.0 }
 0x59d   :  { %v3012_v36 = vpack.c.bf16 %v2990_v21, %v2989_v41  ;;  %4792 = vrsqrt.f32 %v2437_v35 }
 0x59e   :  { %v3011_v14 = vpack.c.bf16 %v2988_v59, %v2987_v38  ;;  %v4605_v31 = vpop.f32.mrb[140].mxu1 }
 0x59f   :  { %v2933_v55 = vadd.f32 %v6740_v9, %v4605_v31  ;;  %v2924_v0 = vpop.f32.mrb[141].mxu1 }
 0x5a0   :  { %v2925_v26 = vadd.f32 %v6740_v9, %v2924_v0  ;;  %v4606_v29 = vpop.f32.mrb[142].mxu1  ;;  %4639 = vmatprep.mubr.msk.bf16.mxu0 %vm1258_vm2, %v3011_v14 }
 0x5a1   :  { %v2993_v48 = vmax.f32 %v2933_v55, 0.0  ;;  %v2936_v40 = vadd.f32 %v6740_v9, %v4606_v29  ;;  %v2927_v51 = vpop.f32.mrb[143].mxu1  ;;  %4640 = vmatmul.mubr.msk.bf16.gmra.mrb[192].mxu0 %vm1258_vm2, %v3012_v36 }
 0x5a2   :  { %v2991_v5 = vmax.f32 %v2925_v26, 0.0  ;;  %v2928_v22 = vadd.f32 %v6740_v9, %v2927_v51 }
 0x5a3   :  { %v2994_v3 = vmax.f32 %v2936_v40, 0.0 }
 0x5a4   :  { %v2992_v41 = vmax.f32 %v2928_v22, 0.0 }
 0x5a5   :  { %v3014_v21 = vpack.c.bf16 %v2994_v3, %v2993_v48 }
 0x5a6   :  { %v3013_v38 = vpack.c.bf16 %v2992_v41, %v2991_v5  ;;  %v4609_v59 = vpop.f32.mrb[144].mxu1 }
 0x5a7   :  { %v2949_v31 = vadd.f32 %v6740_v9, %v4609_v59  ;;  %v2940_v0 = vpop.f32.mrb[145].mxu1 }
 0x5a8   :  { %v2941_v14 = vadd.f32 %v6740_v9, %v2940_v0  ;;  %v4610_v55 = vpop.f32.mrb[146].mxu1  ;;  %4643 = vmatprep.mubr.msk.bf16.mxu0 %vm1258_vm2, %v3013_v38 }
 0x5a9   :  { %v2997_v29 = vmax.f32 %v2949_v31, 0.0  ;;  %v2952_v36 = vadd.f32 %v6740_v9, %v4610_v55  ;;  %v2943_v26 = vpop.f32.mrb[147].mxu1  ;;  %4644 = vmatmul.mubr.msk.bf16.gmra.mrb[196].mxu0 %vm1258_vm2, %v3014_v21  ;;  %v4793_v31 = vpop.eup %4792 }
 0x5aa   :  { %v2995_v28 = vmax.f32 %v2941_v14, 0.0  ;;  %v2944_v48 = vadd.f32 %v6740_v9, %v2943_v26 }
 0x5ab   :  { %v2998_v40 = vmax.f32 %v2952_v36, 0.0 }
 0x5ac   :  { %v2996_v51 = vmax.f32 %v2944_v48, 0.0 }
 0x5ad   :  { %v3016_v5 = vpack.c.bf16 %v2998_v40, %v2997_v29 }
 0x5ae   :  { %v3015_v22 = vpack.c.bf16 %v2996_v51, %v2995_v28  ;;  %v4613_v35 = vpop.f32.mrb[148].mxu1  ;;  %v2439_v28 = vmul.f32 %v4793_v31, %v6718_v50 }
 0x5af   :  { %v2965_v3 = vadd.f32 %v6740_v9, %v4613_v35  ;;  %v2956_v41 = vpop.f32.mrb[149].mxu1 }
 0x5b0   :  { %v2957_v59 = vadd.f32 %v6740_v9, %v2956_v41  ;;  %v4614_v38 = vpop.f32.mrb[150].mxu1  ;;  %4647 = vmatprep.mubr.msk.bf16.mxu0 %vm1258_vm2, %v3015_v22  ;;  %v6790_v51 = vpack.c.bf16 %v2439_v28, %v2439_v28 }
 0x5b1   :  { %v3001_v0 = vmax.f32 %v2965_v3, 0.0  ;;  %v2968_v21 = vadd.f32 %v6740_v9, %v4614_v38  ;;  %v2959_v14 = vpop.f32.mrb[151].mxu1  ;;  %4648 = vmatmul.mubr.msk.bf16.gmra.mrb[200].mxu0 %vm1258_vm2, %v3016_v5  ;;  %v6797_v5 = vld [vmem:[%s7201_s9] ss:$0 sm:$0xff] }
 0x5b2   :  { %v2999_v55 = vmax.f32 %v2957_v59, 0.0  ;;  %v2960_v29 = vadd.f32 %v6740_v9, %v2959_v14  ;;  %7653 = vst [vmem:[#allocation8_spill] sm:$0xff] %v6790_v51 }
 0x5b3   :  { %v3002_v36 = vmax.f32 %v2968_v21, 0.0 }
 0x5b4   :  { %v3000_v26 = vmax.f32 %v2960_v29, 0.0 }
 0x5b5   :  { %v3018_v48 = vpack.c.bf16 %v3002_v36, %v3001_v0 }
 0x5b6   :  { %v3017_v40 = vpack.c.bf16 %v3000_v26, %v2999_v55 }
 0x5b8   :  { %4651 = vmatprep.mubr.msk.bf16.mxu0 %vm1258_vm2, %v3017_v40 }
 0x5b9   :  { %4652 = vmatmul.mubr.msk.bf16.gmra.mrb[204].mxu0 %vm1258_vm2, %v3018_v48 }
 0x5ba   :  { %4215 = vmatprep.mubr.bf16.mxu0 %v6790_v51 }
 0x654   :  { %v4625_v22 = vpop.f32.mrb[176].mxu0 }
 0x655   :  { %v6800_v9 = vadd.f32 %v6797_v5, %v4625_v22  ;;  %v3101_v50 = vpop.f32.mrb[177].mxu0 }
 0x656   :  { %v6803_v35 = vadd.f32 %v6797_v5, %v3101_v50  ;;  %v4626_v3 = vpop.f32.mrb[178].mxu0 }
 0x657   :  { %v6806_v41 = vadd.f32 %v6797_v5, %v4626_v3  ;;  %v3104_v59 = vpop.f32.mrb[179].mxu0  ;;  %v3262_v31 = vmax.f32 %v6800_v9, 0.0 }
 0x658   :  { %v6809_v38 = vadd.f32 %v6797_v5, %v3104_v59  ;;  %v3260_v21 = vmax.f32 %v6803_v35, 0.0 }
 0x659   :  { %v3263_v0 = vmax.f32 %v6806_v41, 0.0 }
 0x65a   :  { %v3261_v14 = vmax.f32 %v6809_v38, 0.0 }
 0x65b   :  { %v3293_v55 = vpack.c.bf16 %v3263_v0, %v3262_v31 }
 0x65c   :  { %v4629_v29 = vpop.f32.mrb[180].mxu0  ;;  %v3292_v36 = vpack.c.bf16 %v3261_v14, %v3260_v21 }
 0x65d   :  { %v6816_v26 = vadd.f32 %v6797_v5, %v4629_v29  ;;  %v3117_v28 = vpop.f32.mrb[181].mxu0 }
 0x65e   :  { %v6819_v48 = vadd.f32 %v6797_v5, %v3117_v28  ;;  %v4630_v40 = vpop.f32.mrb[182].mxu0  ;;  %4671 = vmatprep.mubr.bf16.mxu1 %v3292_v36 }
 0x65f   :  { %v6822_v22 = vadd.f32 %v6797_v5, %v4630_v40  ;;  %v3120_v50 = vpop.f32.mrb[183].mxu0  ;;  %4672 = vmatmul.mubr.bf16.vlgmr.msra.gmra.mrb[152].mxu1 %v3293_v55  ;;  %v3266_v59 = vmax.f32 %v6816_v26, 0.0 }
 0x660   :  { %v6825_v3 = vadd.f32 %v6797_v5, %v3120_v50  ;;  %v3264_v0 = vmax.f32 %v6819_v48, 0.0 }
 0x661   :  { %v3267_v31 = vmax.f32 %v6822_v22, 0.0 }
 0x662   :  { %v3265_v21 = vmax.f32 %v6825_v3, 0.0 }
 0x663   :  { %v3295_v14 = vpack.c.bf16 %v3267_v31, %v3266_v59 }
 0x664   :  { %v4633_v29 = vpop.f32.mrb[184].mxu0  ;;  %v3294_v28 = vpack.c.bf16 %v3265_v21, %v3264_v0 }
 0x665   :  { %v6832_v36 = vadd.f32 %v6797_v5, %v4633_v29  ;;  %v3133_v40 = vpop.f32.mrb[185].mxu0 }
 0x666   :  { %v6835_v55 = vadd.f32 %v6797_v5, %v3133_v40  ;;  %v4634_v50 = vpop.f32.mrb[186].mxu0  ;;  %4675 = vmatprep.mubr.bf16.mxu1 %v3294_v28 }
 0x667   :  { %v6838_v58 = vadd.f32 %v6797_v5, %v4634_v50  ;;  %v3136_v47 = vpop.f32.mrb[187].mxu0  ;;  %4676 = vmatmul.mubr.bf16.gmra.mrb[156].mxu1 %v3295_v14  ;;  %v3270_v59 = vmax.f32 %v6832_v36, 0.0 }
 0x668   :  { %v6841_v54 = vadd.f32 %v6797_v5, %v3136_v47  ;;  %v3268_v0 = vmax.f32 %v6835_v55, 0.0 }
 0x669   :  { %v3271_v31 = vmax.f32 %v6838_v58, 0.0 }
 0x66a   :  { %v3269_v21 = vmax.f32 %v6841_v54, 0.0 }
 0x66b   :  { %v3297_v29 = vpack.c.bf16 %v3271_v31, %v3270_v59 }
 0x66c   :  { %v4637_v40 = vpop.f32.mrb[188].mxu0  ;;  %v3296_v27 = vpack.c.bf16 %v3269_v21, %v3268_v0 }
 0x66d   :  { %v6848_v28 = vadd.f32 %v6797_v5, %v4637_v40  ;;  %v3149_v50 = vpop.f32.mrb[189].mxu0 }
 0x66e   :  { %v6851_v14 = vadd.f32 %v6797_v5, %v3149_v50  ;;  %v4638_v47 = vpop.f32.mrb[190].mxu0  ;;  %4679 = vmatprep.mubr.bf16.mxu1 %v3296_v27 }
 0x66f   :  { %v6854_v7 = vadd.f32 %v6797_v5, %v4638_v47  ;;  %v3152_v46 = vpop.f32.mrb[191].mxu0  ;;  %4680 = vmatmul.mubr.bf16.gmra.mrb[160].mxu1 %v3297_v29  ;;  %v3274_v59 = vmax.f32 %v6848_v28, 0.0 }
 0x670   :  { %v6857_v13 = vadd.f32 %v6797_v5, %v3152_v46  ;;  %v3272_v0 = vmax.f32 %v6851_v14, 0.0 }
 0x671   :  { %v3275_v31 = vmax.f32 %v6854_v7, 0.0 }
 0x672   :  { %v3273_v21 = vmax.f32 %v6857_v13, 0.0 }
 0x673   :  { %v3299_v40 = vpack.c.bf16 %v3275_v31, %v3274_v59 }
 0x674   :  { %v4641_v50 = vpop.f32.mrb[192].mxu0  ;;  %v3298_v45 = vpack.c.bf16 %v3273_v21, %v3272_v0 }
 0x675   :  { %v6864_v27 = vadd.f32 %v6797_v5, %v4641_v50  ;;  %v3165_v47 = vpop.f32.mrb[193].mxu0 }
 0x676   :  { %v6867_v29 = vadd.f32 %v6797_v5, %v3165_v47  ;;  %v4642_v46 = vpop.f32.mrb[194].mxu0  ;;  %4683 = vmatprep.mubr.bf16.mxu1 %v3298_v45 }
 0x677   :  { %v6870_v63 = vadd.f32 %v6797_v5, %v4642_v46  ;;  %v3168_v10 = vpop.f32.mrb[195].mxu0  ;;  %4684 = vmatmul.mubr.bf16.gmra.mrb[164].mxu1 %v3299_v40  ;;  %v3278_v59 = vmax.f32 %v6864_v27, 0.0 }
 0x678   :  { %v6873_v51 = vadd.f32 %v6797_v5, %v3168_v10  ;;  %v3276_v0 = vmax.f32 %v6867_v29, 0.0 }
 0x679   :  { %v3279_v31 = vmax.f32 %v6870_v63, 0.0 }
 0x67a   :  { %v3277_v21 = vmax.f32 %v6873_v51, 0.0 }
 0x67b   :  { %v3301_v50 = vpack.c.bf16 %v3279_v31, %v3278_v59 }
 0x67c   :  { %v4645_v47 = vpop.f32.mrb[196].mxu0  ;;  %v3300_v4 = vpack.c.bf16 %v3277_v21, %v3276_v0 }
 0x67d   :  { %v6880_v45 = vadd.f32 %v6797_v5, %v4645_v47  ;;  %v3181_v46 = vpop.f32.mrb[197].mxu0 }
 0x67e   :  { %v6883_v40 = vadd.f32 %v6797_v5, %v3181_v46  ;;  %v4646_v10 = vpop.f32.mrb[198].mxu0  ;;  %4687 = vmatprep.mubr.bf16.mxu1 %v3300_v4 }
 0x67f   :  { %v6886_v34 = vadd.f32 %v6797_v5, %v4646_v10  ;;  %v3184_v19 = vpop.f32.mrb[199].mxu0  ;;  %4688 = vmatmul.mubr.bf16.gmra.mrb[168].mxu1 %v3301_v50  ;;  %v3282_v59 = vmax.f32 %v6880_v45, 0.0 }
 0x680   :  { %v6889_v37 = vadd.f32 %v6797_v5, %v3184_v19  ;;  %v3280_v0 = vmax.f32 %v6883_v40, 0.0 }
 0x681   :  { %v3283_v31 = vmax.f32 %v6886_v34, 0.0 }
 0x682   :  { %v3281_v21 = vmax.f32 %v6889_v37, 0.0 }
 0x683   :  { %v3303_v47 = vpack.c.bf16 %v3283_v31, %v3282_v59 }
 0x684   :  { %v4649_v46 = vpop.f32.mrb[200].mxu0  ;;  %v3302_v25 = vpack.c.bf16 %v3281_v21, %v3280_v0 }
 0x685   :  { %v6896_v4 = vadd.f32 %v6797_v5, %v4649_v46  ;;  %v3197_v10 = vpop.f32.mrb[201].mxu0 }
 0x686   :  { %v6899_v50 = vadd.f32 %v6797_v5, %v3197_v10  ;;  %v4650_v19 = vpop.f32.mrb[202].mxu0  ;;  %4691 = vmatprep.mubr.bf16.mxu1 %v3302_v25 }
 0x687   :  { %7654 = vst [vmem:[#allocation49_spill] sm:$0xff] %v6896_v4  ;;  %v3286_v1 = vmax.f32 %v6896_v4, 0.0  ;;  %v6903_v23 = vadd.f32 %v6797_v5, %v4650_v19  ;;  %v3200_v12 = vpop.f32.mrb[203].mxu0  ;;  %4692 = vmatmul.mubr.bf16.gmra.mrb[172].mxu1 %v3303_v47 }
 0x688   :  { %7655 = vst [vmem:[#allocation50_spill] sm:$0xff] %v6899_v50  ;;  %v3284_v59 = vmax.f32 %v6899_v50, 0.0  ;;  %v6907_v31 = vadd.f32 %v6797_v5, %v3200_v12 }
 0x689   :  { %7656 = vst [vmem:[#allocation51_spill] sm:$0xff] %v6903_v23  ;;  %v3287_v0 = vmax.f32 %v6903_v23, 0.0 }
 0x68a   :  { %7657 = vst [vmem:[#allocation10_spill] sm:$0xff] %v6907_v31  ;;  %v3285_v21 = vmax.f32 %v6907_v31, 0.0 }
 0x68b   :  { %v3305_v46 = vpack.c.bf16 %v3287_v0, %v3286_v1 }
 0x68c   :  { %v4653_v10 = vpop.f32.mrb[204].mxu0  ;;  %v3304_v30 = vpack.c.bf16 %v3285_v21, %v3284_v59 }
 0x68d   :  { %v6912_v25 = vadd.f32 %v6797_v5, %v4653_v10  ;;  %v3213_v4 = vpop.f32.mrb[205].mxu0 }
 0x68e   :  { %v6915_v19 = vadd.f32 %v6797_v5, %v3213_v4  ;;  %v4654_v47 = vpop.f32.mrb[206].mxu0  ;;  %4695 = vmatprep.mubr.bf16.mxu1 %v3304_v30  ;;  %v7403_v30 = vmov 1065369472  }
 0x68f   :  { %7658 = vst [vmem:[#allocation52_spill] sm:$0xff] %v6912_v25  ;;  %v3290_v50 = vmax.f32 %v6912_v25, 0.0  ;;  %v6919_v12 = vadd.f32 %v6797_v5, %v4654_v47  ;;  %v3216_v23 = vpop.f32.mrb[207].mxu0  ;;  %4696 = vmatmul.mubr.bf16.gmra.mrb[176].mxu1 %v3305_v46  ;;  %v3230_v46 = vsel %vm5860_vm5, %v6800_v9, 0.0  ;;  %v6945_v9 = vld [vmem:[%s7204_s11] ss:$0 sm:$0xff] }
 0x690   :  { %7659 = vst [vmem:[#allocation9_spill] sm:$0xff] %v6915_v19  ;;  %v3288_v1 = vmax.f32 %v6915_v19, 0.0  ;;  %v6923_v59 = vadd.f32 %v6797_v5, %v3216_v23  ;;  %v3228_v23 = vsel %vm5860_vm5, %v6803_v35, 0.0  ;;  %v3231_v5 = vsel %vm5860_vm5, %v6806_v41, 0.0 }
 0x691   :  { %7660 = vst [vmem:[#allocation11_spill] sm:$0xff] %v6919_v12  ;;  %v3291_v0 = vmax.f32 %v6919_v12, 0.0  ;;  %v7665_v12 = vmax.f32 %v6528_v39, 0.0  ;;  %v3235_v39 = vsel %vm5860_vm5, %v6822_v22, 0.0  ;;  %v7668_v22 = vmax.f32 %v6549_v2, 0.0 }
 0x692   :  { %7661 = vst [vmem:[#allocation12_spill] sm:$0xff] %v6923_v59  ;;  %v3289_v21 = vmax.f32 %v6923_v59, 0.0  ;;  %v3236_v2 = vsel %vm5860_vm5, %v6835_v55, 0.0  ;;  %v7671_v55 = vmax.f32 %v6573_v52, 0.0  ;;  %v3242_v52 = vsel %vm5860_vm5, %v6848_v28, 0.0 }
 0x693   :  { %v3307_v4 = vpack.c.bf16 %v3291_v0, %v3290_v50  ;;  %v7662_v50 = vmax.f32 %v6522_v17, 0.0  ;;  %v3229_v0 = vsel %vm5860_vm5, %v6809_v38, 0.0  ;;  %v7664_v17 = vmax.f32 %v6525_v24, 0.0 }
 0x694   :  { %v3306_v10 = vpack.c.bf16 %v3289_v21, %v3288_v1  ;;  %v3470_v19 = vadd.f32 %v3229_v0, %v7665_v12  ;;  %v3232_v24 = vsel %vm5860_vm5, %v6819_v48, 0.0  ;;  %v7667_v48 = vmax.f32 %v6543_v6, 0.0 }
 0x695   :  { %v3471_v1 = vadd.f32 %v3230_v46, %v7662_v50  ;;  %v3472_v46 = vadd.f32 %v3231_v5, %v7664_v17  ;;  %v3238_v6 = vsel %vm5860_vm5, %v6832_v36, 0.0  ;;  %v3237_v36 = vsel %vm5860_vm5, %v6841_v54, 0.0 }
 0x696   :  { %4699 = vmatprep.mubr.bf16.mxu1 %v3306_v10  ;;  %v3241_v28 = vsel %vm5860_vm5, %v6857_v13, 0.0 }
 0x697   :  { %4700 = vmatmul.mubr.bf16.gmra.mrb[180].mxu1 %v3307_v4  ;;  %v7663_v4 = vmax.f32 %v6519_v53, 0.0  ;;  %v3234_v53 = vsel %vm5860_vm5, %v6816_v26, 0.0  ;;  %v3233_v26 = vsel %vm5860_vm5, %v6825_v3, 0.0 }
 0x698   :  { %4233 = vmatprep.mubr.bf16.mxu1 %v7403_v30 }
 0x699   :  { %v3469_v10 = vadd.f32 %v3228_v23, %v7663_v4 }
 0x732   :  { %v4673_v47 = vpop.f32.mrb[152].mxu1 }
 0x733   :  { %v3351_v21 = vadd.f32 %v6945_v9, %v4673_v47  ;;  %v3342_v35 = vpop.f32.mrb[153].mxu1 }
 0x734   :  { %v3343_v41 = vadd.f32 %v6945_v9, %v3342_v35  ;;  %v4674_v30 = vpop.f32.mrb[154].mxu1 }
 0x735   :  { %v3503_v50 = vadd.f32 %v3471_v1, %v3351_v21  ;;  %v3354_v38 = vadd.f32 %v6945_v9, %v4674_v30  ;;  %v3345_v59 = vpop.f32.mrb[155].mxu1 }
 0x736   :  { %v3501_v25 = vadd.f32 %v3469_v10, %v3343_v41  ;;  %v3346_v47 = vadd.f32 %v6945_v9, %v3345_v59  ;;  %v7666_v59 = vmax.f32 %v6546_v18, 0.0  ;;  %v7669_v41 = vmax.f32 %v6552_v61, 0.0 }
 0x737   :  { %v3504_v31 = vadd.f32 %v3472_v46, %v3354_v38  ;;  %v3239_v61 = vsel %vm5860_vm5, %v6838_v58, 0.0  ;;  %v7672_v58 = vmax.f32 %v6579_v49, 0.0  ;;  %v3240_v49 = vsel %vm5860_vm5, %v6851_v14, 0.0 }
 0x738   :  { %v3502_v23 = vadd.f32 %v3470_v19, %v3346_v47  ;;  %v3475_v1 = vadd.f32 %v3234_v53, %v7666_v59  ;;  %v3474_v17 = vadd.f32 %v3233_v26, %v7669_v41  ;;  %v7675_v14 = vmax.f32 %v6603_v62, 0.0 }
 0x739   :  { %v6963_v5 = vpack.c.bf16 %v3504_v31, %v3503_v50  ;;  %v3473_v31 = vadd.f32 %v3232_v24, %v7667_v48  ;;  %v7670_v24 = vmax.f32 %v6576_v44, 0.0  ;;  %v3246_v62 = vsel %vm5860_vm5, %v6864_v27, 0.0 }
 0x73a   :  { %v6968_v12 = vpack.c.bf16 %v3502_v23, %v3501_v25  ;;  %v4677_v30 = vpop.f32.mrb[156].mxu1  ;;  %v3476_v25 = vadd.f32 %v3235_v39, %v7668_v22  ;;  %v3245_v27 = vsel %vm5860_vm5, %v6873_v51, 0.0 }
 0x73b   :  { %v3367_v19 = vadd.f32 %v6945_v9, %v4677_v30  ;;  %v3358_v0 = vpop.f32.mrb[157].mxu1  ;;  %v3479_v39 = vadd.f32 %v3238_v6, %v7670_v24  ;;  %v3481_v6 = vadd.f32 %v3240_v49, %v7675_v14 }
 0x73c   :  { %v3359_v21 = vadd.f32 %v6945_v9, %v3358_v0  ;;  %v4678_v35 = vpop.f32.mrb[158].mxu1  ;;  %v3480_v0 = vadd.f32 %v3239_v61, %v7672_v58  ;;  %v7678_v58 = vmax.f32 %v6636_v57, 0.0 }
 0x73d   :  { %v3507_v4 = vadd.f32 %v3475_v1, %v3367_v19  ;;  %v3370_v18 = vadd.f32 %v6945_v9, %v4678_v35  ;;  %v3361_v10 = vpop.f32.mrb[159].mxu1  ;;  %v3477_v1 = vadd.f32 %v3236_v2, %v7671_v55 }
 0x73e   :  { %v3505_v3 = vadd.f32 %v3473_v31, %v3359_v21  ;;  %v3362_v46 = vadd.f32 %v6945_v9, %v3361_v10  ;;  %v7673_v21 = vmax.f32 %v6582_v20, 0.0  ;;  %v3243_v20 = vsel %vm5860_vm5, %v6854_v7, 0.0 }
 0x73f   :  { %v3508_v50 = vadd.f32 %v3476_v25, %v3370_v18  ;;  %v7676_v7 = vmax.f32 %v6609_v33, 0.0  ;;  %v3244_v33 = vsel %vm5860_vm5, %v6867_v29, 0.0  ;;  %v7679_v29 = vmax.f32 %v6633_v11, 0.0 }
 0x740   :  { %v3506_v38 = vadd.f32 %v3474_v17, %v3362_v46  ;;  %v3478_v35 = vadd.f32 %v3237_v36, %v7673_v21  ;;  %v7674_v17 = vmax.f32 %v6606_v16, 0.0  ;;  %v3250_v11 = vsel %vm5860_vm5, %v6880_v45, 0.0 }
 0x741   :  { %v6991_v47 = vpack.c.bf16 %v3508_v50, %v3507_v4  ;;  %v3484_v61 = vadd.f32 %v3243_v20, %v7676_v7 }
 0x742   :  { %v6996_v53 = vpack.c.bf16 %v3506_v38, %v3505_v3  ;;  %v4681_v23 = vpop.f32.mrb[160].mxu1  ;;  %v3483_v3 = vadd.f32 %v3242_v52, %v7674_v17  ;;  %v7681_v52 = vmax.f32 %v6642_v43, 0.0  ;;  %v3251_v17 = vsel %vm5860_vm5, %v6886_v34, 0.0 }
 0x743   :  { %v3383_v30 = vadd.f32 %v6945_v9, %v4681_v23  ;;  %v3374_v59 = vpop.f32.mrb[161].mxu1  ;;  %v3249_v43 = vsel %vm5860_vm5, %v6889_v37, 0.0  ;;  %v7685_v37 = vld [vmem:[#allocation3_spill] sm:$0xff] }
 0x744   :  { %v3375_v26 = vadd.f32 %v6945_v9, %v3374_v59  ;;  %v4682_v19 = vpop.f32.mrb[162].mxu1 }
 0x745   :  { %v3511_v48 = vadd.f32 %v3479_v39, %v3383_v30  ;;  %v3386_v44 = vadd.f32 %v6945_v9, %v4682_v19  ;;  %v3377_v31 = vpop.f32.mrb[163].mxu1  ;;  %v7677_v39 = vmax.f32 %v6612_v42, 0.0  ;;  %v3247_v42 = vsel %vm5860_vm5, %v6870_v63, 0.0 }
 0x746   :  { %v3509_v54 = vadd.f32 %v3477_v1, %v3375_v26  ;;  %v3378_v22 = vadd.f32 %v6945_v9, %v3377_v31  ;;  %v3485_v31 = vadd.f32 %v3244_v33, %v7679_v29  ;;  %v7680_v63 = vmax.f32 %v6639_v8, 0.0 }
 0x747   :  { %v3512_v25 = vadd.f32 %v3480_v0, %v3386_v44  ;;  %v3482_v36 = vadd.f32 %v3241_v28, %v7677_v39  ;;  %v3487_v0 = vadd.f32 %v3246_v62, %v7678_v58  ;;  %v3248_v8 = vsel %vm5860_vm5, %v6883_v40, 0.0  ;;  %v7687_v62 = vld [vmem:[#allocation49_spill] sm:$0xff] }
 0x748   :  { %v3510_v4 = vadd.f32 %v3478_v35, %v3378_v22 }
 0x749   :  { %v7019_v18 = vpack.c.bf16 %v3512_v25, %v3511_v48 }
 0x74a   :  { %v7024_v10 = vpack.c.bf16 %v3510_v4, %v3509_v54  ;;  %v4685_v41 = vpop.f32.mrb[164].mxu1  ;;  %v3488_v54 = vadd.f32 %v3247_v42, %v7680_v63  ;;  %v3486_v4 = vadd.f32 %v3245_v27, %v7681_v52  ;;  %v7688_v42 = vld [vmem:[#allocation50_spill] sm:$0xff] }
 0x74b   :  { %v3399_v46 = vadd.f32 %v6945_v9, %v4685_v41  ;;  %v3390_v50 = vpop.f32.mrb[165].mxu1 }
 0x74c   :  { %v3391_v38 = vadd.f32 %v6945_v9, %v3390_v50  ;;  %v4686_v2 = vpop.f32.mrb[166].mxu1  ;;  %v7682_v50 = vmax.f32 %v6660_v32, 0.0  ;;  %v3590_v32 = vmul.bf16 %v6968_v12, %v6968_v12 }
 0x74d   :  { %v3515_v23 = vadd.f32 %v3483_v3, %v3399_v46  ;;  %v3402_v16 = vadd.f32 %v6945_v9, %v4686_v2  ;;  %v3393_v24 = vpop.f32.mrb[167].mxu1  ;;  %v7684_v2 = vmax.f32 %v6667_v56, 0.0 }
 0x74e   :  { %v3513_v13 = vadd.f32 %v3481_v6, %v3391_v38  ;;  %v3394_v30 = vadd.f32 %v6945_v9, %v3393_v24  ;;  %v3491_v14 = vadd.f32 %v3250_v11, %v7682_v50  ;;  %v7683_v38 = vmax.f32 %v6663_v15, 0.0 }
 0x74f   :  { %v3516_v59 = vadd.f32 %v3484_v61, %v3402_v16  ;;  %v3492_v7 = vadd.f32 %v3251_v17, %v7684_v2  ;;  %v7686_v16 = vmax.f32 %v7685_v37, 0.0  ;;  %v3591_v11 = vmul.bf16 %v6963_v5, %v6963_v5  ;;  %v7700_v2 = vld [vmem:[#allocation9_spill] sm:$0xff] }
 0x750   :  { %v3514_v55 = vadd.f32 %v3482_v36, %v3394_v30  ;;  %v3489_v40 = vadd.f32 %v3248_v8, %v7683_v38 }
 0x751   :  { %v7047_v1 = vpack.c.bf16 %v3516_v59, %v3515_v23  ;;  %v3490_v24 = vadd.f32 %v3249_v43, %v7686_v16  ;;  %v7702_v16 = vld [vmem:[#allocation6_spill] sm:$0xff] }
 0x752   :  { %v7052_v26 = vpack.c.bf16 %v3514_v55, %v3513_v13  ;;  %v4689_v19 = vpop.f32.mrb[168].mxu1  ;;  %v3254_v55 = vsel %vm5860_vm5, %v7687_v62, 0.0 }
 0x753   :  { %v3415_v48 = vadd.f32 %v6945_v9, %v4689_v19  ;;  %v3406_v44 = vpop.f32.mrb[169].mxu1  ;;  %v3252_v19 = vsel %vm5860_vm5, %v7688_v42, 0.0 }
 0x754   :  { %v3407_v21 = vadd.f32 %v6945_v9, %v3406_v44  ;;  %v4690_v35 = vpop.f32.mrb[170].mxu1  ;;  %v7690_v44 = vld [vmem:[#allocation4_spill] sm:$0xff] }
 0x755   :  { %v3519_v22 = vadd.f32 %v3487_v0, %v3415_v48  ;;  %v3418_v57 = vadd.f32 %v6945_v9, %v4690_v35  ;;  %v3409_v25 = vpop.f32.mrb[171].mxu1  ;;  %v7691_v29 = vmax.f32 %v7690_v44, 0.0 }
 0x756   :  { %v3517_v51 = vadd.f32 %v3485_v31, %v3407_v21  ;;  %v3410_v49 = vadd.f32 %v6945_v9, %v3409_v25  ;;  %v7692_v21 = vld [vmem:[#allocation10_spill] sm:$0xff] }
 0x757   :  { %v3520_v20 = vadd.f32 %v3488_v54, %v3418_v57  ;;  %v3495_v31 = vadd.f32 %v3254_v55, %v7691_v29  ;;  %v3253_v35 = vsel %vm5860_vm5, %v7692_v21, 0.0 }
 0x758   :  { %v3518_v41 = vadd.f32 %v3486_v4, %v3410_v49 }
 0x759   :  { %v3542_v3 = vpack.c.bf16 %v3520_v20, %v3519_v22  ;;  %v7693_v22 = vld [vmem:[#allocation45_spill] sm:$0xff] }
 0x75a   :  { %v4693_v28 = vpop.f32.mrb[172].mxu1  ;;  %v3541_v46 = vpack.c.bf16 %v3518_v41, %v3517_v51  ;;  %v7694_v57 = vmax.f32 %v7693_v22, 0.0  ;;  %v7695_v51 = vld [vmem:[#allocation46_spill] sm:$0xff] }
 0x75b   :  { %v3431_v45 = vadd.f32 %v6945_v9, %v4693_v28  ;;  %v3422_v6 = vpop.f32.mrb[173].mxu1  ;;  %v3599_v30 = vmul.bf16 %v3542_v3, %v3542_v3  ;;  %v7696_v49 = vmax.f32 %v7695_v51, 0.0  ;;  %v3597_v51 = vmul.bf16 %v7047_v1, %v7047_v1 }
 0x75c   :  { %v3423_v34 = vadd.f32 %v6945_v9, %v3422_v6  ;;  %v4694_v61 = vpop.f32.mrb[174].mxu1  ;;  %4199 = vmatprep.subr.bf16.mxu0 %v3541_v46  ;;  %v3598_v23 = vmul.bf16 %v3541_v46, %v3541_v46  ;;  %v3493_v25 = vadd.f32 %v3252_v19, %v7694_v57  ;;  %v7699_v6 = vld [vmem:[#allocation52_spill] sm:$0xff] }
 0x75d   :  { %v3523_v39 = vadd.f32 %v3491_v14, %v3431_v45  ;;  %v3434_v36 = vadd.f32 %v6945_v9, %v4694_v61  ;;  %v3425_v13 = vpop.f32.mrb[175].mxu1  ;;  %4200 = vmatpush3.bf16.xpose.msra.mxu0 %v6968_v12  ;;  %v7689_v12 = vld [vmem:[#allocation51_spill] sm:$0xff]  ;;  %v3258_v38 = vsel %vm5860_vm5, %v7699_v6, 0.0 }
 0x75e   :  { %v3521_v15 = vadd.f32 %v3489_v40, %v3423_v34  ;;  %v3426_v56 = vadd.f32 %v6945_v9, %v3425_v13  ;;  %4201 = vmatprep.subr.bf16.mxu0 %v3542_v3  ;;  %4217 = vmatprep.subr.bf16.mxu1 %v3598_v23  ;;  %v3255_v0 = vsel %vm5860_vm5, %v7689_v12, 0.0  ;;  %v7697_v3 = vld [vmem:[#allocation47_spill] sm:$0xff]  ;;  %v3592_v12 = vmul.bf16 %v6996_v53, %v6996_v53 }
 0x75f   :  { %v3524_v59 = vadd.f32 %v3492_v7, %v3434_v36  ;;  %4218 = vmatpush3.bf16.xpose.msra.mxu1 %v3590_v32  ;;  %v3496_v20 = vadd.f32 %v3255_v0, %v7696_v49  ;;  %v7698_v43 = vmax.f32 %v7697_v3, 0.0  ;;  %v7701_v34 = vld [vmem:[#allocation11_spill] sm:$0xff]  ;;  %v7712_v49 = vmov 1065369472  }
 0x760   :  { %v3522_v33 = vadd.f32 %v3490_v24, %v3426_v56  ;;  %4219 = vmatprep.subr.bf16.mxu1 %v3599_v30  ;;  %v3259_v61 = vsel %vm5860_vm5, %v7701_v34, 0.0  ;;  %v7703_v24 = vmax.f32 %v7702_v16, 0.0  ;;  %v7705_v56 = vld [vmem:[#allocation48_spill] sm:$0xff] }
 0x761   :  { %v3544_v58 = vpack.c.bf16 %v3524_v59, %v3523_v39  ;;  %v3494_v28 = vadd.f32 %v3253_v35, %v7698_v43  ;;  %v7704_v39 = vld [vmem:[#allocation12_spill] sm:$0xff]  ;;  %v7706_v30 = vmax.f32 %v7705_v56, 0.0 }
 0x762   :  { %v4697_v27 = vpop.f32.mrb[176].mxu1  ;;  %v3543_v48 = vpack.c.bf16 %v3522_v33, %v3521_v15  ;;  %v3499_v32 = vadd.f32 %v3258_v38, %v7703_v24  ;;  %v3257_v36 = vsel %vm5860_vm5, %v7704_v39, 0.0  ;;  %v7707_v33 = vld [vmem:[#allocation5_spill] sm:$0xff] }
 0x763   :  { %v3447_v63 = vadd.f32 %v6945_v9, %v4697_v27  ;;  %v3438_v54 = vpop.f32.mrb[177].mxu1  ;;  %v7708_v42 = vmax.f32 %v7707_v33, 0.0  ;;  %v3601_v35 = vmul.bf16 %v3544_v58, %v3544_v58 }
 0x764   :  { %v3439_v52 = vadd.f32 %v6945_v9, %v3438_v54  ;;  %v4698_v4 = vpop.f32.mrb[178].mxu1  ;;  %v3600_v14 = vmul.bf16 %v3543_v48, %v3543_v48 }
 0x765   :  { %v3527_v41 = vadd.f32 %v3495_v31, %v3447_v63  ;;  %v3450_v8 = vadd.f32 %v6945_v9, %v4698_v4  ;;  %v3441_v17 = vpop.f32.mrb[179].mxu1  ;;  %4202 = vmatpush3.bf16.xpose.msra.mxu0 %v6963_v5  ;;  %v3256_v5 = vsel %vm5860_vm5, %v7700_v2, 0.0  ;;  %v3500_v19 = vadd.f32 %v3259_v61, %v7708_v42 }
 0x766   :  { %v3525_v46 = vadd.f32 %v3493_v25, %v3439_v52  ;;  %v3442_v50 = vadd.f32 %v6945_v9, %v3441_v17  ;;  %4203 = vmatprep.subr.bf16.mxu0 %v3543_v48  ;;  %v3497_v59 = vadd.f32 %v3256_v5, %v7706_v30  ;;  %v7709_v48 = vld [vmem:[#allocation7_spill] sm:$0xff]  ;;  %v3593_v25 = vmul.bf16 %v6991_v47, %v6991_v47 }
 0x767   :  { %v3528_v45 = vadd.f32 %v3496_v20, %v3450_v8  ;;  %4220 = vmatpush3.bf16.xpose.msra.mxu1 %v3591_v11  ;;  %v7710_v44 = vmax.f32 %v7709_v48, 0.0  ;;  %v3595_v52 = vmul.bf16 %v7019_v18, %v7019_v18  ;;  %v3596_v4 = vmul.bf16 %v7052_v26, %v7052_v26 }
 0x768   :  { %v3526_v40 = vadd.f32 %v3494_v28, %v3442_v50  ;;  %4221 = vmatprep.subr.bf16.mxu1 %v3600_v14  ;;  %v7713_v50 = vld [vmem:[#allocation85_spill] sm:$0xff] }
 0x769   :  { %v3546_v7 = vpack.c.bf16 %v3528_v45, %v3527_v41  ;;  %v3498_v29 = vadd.f32 %v3257_v36, %v7710_v44  ;;  %v3655_v14 = vsub.s32 0, %v7713_v50 }
 0x76a   :  { %v4701_v23 = vpop.f32.mrb[180].mxu1  ;;  %v3545_v37 = vpack.c.bf16 %v3526_v40, %v3525_v46 }
 0x76b   :  { %v3463_v13 = vadd.f32 %v6945_v9, %v4701_v23  ;;  %v3454_v15 = vpop.f32.mrb[181].mxu1 }
 0x76c   :  { %v3455_v62 = vadd.f32 %v6945_v9, %v3454_v15  ;;  %v4702_v55 = vpop.f32.mrb[182].mxu1 }
 0x76d   :  { %v3531_v0 = vadd.f32 %v3499_v32, %v3463_v13  ;;  %v3466_v27 = vadd.f32 %v6945_v9, %v4702_v55  ;;  %v3457_v60 = vpop.f32.mrb[183].mxu1  ;;  %4204 = vmatpush3.bf16.xpose.msra.mxu0 %v6996_v53  ;;  %v3602_v53 = vmul.bf16 %v3545_v37, %v3545_v37 }
 0x76e   :  { %v3529_v31 = vadd.f32 %v3497_v59, %v3455_v62  ;;  %v3458_v21 = vadd.f32 %v6945_v9, %v3457_v60  ;;  %4205 = vmatprep.subr.bf16.mxu0 %v3544_v58  ;;  %v3594_v9 = vmul.bf16 %v7024_v10, %v7024_v10  ;;  %v3603_v58 = vmul.bf16 %v3546_v7, %v3546_v7 }
 0x76f   :  { %v3532_v63 = vadd.f32 %v3500_v19, %v3466_v27  ;;  %4222 = vmatpush3.bf16.xpose.msra.mxu1 %v3592_v12  ;;  %v3916_v19 = vld [vmem:[%s7206_s3] ss:$0 sm:$0xff]  ;;  %v3919_v12 = vld [vmem:[%s7206_s3 + $0x1] ss:$0 sm:$0xff] }
 0x770   :  { %v3530_v54 = vadd.f32 %v3498_v29, %v3458_v21  ;;  %4223 = vmatprep.subr.bf16.mxu1 %v3601_v35  ;;  %vm3690_vm7 = vcmp.eq.s32.totalorder %v7713_v50, %v3916_v19  ;;  %vm3728_vm8 = vcmp.eq.s32.totalorder %v7713_v50, %v3919_v12 }
 0x771   :  { %v3548_v22 = vpack.c.bf16 %v3532_v63, %v3531_v0 }
 0x772   :  { %v3547_v57 = vpack.c.bf16 %v3530_v54, %v3529_v31 }
 0x775   :  { %4206 = vmatpush3.bf16.xpose.msra.mxu0 %v6991_v47  ;;  %v3604_v47 = vmul.bf16 %v3547_v57, %v3547_v57 }
 0x776   :  { %4207 = vmatprep.subr.bf16.mxu0 %v3545_v37 }
 0x777   :  { %4224 = vmatpush3.bf16.xpose.msra.mxu1 %v3593_v25 }
 0x778   :  { %4225 = vmatprep.subr.bf16.mxu1 %v3602_v53 }
 0x77d   :  { %4208 = vmatpush3.bf16.xpose.msra.mxu0 %v7024_v10  ;;  %v3605_v10 = vmul.bf16 %v3548_v22, %v3548_v22 }
 0x77e   :  { %4209 = vmatprep.subr.bf16.mxu0 %v3546_v7 }
 0x77f   :  { %4226 = vmatpush3.bf16.xpose.msra.mxu1 %v3594_v9 }
 0x780   :  { %4227 = vmatprep.subr.bf16.mxu1 %v3603_v58 }
 0x785   :  { %4210 = vmatpush3.bf16.xpose.msra.mxu0 %v7019_v18  ;;  %v7711_v18 = vld [vmem:[#allocation8_spill] sm:$0xff] }
 0x786   :  { %4211 = vmatprep.subr.bf16.mxu0 %v3547_v57 }
 0x787   :  { %4228 = vmatpush3.bf16.xpose.msra.mxu1 %v3595_v52 }
 0x788   :  { %4229 = vmatprep.subr.bf16.mxu1 %v3604_v47 }
 0x78d   :  { %4212 = vmatpush3.bf16.xpose.msra.mxu0 %v7052_v26 }
 0x78e   :  { %4213 = vmatprep.subr.bf16.mxu0 %v3548_v22 }
 0x78f   :  { %4230 = vmatpush3.bf16.xpose.msra.mxu1 %v3596_v4 }
 0x790   :  { %4231 = vmatprep.subr.bf16.mxu1 %v3605_v10 }
 0x795   :  { %4214 = vmatpush3.bf16.xpose.msra.mxu0 %v7047_v1 }
 0x797   :  { %4232 = vmatpush3.bf16.xpose.msra.mxu1 %v3597_v51 }
 0x79c   :  { %4216 = vmatmul.mubr.bf16.vlgmr.msra.gmra.mrb[208].mxu0 %v7711_v18 }
 0x79e   :  { %4234 = vmatmul.mubr.bf16.vlgmr.msra.gmra.mrb[184].mxu1 %v7712_v49 }
 0x86f   :  { %v3583_v20 = vpop.f32.mrb[208].mxu0 }
 0x870   :  { %v3585_v11 = vpop.f32.mrb[209].mxu0 }
 0x871   :  { %v3587_v41 = vpop.f32.mrb[210].mxu0  ;;  %v3640_v8 = vpop.f32.mrb[184].mxu1 }
 0x872   :  { %v3647_v17 = vmax.f32 %v3640_v8, 1e-16  ;;  %v3588_v26 = vpop.f32.mrb[211].mxu0  ;;  %v3642_v3 = vpop.f32.mrb[185].mxu1 }
 0x873   :  { %v3648_v43 = vmax.f32 %v3642_v3, 1e-16  ;;  %v3644_v28 = vpop.f32.mrb[186].mxu1 }
 0x874   :  { %4794 = vrsqrt.f32 %v3647_v17  ;;  %v3645_v46 = vpop.f32.mrb[187].mxu1 }
 0x875   :  { %4796 = vrsqrt.f32 %v3648_v43 }
 0x87e   :  { %v4795_v1 = vpop.eup %4794 }
 0x87f   :  { %v4797_v45 = vpop.eup %4796  ;;  %v3651_v6 = vmul.f32 10.0, %v4795_v1 }
 0x880   :  { %v3652_v38 = vmul.f32 10.0, %v4797_v45 }
 0x881   :  { %v3656_v40 = vrot.slane %v3651_v6, %v3655_v14 }
 0x882   :  { %v3660_v2 = vrot.slane %v3652_v38, %v3655_v14 }
 0x883   :  { %v3661_v5 = vmul.f32 %v3656_v40, %v3583_v20 }
 0x884   :  { %v3662_v7 = vmul.f32 %v3660_v2, %v3585_v11 }
 0x885   :  { %3663 = vst [vmem:[%s7205_s12] sm:$0x7] %v3661_v5  ;;  %v3664_v34 = vsel %vm2433_vm6, %v3661_v5, -inf }
 0x886   :  { %v3665_v61 = vrot.slane %v3664_v34, 4  ;;  %3917 = vst [vmem:[%s7205_s12 + $0x4] sm:$0x7] %v3662_v7  ;;  %v3703_v23 = vsel %vm2433_vm6, %v3662_v7, -inf }
 0x887   :  { %v3704_v37 = vrot.slane %v3703_v23, 4 }
 0x888   :  { %v3666_v16 = vmax.f32 %v3664_v34, %v3665_v61 }
 0x889   :  { %v3705_v24 = vmax.f32 %v3703_v23, %v3704_v37 }
 0x88a   :  { %v3667_v32 = vrot.slane %v3666_v16, 2 }
 0x88b   :  { %v3706_v39 = vrot.slane %v3705_v24, 2 }
 0x88c   :  { %v3668_v36 = vmax.f32 %v3666_v16, %v3667_v32 }
 0x88d   :  { %v3707_v13 = vmax.f32 %v3705_v24, %v3706_v39 }
 0x88e   :  { %v3669_v15 = vrot.slane %v3668_v36, 1 }
 0x88f   :  { %v3708_v56 = vrot.slane %v3707_v13, 1 }
 0x890   :  { %v3670_v30 = vmax.f32 %v3668_v36, %v3669_v15 }
 0x891   :  { %v3709_v59 = vmax.f32 %v3707_v13, %v3708_v56 }
 0x892   :  { %v3671_v62 = vsub.f32 %v3661_v5, %v3670_v30 }
 0x893   :  { %v3710_v55 = vsub.f32 %v3662_v7, %v3709_v59 }
 0x894   :  { %v3672_v33 = vmul.f32 1.442695, %v3671_v62  ;;  %v3691_v0 = vsel %vm3690_vm7, %v3671_v62, 0.0 }
 0x895   :  { %v3711_v42 = vmul.f32 1.442695, %v3710_v55  ;;  %v3729_v60 = vsel %vm3728_vm8, %v3710_v55, 0.0  ;;  %v3692_v31 = vsel %vm2433_vm6, %v3691_v0, 0.0 }
 0x896   :  { %4798 = vpow2.f32 %v3672_v33  ;;  %v3730_v63 = vsel %vm2433_vm6, %v3729_v60, 0.0  ;;  %v3693_v22 = vrot.slane %v3692_v31, 4 }
 0x897   :  { %4800 = vpow2.f32 %v3711_v42  ;;  %v3731_v53 = vrot.slane %v3730_v63, 4 }
 0x898   :  { %v3694_v52 = vadd.f32 %v3693_v22, %v3692_v31 }
 0x899   :  { %v3732_v10 = vadd.f32 %v3731_v53, %v3730_v63 }
 0x89a   :  { %v3695_v49 = vrot.slane %v3694_v52, 2 }
 0x89b   :  { %v3733_v11 = vrot.slane %v3732_v10, 2 }
 0x89c   :  { %v3696_v41 = vadd.f32 %v3695_v49, %v3694_v52 }
 0x89d   :  { %v3734_v8 = vadd.f32 %v3733_v11, %v3732_v10 }
 0x89e   :  { %v3697_v17 = vrot.slane %v3696_v41, 1 }
 0x89f   :  { %v3735_v26 = vrot.slane %v3734_v8, 1 }
 0x8a0   :  { %v4799_v27 = vpop.eup %4798  ;;  %v3698_v46 = vadd.f32 %v3697_v17, %v3696_v41 }
 0x8a1   :  { %v4801_v48 = vpop.eup %4800  ;;  %v3674_v44 = vsel %vm2433_vm6, %v4799_v27, 0.0  ;;  %v3736_v14 = vadd.f32 %v3735_v26, %v3734_v8 }
 0x8a2   :  { %v3675_v29 = vrot.slane %v3674_v44, 4  ;;  %v3713_v21 = vsel %vm2433_vm6, %v4801_v48, 0.0 }
 0x8a3   :  { %v3714_v35 = vrot.slane %v3713_v21, 4 }
 0x8a4   :  { %v3676_v54 = vadd.f32 %v3675_v29, %v3674_v44 }
 0x8a5   :  { %v3715_v57 = vadd.f32 %v3714_v35, %v3713_v21 }
 0x8a6   :  { %v3677_v25 = vrot.slane %v3676_v54, 2 }
 0x8a7   :  { %v3716_v9 = vrot.slane %v3715_v57, 2 }
 0x8a8   :  { %v3678_v58 = vadd.f32 %v3677_v25, %v3676_v54 }
 0x8a9   :  { %v3717_v47 = vadd.f32 %v3716_v9, %v3715_v57 }
 0x8aa   :  { %v3679_v4 = vrot.slane %v3678_v58, 1 }
 0x8ab   :  { %v3718_v51 = vrot.slane %v3717_v47, 1 }
 0x8ac   :  { %v3680_v18 = vadd.f32 %v3679_v4, %v3678_v58 }
 0x8ad   :  { %v3719_v20 = vadd.f32 %v3718_v51, %v3717_v47 }
 0x8ae   :  { %4802 = vlog2.f32 %v3680_v18 }
 0x8af   :  { %4804 = vlog2.f32 %v3719_v20 }
 0x8b8   :  { %v4803_v3 = vpop.eup %4802 }
 0x8b9   :  { %v4805_v43 = vpop.eup %4804  ;;  %v3682_v28 = vmul.f32 0.6931472, %v4803_v3 }
 0x8ba   :  { %v3721_v50 = vmul.f32 0.6931472, %v4805_v43 }
 0x8bb   :  { %v3699_v1 = vsub.f32 %v3682_v28, %v3698_v46 }
 0x8bc   :  { %v3737_v45 = vsub.f32 %v3721_v50, %v3736_v14 }
 0x8bd   :  { %3700 = vst [vmem:[%s7207_s13] sm:$0x1] %v3699_v1 }
 0x8be   :  { %3920 = vst [vmem:[%s7207_s13 + $0x1] sm:$0x1] %v3737_v45 }

</bundles_post_ra>
